<compile_context>
chip_gen: v7x
topology: tpu7x:2x2x1
jax: 0.10.0
libtpu: 0.0.40
codegen_flags: <defaults>
</compile_context>

<pallas_src>
import functools

import jax
import jax.numpy as jnp
from jax import lax
from jax.experimental import pallas as pl
from jax.experimental.pallas import tpu as pltpu


def _round_up(x, m):
    return (x + m - 1) // m * m


def _pick_tile(n_p, cap):
    """Largest multiple-of-128 tile <= cap that divides n_p (n_p % 128 == 0)."""
    t = min(cap, n_p)
    while n_p % t:
        t -= 128
    return t


# ---------------------------------------------------------------------------
# Pass 1: per-node linears (computed once, not per src step).
# ---------------------------------------------------------------------------
def _node_kernel(h_ref, att_ref, deg_ref, wn_ref, bn_ref, wa1_ref, wa2_ref,
                 ba_ref, base_ref, g_ref):
    f32 = jnp.float32
    h1 = jnp.dot(h_ref[...], wn_ref[...], preferred_element_type=f32) + bn_ref[...]
    g = jnp.dot(att_ref[...] * h1, wa2_ref[...], preferred_element_type=f32)
    # base = h1 @ Wa1 + ba + indeg * ((att*h1) @ Wa2)   (dst self term, f32)
    base_ref[...] = (jnp.dot(h1, wa1_ref[...], preferred_element_type=f32)
                     + ba_ref[...] + deg_ref[...] * g)
    g_ref[...] = g.astype(g_ref.dtype)


# ---------------------------------------------------------------------------
# Pass 2: edge reduction.  grid = (dst tiles [parallel], src tiles [arbitrary]).
# ---------------------------------------------------------------------------
def _edge_kernel(adjT_ref, g_ref, w_ref, rel_ref, base_ref, wz2_ref,
                 out_ref, wrel_acc, *, rdim, src_chunk):
    f32 = jnp.float32
    k = pl.program_id(1)

    @pl.when(k == 0)
    def _init():
        out_ref[...] = base_ref[...]
        wrel_acc[...] = jnp.zeros_like(wrel_acc)

    # z1 path:  (TM dst, TK src) @ (TK src, Dout_p) -- bf16 MXU, f32 accumulate.
    out_ref[...] += jnp.dot(adjT_ref[...], g_ref[...],
                            preferred_element_type=f32)

    # z2 path:  wrel[r, v] += sum_u w[u, v] * rel[r, u, v]       (rows 0..R-1)
    #           wrel[R, v] += sum_u w[u, v]                      (rel_fc bias row)
    # Chunked over src (16 rows = one bf16 sublane pack), unrolled so the LLO
    # scheduler sees everything; wrel rows accumulate straight into the VMEM
    # scratch (narrow live ranges); the bias row is carried in registers.
    tile_k = w_ref.shape[0]
    tile_m = w_ref.shape[1]

    def body(s, bias_acc):
        start = pl.multiple_of(s * src_chunk, src_chunk)
        wc = w_ref[pl.ds(start, src_chunk), :].astype(f32)            # (ch, TM)
        rc = rel_ref[:, pl.ds(start, src_chunk), :].astype(f32)       # (R, ch, TM)
        wrel_acc[:rdim, :] += jnp.sum(wc[None, :, :] * rc, axis=1)    # (R, TM)
        return bias_acc + jnp.sum(wc, axis=0, keepdims=True)          # (1, TM)

    bias = lax.fori_loop(0, tile_k // src_chunk, body,
                         jnp.zeros((1, tile_m), f32), unroll=True)
    wrel_acc[rdim:, :] += bias

    @pl.when(k == pl.num_programs(1) - 1)
    def _finalize():
        # (R+1, TM)^T @ (R+1, Dout_p) -> (TM, Dout_p)
        z2 = lax.dot_general(wrel_acc[...], wz2_ref[...],
                             (((0,), (0,)), ((), ())),
                             preferred_element_type=f32)
        out_ref[...] = jnp.maximum(out_ref[...] + z2, 0.0)


# ---------------------------------------------------------------------------
# Wrapper
# ---------------------------------------------------------------------------
@jax.jit
def image_gcn_forward(h, att_n, adj, att_e, rel, params):
    """h: (N, Din); att_n: (N, 1); adj: (N, N) src x dst (0/1 float);
    att_e: (N, N, 1); rel: (N, N, R).  Returns (N, Dout) f32."""
    f32, bf16 = jnp.float32, jnp.bfloat16
    N, din = h.shape
    rdim = rel.shape[-1]
    wn, bn, wr, br, wa, ba = params          # weights (in, out); biases (1, out)
    dout = wa.shape[1]

    n_p = _round_up(N, 128)                  # node-count padding
    dout_p = _round_up(dout, 128)            # lane-dense output features

    # Tiles: decoupled dst (TM) / src (TK); keep >=2 dst tiles when possible so
    # both v7x TensorCores get work on the "parallel" axis.
    tk = _pick_tile(n_p, 512)                # src / reduction tile (MXU depth)
    tm = _pick_tile(n_p, 256)                # dst tile
    while tm > 128 and n_p // tm < 2:
        tm //= 2
    n_m, n_k = n_p // tm, n_p // tk

    # ---- weight prep (tiny one-time glue) ----------------------------------
    wa1 = jnp.pad(wa[:din], ((0, 0), (0, dout_p - dout)))             # h slice
    wa2 = jnp.pad(wa[din:2 * din], ((0, 0), (0, dout_p - dout)))      # z1 slice
    wa3 = jnp.pad(wa[2 * din:], ((0, 0), (0, dout_p - dout)))         # z2 slice
    ba_p = jnp.pad(ba, ((0, 0), (0, dout_p - dout)))
    # rel_fc folded with apply_fc's z2 slice; last row carries rel_fc's bias
    # (matched in-kernel by the w column-sum row of the accumulator).
    wz2 = jnp.concatenate([wr, br], axis=0) @ wa3                     # (R+1, Dout_p)

    # ---- node-side inputs ---------------------------------------------------
    pad_n = (0, n_p - N)
    h_p = jnp.pad(h, (pad_n, (0, 0)))
    att_p = jnp.pad(att_n, (pad_n, (0, 0)))
    deg_p = jnp.pad(jnp.sum(adj, axis=0)[:, None], (pad_n, (0, 0)))   # in-degree

    # ---- edge-side streams (bf16, no constant-1 channel) --------------------
    pad_nn = (pad_n, pad_n)
    adjT = jnp.pad(adj.T.astype(bf16), pad_nn)                        # (dst, src)
    w_sd = jnp.pad((adj * att_e[..., 0]).astype(bf16), pad_nn)        # (src, dst)
    rel_t = jnp.pad(jnp.transpose(rel, (2, 0, 1)).astype(bf16),       # (R, src, dst)
                    ((0, 0), pad_n, pad_n))

    # ---- pass 1: node linears ----------------------------------------------
    base, g = pl.pallas_call(
        _node_kernel,
        out_shape=(jax.ShapeDtypeStruct((n_p, dout_p), f32),
                   jax.ShapeDtypeStruct((n_p, dout_p), bf16)),
        grid=(n_m,),
        in_specs=[
            pl.BlockSpec((tm, din), lambda i: (i, 0)),
            pl.BlockSpec((tm, 1), lambda i: (i, 0)),
            pl.BlockSpec((tm, 1), lambda i: (i, 0)),
            pl.BlockSpec((din, din), lambda i: (0, 0)),
            pl.BlockSpec((1, din), lambda i: (0, 0)),
            pl.BlockSpec((din, dout_p), lambda i: (0, 0)),
            pl.BlockSpec((din, dout_p), lambda i: (0, 0)),
            pl.BlockSpec((1, dout_p), lambda i: (0, 0)),
        ],
        out_specs=(pl.BlockSpec((tm, dout_p), lambda i: (i, 0)),
                   pl.BlockSpec((tm, dout_p), lambda i: (i, 0))),
        compiler_params=pltpu.CompilerParams(
            dimension_semantics=("parallel",)),
    )(h_p, att_p, deg_p, wn, bn, wa1, wa2, ba_p)

    # ---- pass 2: dst-tile x src-tile edge reduction -------------------------
    out_p = pl.pallas_call(
        functools.partial(_edge_kernel, rdim=rdim, src_chunk=16),
        out_shape=jax.ShapeDtypeStruct((n_p, dout_p), f32),
        grid=(n_m, n_k),
        in_specs=[
            pl.BlockSpec((tm, tk), lambda i, k: (i, k)),              # adj^T
            pl.BlockSpec((tk, dout_p), lambda i, k: (k, 0)),          # g (src)
            pl.BlockSpec((tk, tm), lambda i, k: (k, i)),              # w (src,dst)
            pl.BlockSpec((rdim, tk, tm), lambda i, k: (0, k, i)),     # rel
            pl.BlockSpec((tm, dout_p), lambda i, k: (i, 0)),          # base (dst)
            pl.BlockSpec((rdim + 1, dout_p), lambda i, k: (0, 0)),    # wz2
        ],
        out_specs=pl.BlockSpec((tm, dout_p), lambda i, k: (i, 0)),
        scratch_shapes=[pltpu.VMEM((rdim + 1, tm), f32)],
        compiler_params=pltpu.CompilerParams(
            dimension_semantics=("parallel", "arbitrary")),
    )(adjT, g, w_sd, rel_t, base, wz2)

    return out_p[:N, :dout]


# ---------------------------------------------------------------------------
# Pure-JAX reference (f32) of the same forward pass, for validation.
# ---------------------------------------------------------------------------
def image_gcn_reference(h, att_n, adj, att_e, rel, params):
    wn, bn, wr, br, wa, ba = params
    h1 = h @ wn + bn
    ah = att_n * h1
    z1 = adj.T @ ah + jnp.sum(adj, axis=0)[:, None] * ah
    relp = rel @ wr + br                       # (N, N, R)
    w = adj[..., None] * att_e                 # (N, N, 1)
    z2 = jnp.sum(w * relp, axis=0)             # (N, R)
    hcat = jnp.concatenate([h1, z1, z2], axis=1)
    return jax.nn.relu(hcat @ wa + ba)


def init_params(key, in_dim, out_dim, rel_dim):
    """Deterministic PyTorch-Linear-style init; weights (in, out), biases (1, out)."""
    ks = jax.random.split(key, 6)

    def lin(kw, kb, fan_in, fan_out):
        bound = 1.0 / jnp.sqrt(fan_in)
        w = jax.random.uniform(kw, (fan_out, fan_in), jnp.float32, -bound, bound)
        b = jax.random.uniform(kb, (fan_out,), jnp.float32, -bound, bound)
        return w.T, b.reshape(1, fan_out)

    wn, bn = lin(ks[0], ks[1], in_dim, in_dim)                       # node_fc
    wr, br = lin(ks[2], ks[3], rel_dim, rel_dim)                     # rel_fc
    wa, ba = lin(ks[4], ks[5], in_dim + rel_dim + in_dim, out_dim)   # apply_fc
    return wn, bn, wr, br, wa, ba


if __name__ == "__main__":
    # Small graph-layer shapes: 200 image-region nodes, dense edge features.
    N, in_dim, rel_dim, out_dim = 200, 16, 8, 32

    key = jax.random.PRNGKey(0)
    k_h, k_an, k_adj, k_ae, k_rel, k_par = jax.random.split(key, 6)

    h = jax.random.normal(k_h, (N, in_dim), jnp.float32)
    att_n = jax.random.uniform(k_an, (N, 1), jnp.float32)
    adj = (jax.random.uniform(k_adj, (N, N)) < 0.3).astype(jnp.float32)   # src x dst
    att_e = jax.random.uniform(k_ae, (N, N, 1), jnp.float32)
    rel = jax.random.normal(k_rel, (N, N, rel_dim), jnp.float32)

    params = init_params(k_par, in_dim, out_dim, rel_dim)

    out = jax.block_until_ready(image_gcn_forward(h, att_n, adj, att_e, rel, params))
    ref = jax.block_until_ready(image_gcn_reference(h, att_n, adj, att_e, rel, params))

    assert out.shape == (N, out_dim), out.shape
    err = float(jnp.max(jnp.abs(out - ref)))
    # bf16 streamed edge data => loosened tolerance vs the f32 reference.
    assert jnp.allclose(out, ref, rtol=2e-2, atol=1e-1), f"max abs err {err}"
    print("KERNEL_OK")
</pallas_src>

<mosaic_0001>
module attributes {stable_mosaic.version = 11 : i64} {
  func.func @_node_kernel(%arg0: i32, %arg1: memref<128x16xf32, #tpu.memory_space<vmem>>, %arg2: memref<128x1xf32, #tpu.memory_space<vmem>>, %arg3: memref<128x1xf32, #tpu.memory_space<vmem>>, %arg4: memref<16x16xf32, #tpu.memory_space<vmem>>, %arg5: memref<1x16xf32, #tpu.memory_space<vmem>>, %arg6: memref<16x128xf32, #tpu.memory_space<vmem>>, %arg7: memref<16x128xf32, #tpu.memory_space<vmem>>, %arg8: memref<1x128xf32, #tpu.memory_space<vmem>>, %arg9: memref<128x128xf32, #tpu.memory_space<vmem>>, %arg10: memref<128x128xbf16, #tpu.memory_space<vmem>>) attributes {dimension_semantics = [#tpu.dimension_semantics<parallel>], iteration_bounds = array<i64: 2>, scalar_prefetch = 0 : i64, scratch_operands = 0 : i64, tpu.core_type = #tpu.core_type<tc>, window_params = [{transform_indices = @transform_0, window_bounds = array<i64: 128, 16>}, {transform_indices = @transform_1, window_bounds = array<i64: 128, 1>}, {transform_indices = @transform_2, window_bounds = array<i64: 128, 1>}, {pipeline_mode = #tpu.pipeline_mode<synchronous>, transform_indices = @transform_3, window_bounds = array<i64: 16, 16>}, {pipeline_mode = #tpu.pipeline_mode<synchronous>, transform_indices = @transform_4, window_bounds = array<i64: 1, 16>}, {pipeline_mode = #tpu.pipeline_mode<synchronous>, transform_indices = @transform_5, window_bounds = array<i64: 16, 128>}, {pipeline_mode = #tpu.pipeline_mode<synchronous>, transform_indices = @transform_6, window_bounds = array<i64: 16, 128>}, {pipeline_mode = #tpu.pipeline_mode<synchronous>, transform_indices = @transform_7, window_bounds = array<i64: 1, 128>}, {transform_indices = @transform_8, window_bounds = array<i64: 128, 128>}, {transform_indices = @transform_9, window_bounds = array<i64: 128, 128>}]} {
    %c0 = arith.constant 0 : index
    %c0_0 = arith.constant 0 : index
    %0 = vector.load %arg1[%c0, %c0_0] : memref<128x16xf32, #tpu.memory_space<vmem>>, vector<128x16xf32>
    %c0_1 = arith.constant 0 : index
    %c0_2 = arith.constant 0 : index
    %1 = vector.load %arg4[%c0_1, %c0_2] : memref<16x16xf32, #tpu.memory_space<vmem>>, vector<16x16xf32>
    %cst = arith.constant dense<0.000000e+00> : vector<128x16xf32>
    %2 = tpu.matmul %0, %1, %cst {dimension_numbers = #tpu.dot_dimension_numbers<[1], [0], [0], [1], [0, 0, 1, 1], [], []>} : vector<128x16xf32>, vector<16x16xf32>, vector<128x16xf32> -> vector<128x16xf32>
    %c0_3 = arith.constant 0 : index
    %c0_4 = arith.constant 0 : index
    %3 = vector.load %arg5[%c0_3, %c0_4] : memref<1x16xf32, #tpu.memory_space<vmem>>, vector<1x16xf32>
    %4 = vector.broadcast %3 : vector<1x16xf32> to vector<128x16xf32>
    %5 = arith.addf %2, %4 : vector<128x16xf32>
    %c0_5 = arith.constant 0 : index
    %c0_6 = arith.constant 0 : index
    %6 = vector.load %arg2[%c0_5, %c0_6] : memref<128x1xf32, #tpu.memory_space<vmem>>, vector<128x1xf32>
    %7 = vector.broadcast %6 : vector<128x1xf32> to vector<128x16xf32>
    %8 = arith.mulf %7, %5 : vector<128x16xf32>
    %c0_7 = arith.constant 0 : index
    %c0_8 = arith.constant 0 : index
    %9 = vector.load %arg7[%c0_7, %c0_8] : memref<16x128xf32, #tpu.memory_space<vmem>>, vector<16x128xf32>
    %cst_9 = arith.constant dense<0.000000e+00> : vector<128x128xf32>
    %10 = tpu.matmul %8, %9, %cst_9 {dimension_numbers = #tpu.dot_dimension_numbers<[1], [0], [0], [1], [0, 0, 1, 1], [], []>} : vector<128x16xf32>, vector<16x128xf32>, vector<128x128xf32> -> vector<128x128xf32>
    %c0_10 = arith.constant 0 : index
    %c0_11 = arith.constant 0 : index
    %11 = vector.load %arg6[%c0_10, %c0_11] : memref<16x128xf32, #tpu.memory_space<vmem>>, vector<16x128xf32>
    %cst_12 = arith.constant dense<0.000000e+00> : vector<128x128xf32>
    %12 = tpu.matmul %5, %11, %cst_12 {dimension_numbers = #tpu.dot_dimension_numbers<[1], [0], [0], [1], [0, 0, 1, 1], [], []>} : vector<128x16xf32>, vector<16x128xf32>, vector<128x128xf32> -> vector<128x128xf32>
    %c0_13 = arith.constant 0 : index
    %c0_14 = arith.constant 0 : index
    %13 = vector.load %arg8[%c0_13, %c0_14] : memref<1x128xf32, #tpu.memory_space<vmem>>, vector<1x128xf32>
    %14 = vector.broadcast %13 : vector<1x128xf32> to vector<128x128xf32>
    %15 = arith.addf %12, %14 : vector<128x128xf32>
    %c0_15 = arith.constant 0 : index
    %c0_16 = arith.constant 0 : index
    %16 = vector.load %arg3[%c0_15, %c0_16] : memref<128x1xf32, #tpu.memory_space<vmem>>, vector<128x1xf32>
    %17 = vector.broadcast %16 : vector<128x1xf32> to vector<128x128xf32>
    %18 = arith.mulf %17, %10 : vector<128x128xf32>
    %19 = arith.addf %15, %18 : vector<128x128xf32>
    %c0_17 = arith.constant 0 : index
    %c0_18 = arith.constant 0 : index
    %20 = vector.load %arg9[%c0_17, %c0_18] : memref<128x128xf32, #tpu.memory_space<vmem>>, vector<128x128xf32>
    tpu.vector_store %arg9[%c0_17, %c0_18], %19 {strides = array<i32>} : memref<128x128xf32, #tpu.memory_space<vmem>>, vector<128x128xf32>,
    %21 = arith.truncf %10 : vector<128x128xf32> to vector<128x128xbf16>
    %c0_19 = arith.constant 0 : index
    %c0_20 = arith.constant 0 : index
    %22 = vector.load %arg10[%c0_19, %c0_20] : memref<128x128xbf16, #tpu.memory_space<vmem>>, vector<128x128xbf16>
    tpu.vector_store %arg10[%c0_19, %c0_20], %21 {strides = array<i32>} : memref<128x128xbf16, #tpu.memory_space<vmem>>, vector<128x128xbf16>,
    return
  }
  func.func @transform_0(%arg0: i32) -> (i32, i32) {
    %c0_i32 = arith.constant 0 : i32
    %c0_i32_0 = arith.constant 0 : i32
    return %arg0, %c0_i32 : i32, i32
  }
  func.func @transform_1(%arg0: i32) -> (i32, i32) {
    %c0_i32 = arith.constant 0 : i32
    %c0_i32_0 = arith.constant 0 : i32
    return %arg0, %c0_i32 : i32, i32
  }
  func.func @transform_2(%arg0: i32) -> (i32, i32) {
    %c0_i32 = arith.constant 0 : i32
    %c0_i32_0 = arith.constant 0 : i32
    return %arg0, %c0_i32 : i32, i32
  }
  func.func @transform_3(%arg0: i32) -> (i32, i32) {
    %c0_i32 = arith.constant 0 : i32
    %c0_i32_0 = arith.constant 0 : i32
    %c0_i32_1 = arith.constant 0 : i32
    return %c0_i32, %c0_i32_0 : i32, i32
  }
  func.func @transform_4(%arg0: i32) -> (i32, i32) {
    %c0_i32 = arith.constant 0 : i32
    %c0_i32_0 = arith.constant 0 : i32
    %c0_i32_1 = arith.constant 0 : i32
    return %c0_i32, %c0_i32_0 : i32, i32
  }
  func.func @transform_5(%arg0: i32) -> (i32, i32) {
    %c0_i32 = arith.constant 0 : i32
    %c0_i32_0 = arith.constant 0 : i32
    %c0_i32_1 = arith.constant 0 : i32
    return %c0_i32, %c0_i32_0 : i32, i32
  }
  func.func @transform_6(%arg0: i32) -> (i32, i32) {
    %c0_i32 = arith.constant 0 : i32
    %c0_i32_0 = arith.constant 0 : i32
    %c0_i32_1 = arith.constant 0 : i32
    return %c0_i32, %c0_i32_0 : i32, i32
  }
  func.func @transform_7(%arg0: i32) -> (i32, i32) {
    %c0_i32 = arith.constant 0 : i32
    %c0_i32_0 = arith.constant 0 : i32
    %c0_i32_1 = arith.constant 0 : i32
    return %c0_i32, %c0_i32_0 : i32, i32
  }
  func.func @transform_8(%arg0: i32) -> (i32, i32) {
    %c0_i32 = arith.constant 0 : i32
    %c0_i32_0 = arith.constant 0 : i32
    return %arg0, %c0_i32 : i32, i32
  }
  func.func @transform_9(%arg0: i32) -> (i32, i32) {
    %c0_i32 = arith.constant 0 : i32
    %c0_i32_0 = arith.constant 0 : i32
    return %arg0, %c0_i32 : i32, i32
  }
}

module attributes {stable_mosaic.version = 11 : i64} {
  func.func @_edge_kernel(%arg0: i32, %arg1: i32, %arg2: memref<128x256xbf16, #tpu.memory_space<vmem>>, %arg3: memref<256x128xbf16, #tpu.memory_space<vmem>>, %arg4: memref<256x128xbf16, #tpu.memory_space<vmem>>, %arg5: memref<8x256x128xbf16, #tpu.memory_space<vmem>>, %arg6: memref<128x128xf32, #tpu.memory_space<vmem>>, %arg7: memref<9x128xf32, #tpu.memory_space<vmem>>, %arg8: memref<128x128xf32, #tpu.memory_space<vmem>>, %arg9: memref<9x128xf32, #tpu.memory_space<vmem>>) attributes {dimension_semantics = [#tpu.dimension_semantics<parallel>, #tpu.dimension_semantics<arbitrary>], iteration_bounds = array<i64: 2, 1>, scalar_prefetch = 0 : i64, scratch_operands = 1 : i64, tpu.core_type = #tpu.core_type<tc>, window_params = [{transform_indices = @transform_0, window_bounds = array<i64: 128, 256>}, {transform_indices = @transform_1, window_bounds = array<i64: 256, 128>}, {transform_indices = @transform_2, window_bounds = array<i64: 256, 128>}, {transform_indices = @transform_3, window_bounds = array<i64: 8, 256, 128>}, {transform_indices = @transform_4, window_bounds = array<i64: 128, 128>}, {pipeline_mode = #tpu.pipeline_mode<synchronous>, transform_indices = @transform_5, window_bounds = array<i64: 9, 128>}, {transform_indices = @transform_6, window_bounds = array<i64: 128, 128>}]} {
    %c0_i32 = arith.constant 0 : i32
    %0 = arith.cmpi eq, %arg1, %c0_i32 : i32
    %1 = arith.extui %0 : i1 to i32
    %c0_i32_0 = arith.constant 0 : i32
    %2 = arith.cmpi ne, %1, %c0_i32_0 : i32
    scf.if %2 {
      %c0_175 = arith.constant 0 : index
      %c0_176 = arith.constant 0 : index
      %304 = vector.load %arg6[%c0_175, %c0_176] : memref<128x128xf32, #tpu.memory_space<vmem>>, vector<128x128xf32>
      %c0_177 = arith.constant 0 : index
      %c0_178 = arith.constant 0 : index
      %305 = vector.load %arg8[%c0_177, %c0_178] : memref<128x128xf32, #tpu.memory_space<vmem>>, vector<128x128xf32>
      tpu.vector_store %arg8[%c0_177, %c0_178], %304 {strides = array<i32>} : memref<128x128xf32, #tpu.memory_space<vmem>>, vector<128x128xf32>,
      %cst_179 = arith.constant 0.000000e+00 : f32
      %306 = vector.broadcast %cst_179 : f32 to vector<9x128xf32>
      %c0_180 = arith.constant 0 : index
      %c0_181 = arith.constant 0 : index
      %307 = vector.load %arg9[%c0_180, %c0_181] : memref<9x128xf32, #tpu.memory_space<vmem>>, vector<9x128xf32>
      tpu.vector_store %arg9[%c0_180, %c0_181], %306 {strides = array<i32>} : memref<9x128xf32, #tpu.memory_space<vmem>>, vector<9x128xf32>,
    } else {
    }
    %c0 = arith.constant 0 : index
    %c0_1 = arith.constant 0 : index
    %3 = vector.load %arg8[%c0, %c0_1] : memref<128x128xf32, #tpu.memory_space<vmem>>, vector<128x128xf32>
    %c0_2 = arith.constant 0 : index
    %c0_3 = arith.constant 0 : index
    %4 = vector.load %arg2[%c0_2, %c0_3] : memref<128x256xbf16, #tpu.memory_space<vmem>>, vector<128x256xbf16>
    %c0_4 = arith.constant 0 : index
    %c0_5 = arith.constant 0 : index
    %5 = vector.load %arg3[%c0_4, %c0_5] : memref<256x128xbf16, #tpu.memory_space<vmem>>, vector<256x128xbf16>
    %cst = arith.constant dense<0.000000e+00> : vector<128x128xf32>
    %6 = tpu.matmul %4, %5, %cst {dimension_numbers = #tpu.dot_dimension_numbers<[1], [0], [0], [1], [0, 0, 1, 1], [], []>} : vector<128x256xbf16>, vector<256x128xbf16>, vector<128x128xf32> -> vector<128x128xf32>
    %7 = arith.addf %3, %6 : vector<128x128xf32>
    %c0_6 = arith.constant 0 : index
    %c0_7 = arith.constant 0 : index
    %8 = vector.load %arg8[%c0_6, %c0_7] : memref<128x128xf32, #tpu.memory_space<vmem>>, vector<128x128xf32>
    tpu.vector_store %arg8[%c0_6, %c0_7], %7 {strides = array<i32>} : memref<128x128xf32, #tpu.memory_space<vmem>>, vector<128x128xf32>,
    %cst_8 = arith.constant 0.000000e+00 : f32
    %9 = vector.broadcast %cst_8 : f32 to vector<1x128xf32>
    %c0_i32_9 = arith.constant 0 : i32
    %c16_i32 = arith.constant 16 : i32
    %10 = arith.muli %c0_i32_9, %c16_i32 : i32
    %11 = tpu.assume_multiple %10, 16 : i32
    %12 = arith.index_cast %11 : i32 to index
    %c0_10 = arith.constant 0 : index
    %13 = vector.load %arg4[%12, %c0_10] : memref<256x128xbf16, #tpu.memory_space<vmem>>, vector<16x128xbf16>
    %14 = arith.extf %13 : vector<16x128xbf16> to vector<16x128xf32>
    %c0_11 = arith.constant 0 : index
    %15 = arith.index_cast %11 : i32 to index
    %c0_12 = arith.constant 0 : index
    %16 = vector.load %arg5[%c0_11, %15, %c0_12] : memref<8x256x128xbf16, #tpu.memory_space<vmem>>, vector<8x16x128xbf16>
    %17 = arith.extf %16 : vector<8x16x128xbf16> to vector<8x16x128xf32>
    %c0_13 = arith.constant 0 : index
    %c0_14 = arith.constant 0 : index
    %18 = vector.load %arg9[%c0_13, %c0_14] : memref<9x128xf32, #tpu.memory_space<vmem>>, vector<8x128xf32>
    %19 = vector.shape_cast %14 : vector<16x128xf32> to vector<1x16x128xf32>
    %20 = vector.broadcast %19 : vector<1x16x128xf32> to vector<8x16x128xf32>
    %21 = arith.mulf %20, %17 : vector<8x16x128xf32>
    %cst_15 = arith.constant dense<0.000000e+00> : vector<8x128xf32>
    %22 = vector.multi_reduction <add>, %21, %cst_15 [1] : vector<8x16x128xf32> to vector<8x128xf32>
    %23 = arith.addf %18, %22 : vector<8x128xf32>
    %c0_16 = arith.constant 0 : index
    %c0_17 = arith.constant 0 : index
    %24 = vector.load %arg9[%c0_16, %c0_17] : memref<9x128xf32, #tpu.memory_space<vmem>>, vector<8x128xf32>
    tpu.vector_store %arg9[%c0_16, %c0_17], %23 {strides = array<i32>} : memref<9x128xf32, #tpu.memory_space<vmem>>, vector<8x128xf32>,
    %cst_18 = arith.constant dense<0.000000e+00> : vector<128xf32>
    %25 = vector.multi_reduction <add>, %14, %cst_18 [0] : vector<16x128xf32> to vector<128xf32>
    %26 = vector.shape_cast %25 : vector<128xf32> to vector<1x128xf32>
    %27 = arith.addf %9, %26 : vector<1x128xf32>
    %c1_i32 = arith.constant 1 : i32
    %c16_i32_19 = arith.constant 16 : i32
    %28 = arith.muli %c1_i32, %c16_i32_19 : i32
    %29 = tpu.assume_multiple %28, 16 : i32
    %30 = arith.index_cast %29 : i32 to index
    %c0_20 = arith.constant 0 : index
    %31 = vector.load %arg4[%30, %c0_20] : memref<256x128xbf16, #tpu.memory_space<vmem>>, vector<16x128xbf16>
    %32 = arith.extf %31 : vector<16x128xbf16> to vector<16x128xf32>
    %c0_21 = arith.constant 0 : index
    %33 = arith.index_cast %29 : i32 to index
    %c0_22 = arith.constant 0 : index
    %34 = vector.load %arg5[%c0_21, %33, %c0_22] : memref<8x256x128xbf16, #tpu.memory_space<vmem>>, vector<8x16x128xbf16>
    %35 = arith.extf %34 : vector<8x16x128xbf16> to vector<8x16x128xf32>
    %c0_23 = arith.constant 0 : index
    %c0_24 = arith.constant 0 : index
    %36 = vector.load %arg9[%c0_23, %c0_24] : memref<9x128xf32, #tpu.memory_space<vmem>>, vector<8x128xf32>
    %37 = vector.shape_cast %32 : vector<16x128xf32> to vector<1x16x128xf32>
    %38 = vector.broadcast %37 : vector<1x16x128xf32> to vector<8x16x128xf32>
    %39 = arith.mulf %38, %35 : vector<8x16x128xf32>
    %cst_25 = arith.constant dense<0.000000e+00> : vector<8x128xf32>
    %40 = vector.multi_reduction <add>, %39, %cst_25 [1] : vector<8x16x128xf32> to vector<8x128xf32>
    %41 = arith.addf %36, %40 : vector<8x128xf32>
    %c0_26 = arith.constant 0 : index
    %c0_27 = arith.constant 0 : index
    %42 = vector.load %arg9[%c0_26, %c0_27] : memref<9x128xf32, #tpu.memory_space<vmem>>, vector<8x128xf32>
    tpu.vector_store %arg9[%c0_26, %c0_27], %41 {strides = array<i32>} : memref<9x128xf32, #tpu.memory_space<vmem>>, vector<8x128xf32>,
    %cst_28 = arith.constant dense<0.000000e+00> : vector<128xf32>
    %43 = vector.multi_reduction <add>, %32, %cst_28 [0] : vector<16x128xf32> to vector<128xf32>
    %44 = vector.shape_cast %43 : vector<128xf32> to vector<1x128xf32>
    %45 = arith.addf %27, %44 : vector<1x128xf32>
    %c2_i32 = arith.constant 2 : i32
    %c16_i32_29 = arith.constant 16 : i32
    %46 = arith.muli %c2_i32, %c16_i32_29 : i32
    %47 = tpu.assume_multiple %46, 16 : i32
    %48 = arith.index_cast %47 : i32 to index
    %c0_30 = arith.constant 0 : index
    %49 = vector.load %arg4[%48, %c0_30] : memref<256x128xbf16, #tpu.memory_space<vmem>>, vector<16x128xbf16>
    %50 = arith.extf %49 : vector<16x128xbf16> to vector<16x128xf32>
    %c0_31 = arith.constant 0 : index
    %51 = arith.index_cast %47 : i32 to index
    %c0_32 = arith.constant 0 : index
    %52 = vector.load %arg5[%c0_31, %51, %c0_32] : memref<8x256x128xbf16, #tpu.memory_space<vmem>>, vector<8x16x128xbf16>
    %53 = arith.extf %52 : vector<8x16x128xbf16> to vector<8x16x128xf32>
    %c0_33 = arith.constant 0 : index
    %c0_34 = arith.constant 0 : index
    %54 = vector.load %arg9[%c0_33, %c0_34] : memref<9x128xf32, #tpu.memory_space<vmem>>, vector<8x128xf32>
    %55 = vector.shape_cast %50 : vector<16x128xf32> to vector<1x16x128xf32>
    %56 = vector.broadcast %55 : vector<1x16x128xf32> to vector<8x16x128xf32>
    %57 = arith.mulf %56, %53 : vector<8x16x128xf32>
    %cst_35 = arith.constant dense<0.000000e+00> : vector<8x128xf32>
    %58 = vector.multi_reduction <add>, %57, %cst_35 [1] : vector<8x16x128xf32> to vector<8x128xf32>
    %59 = arith.addf %54, %58 : vector<8x128xf32>
    %c0_36 = arith.constant 0 : index
    %c0_37 = arith.constant 0 : index
    %60 = vector.load %arg9[%c0_36, %c0_37] : memref<9x128xf32, #tpu.memory_space<vmem>>, vector<8x128xf32>
    tpu.vector_store %arg9[%c0_36, %c0_37], %59 {strides = array<i32>} : memref<9x128xf32, #tpu.memory_space<vmem>>, vector<8x128xf32>,
    %cst_38 = arith.constant dense<0.000000e+00> : vector<128xf32>
    %61 = vector.multi_reduction <add>, %50, %cst_38 [0] : vector<16x128xf32> to vector<128xf32>
    %62 = vector.shape_cast %61 : vector<128xf32> to vector<1x128xf32>
    %63 = arith.addf %45, %62 : vector<1x128xf32>
    %c3_i32 = arith.constant 3 : i32
    %c16_i32_39 = arith.constant 16 : i32
    %64 = arith.muli %c3_i32, %c16_i32_39 : i32
    %65 = tpu.assume_multiple %64, 16 : i32
    %66 = arith.index_cast %65 : i32 to index
    %c0_40 = arith.constant 0 : index
    %67 = vector.load %arg4[%66, %c0_40] : memref<256x128xbf16, #tpu.memory_space<vmem>>, vector<16x128xbf16>
    %68 = arith.extf %67 : vector<16x128xbf16> to vector<16x128xf32>
    %c0_41 = arith.constant 0 : index
    %69 = arith.index_cast %65 : i32 to index
    %c0_42 = arith.constant 0 : index
    %70 = vector.load %arg5[%c0_41, %69, %c0_42] : memref<8x256x128xbf16, #tpu.memory_space<vmem>>, vector<8x16x128xbf16>
    %71 = arith.extf %70 : vector<8x16x128xbf16> to vector<8x16x128xf32>
    %c0_43 = arith.constant 0 : index
    %c0_44 = arith.constant 0 : index
    %72 = vector.load %arg9[%c0_43, %c0_44] : memref<9x128xf32, #tpu.memory_space<vmem>>, vector<8x128xf32>
    %73 = vector.shape_cast %68 : vector<16x128xf32> to vector<1x16x128xf32>
    %74 = vector.broadcast %73 : vector<1x16x128xf32> to vector<8x16x128xf32>
    %75 = arith.mulf %74, %71 : vector<8x16x128xf32>
    %cst_45 = arith.constant dense<0.000000e+00> : vector<8x128xf32>
    %76 = vector.multi_reduction <add>, %75, %cst_45 [1] : vector<8x16x128xf32> to vector<8x128xf32>
    %77 = arith.addf %72, %76 : vector<8x128xf32>
    %c0_46 = arith.constant 0 : index
    %c0_47 = arith.constant 0 : index
    %78 = vector.load %arg9[%c0_46, %c0_47] : memref<9x128xf32, #tpu.memory_space<vmem>>, vector<8x128xf32>
    tpu.vector_store %arg9[%c0_46, %c0_47], %77 {strides = array<i32>} : memref<9x128xf32, #tpu.memory_space<vmem>>, vector<8x128xf32>,
    %cst_48 = arith.constant dense<0.000000e+00> : vector<128xf32>
    %79 = vector.multi_reduction <add>, %68, %cst_48 [0] : vector<16x128xf32> to vector<128xf32>
    %80 = vector.shape_cast %79 : vector<128xf32> to vector<1x128xf32>
    %81 = arith.addf %63, %80 : vector<1x128xf32>
    %c4_i32 = arith.constant 4 : i32
    %c16_i32_49 = arith.constant 16 : i32
    %82 = arith.muli %c4_i32, %c16_i32_49 : i32
    %83 = tpu.assume_multiple %82, 16 : i32
    %84 = arith.index_cast %83 : i32 to index
    %c0_50 = arith.constant 0 : index
    %85 = vector.load %arg4[%84, %c0_50] : memref<256x128xbf16, #tpu.memory_space<vmem>>, vector<16x128xbf16>
    %86 = arith.extf %85 : vector<16x128xbf16> to vector<16x128xf32>
    %c0_51 = arith.constant 0 : index
    %87 = arith.index_cast %83 : i32 to index
    %c0_52 = arith.constant 0 : index
    %88 = vector.load %arg5[%c0_51, %87, %c0_52] : memref<8x256x128xbf16, #tpu.memory_space<vmem>>, vector<8x16x128xbf16>
    %89 = arith.extf %88 : vector<8x16x128xbf16> to vector<8x16x128xf32>
    %c0_53 = arith.constant 0 : index
    %c0_54 = arith.constant 0 : index
    %90 = vector.load %arg9[%c0_53, %c0_54] : memref<9x128xf32, #tpu.memory_space<vmem>>, vector<8x128xf32>
    %91 = vector.shape_cast %86 : vector<16x128xf32> to vector<1x16x128xf32>
    %92 = vector.broadcast %91 : vector<1x16x128xf32> to vector<8x16x128xf32>
    %93 = arith.mulf %92, %89 : vector<8x16x128xf32>
    %cst_55 = arith.constant dense<0.000000e+00> : vector<8x128xf32>
    %94 = vector.multi_reduction <add>, %93, %cst_55 [1] : vector<8x16x128xf32> to vector<8x128xf32>
    %95 = arith.addf %90, %94 : vector<8x128xf32>
    %c0_56 = arith.constant 0 : index
    %c0_57 = arith.constant 0 : index
    %96 = vector.load %arg9[%c0_56, %c0_57] : memref<9x128xf32, #tpu.memory_space<vmem>>, vector<8x128xf32>
    tpu.vector_store %arg9[%c0_56, %c0_57], %95 {strides = array<i32>} : memref<9x128xf32, #tpu.memory_space<vmem>>, vector<8x128xf32>,
    %cst_58 = arith.constant dense<0.000000e+00> : vector<128xf32>
    %97 = vector.multi_reduction <add>, %86, %cst_58 [0] : vector<16x128xf32> to vector<128xf32>
    %98 = vector.shape_cast %97 : vector<128xf32> to vector<1x128xf32>
    %99 = arith.addf %81, %98 : vector<1x128xf32>
    %c5_i32 = arith.constant 5 : i32
    %c16_i32_59 = arith.constant 16 : i32
    %100 = arith.muli %c5_i32, %c16_i32_59 : i32
    %101 = tpu.assume_multiple %100, 16 : i32
    %102 = arith.index_cast %101 : i32 to index
    %c0_60 = arith.constant 0 : index
    %103 = vector.load %arg4[%102, %c0_60] : memref<256x128xbf16, #tpu.memory_space<vmem>>, vector<16x128xbf16>
    %104 = arith.extf %103 : vector<16x128xbf16> to vector<16x128xf32>
    %c0_61 = arith.constant 0 : index
    %105 = arith.index_cast %101 : i32 to index
    %c0_62 = arith.constant 0 : index
    %106 = vector.load %arg5[%c0_61, %105, %c0_62] : memref<8x256x128xbf16, #tpu.memory_space<vmem>>, vector<8x16x128xbf16>
    %107 = arith.extf %106 : vector<8x16x128xbf16> to vector<8x16x128xf32>
    %c0_63 = arith.constant 0 : index
    %c0_64 = arith.constant 0 : index
    %108 = vector.load %arg9[%c0_63, %c0_64] : memref<9x128xf32, #tpu.memory_space<vmem>>, vector<8x128xf32>
    %109 = vector.shape_cast %104 : vector<16x128xf32> to vector<1x16x128xf32>
    %110 = vector.broadcast %109 : vector<1x16x128xf32> to vector<8x16x128xf32>
    %111 = arith.mulf %110, %107 : vector<8x16x128xf32>
    %cst_65 = arith.constant dense<0.000000e+00> : vector<8x128xf32>
    %112 = vector.multi_reduction <add>, %111, %cst_65 [1] : vector<8x16x128xf32> to vector<8x128xf32>
    %113 = arith.addf %108, %112 : vector<8x128xf32>
    %c0_66 = arith.constant 0 : index
    %c0_67 = arith.constant 0 : index
    %114 = vector.load %arg9[%c0_66, %c0_67] : memref<9x128xf32, #tpu.memory_space<vmem>>, vector<8x128xf32>
    tpu.vector_store %arg9[%c0_66, %c0_67], %113 {strides = array<i32>} : memref<9x128xf32, #tpu.memory_space<vmem>>, vector<8x128xf32>,
    %cst_68 = arith.constant dense<0.000000e+00> : vector<128xf32>
    %115 = vector.multi_reduction <add>, %104, %cst_68 [0] : vector<16x128xf32> to vector<128xf32>
    %116 = vector.shape_cast %115 : vector<128xf32> to vector<1x128xf32>
    %117 = arith.addf %99, %116 : vector<1x128xf32>
    %c6_i32 = arith.constant 6 : i32
    %c16_i32_69 = arith.constant 16 : i32
    %118 = arith.muli %c6_i32, %c16_i32_69 : i32
    %119 = tpu.assume_multiple %118, 16 : i32
    %120 = arith.index_cast %119 : i32 to index
    %c0_70 = arith.constant 0 : index
    %121 = vector.load %arg4[%120, %c0_70] : memref<256x128xbf16, #tpu.memory_space<vmem>>, vector<16x128xbf16>
    %122 = arith.extf %121 : vector<16x128xbf16> to vector<16x128xf32>
    %c0_71 = arith.constant 0 : index
    %123 = arith.index_cast %119 : i32 to index
    %c0_72 = arith.constant 0 : index
    %124 = vector.load %arg5[%c0_71, %123, %c0_72] : memref<8x256x128xbf16, #tpu.memory_space<vmem>>, vector<8x16x128xbf16>
    %125 = arith.extf %124 : vector<8x16x128xbf16> to vector<8x16x128xf32>
    %c0_73 = arith.constant 0 : index
    %c0_74 = arith.constant 0 : index
    %126 = vector.load %arg9[%c0_73, %c0_74] : memref<9x128xf32, #tpu.memory_space<vmem>>, vector<8x128xf32>
    %127 = vector.shape_cast %122 : vector<16x128xf32> to vector<1x16x128xf32>
    %128 = vector.broadcast %127 : vector<1x16x128xf32> to vector<8x16x128xf32>
    %129 = arith.mulf %128, %125 : vector<8x16x128xf32>
    %cst_75 = arith.constant dense<0.000000e+00> : vector<8x128xf32>
    %130 = vector.multi_reduction <add>, %129, %cst_75 [1] : vector<8x16x128xf32> to vector<8x128xf32>
    %131 = arith.addf %126, %130 : vector<8x128xf32>
    %c0_76 = arith.constant 0 : index
    %c0_77 = arith.constant 0 : index
    %132 = vector.load %arg9[%c0_76, %c0_77] : memref<9x128xf32, #tpu.memory_space<vmem>>, vector<8x128xf32>
    tpu.vector_store %arg9[%c0_76, %c0_77], %131 {strides = array<i32>} : memref<9x128xf32, #tpu.memory_space<vmem>>, vector<8x128xf32>,
    %cst_78 = arith.constant dense<0.000000e+00> : vector<128xf32>
    %133 = vector.multi_reduction <add>, %122, %cst_78 [0] : vector<16x128xf32> to vector<128xf32>
    %134 = vector.shape_cast %133 : vector<128xf32> to vector<1x128xf32>
    %135 = arith.addf %117, %134 : vector<1x128xf32>
    %c7_i32 = arith.constant 7 : i32
    %c16_i32_79 = arith.constant 16 : i32
    %136 = arith.muli %c7_i32, %c16_i32_79 : i32
    %137 = tpu.assume_multiple %136, 16 : i32
    %138 = arith.index_cast %137 : i32 to index
    %c0_80 = arith.constant 0 : index
    %139 = vector.load %arg4[%138, %c0_80] : memref<256x128xbf16, #tpu.memory_space<vmem>>, vector<16x128xbf16>
    %140 = arith.extf %139 : vector<16x128xbf16> to vector<16x128xf32>
    %c0_81 = arith.constant 0 : index
    %141 = arith.index_cast %137 : i32 to index
    %c0_82 = arith.constant 0 : index
    %142 = vector.load %arg5[%c0_81, %141, %c0_82] : memref<8x256x128xbf16, #tpu.memory_space<vmem>>, vector<8x16x128xbf16>
    %143 = arith.extf %142 : vector<8x16x128xbf16> to vector<8x16x128xf32>
    %c0_83 = arith.constant 0 : index
    %c0_84 = arith.constant 0 : index
    %144 = vector.load %arg9[%c0_83, %c0_84] : memref<9x128xf32, #tpu.memory_space<vmem>>, vector<8x128xf32>
    %145 = vector.shape_cast %140 : vector<16x128xf32> to vector<1x16x128xf32>
    %146 = vector.broadcast %145 : vector<1x16x128xf32> to vector<8x16x128xf32>
    %147 = arith.mulf %146, %143 : vector<8x16x128xf32>
    %cst_85 = arith.constant dense<0.000000e+00> : vector<8x128xf32>
    %148 = vector.multi_reduction <add>, %147, %cst_85 [1] : vector<8x16x128xf32> to vector<8x128xf32>
    %149 = arith.addf %144, %148 : vector<8x128xf32>
    %c0_86 = arith.constant 0 : index
    %c0_87 = arith.constant 0 : index
    %150 = vector.load %arg9[%c0_86, %c0_87] : memref<9x128xf32, #tpu.memory_space<vmem>>, vector<8x128xf32>
    tpu.vector_store %arg9[%c0_86, %c0_87], %149 {strides = array<i32>} : memref<9x128xf32, #tpu.memory_space<vmem>>, vector<8x128xf32>,
    %cst_88 = arith.constant dense<0.000000e+00> : vector<128xf32>
    %151 = vector.multi_reduction <add>, %140, %cst_88 [0] : vector<16x128xf32> to vector<128xf32>
    %152 = vector.shape_cast %151 : vector<128xf32> to vector<1x128xf32>
    %153 = arith.addf %135, %152 : vector<1x128xf32>
    %c8_i32 = arith.constant 8 : i32
    %c16_i32_89 = arith.constant 16 : i32
    %154 = arith.muli %c8_i32, %c16_i32_89 : i32
    %155 = tpu.assume_multiple %154, 16 : i32
    %156 = arith.index_cast %155 : i32 to index
    %c0_90 = arith.constant 0 : index
    %157 = vector.load %arg4[%156, %c0_90] : memref<256x128xbf16, #tpu.memory_space<vmem>>, vector<16x128xbf16>
    %158 = arith.extf %157 : vector<16x128xbf16> to vector<16x128xf32>
    %c0_91 = arith.constant 0 : index
    %159 = arith.index_cast %155 : i32 to index
    %c0_92 = arith.constant 0 : index
    %160 = vector.load %arg5[%c0_91, %159, %c0_92] : memref<8x256x128xbf16, #tpu.memory_space<vmem>>, vector<8x16x128xbf16>
    %161 = arith.extf %160 : vector<8x16x128xbf16> to vector<8x16x128xf32>
    %c0_93 = arith.constant 0 : index
    %c0_94 = arith.constant 0 : index
    %162 = vector.load %arg9[%c0_93, %c0_94] : memref<9x128xf32, #tpu.memory_space<vmem>>, vector<8x128xf32>
    %163 = vector.shape_cast %158 : vector<16x128xf32> to vector<1x16x128xf32>
    %164 = vector.broadcast %163 : vector<1x16x128xf32> to vector<8x16x128xf32>
    %165 = arith.mulf %164, %161 : vector<8x16x128xf32>
    %cst_95 = arith.constant dense<0.000000e+00> : vector<8x128xf32>
    %166 = vector.multi_reduction <add>, %165, %cst_95 [1] : vector<8x16x128xf32> to vector<8x128xf32>
    %167 = arith.addf %162, %166 : vector<8x128xf32>
    %c0_96 = arith.constant 0 : index
    %c0_97 = arith.constant 0 : index
    %168 = vector.load %arg9[%c0_96, %c0_97] : memref<9x128xf32, #tpu.memory_space<vmem>>, vector<8x128xf32>
    tpu.vector_store %arg9[%c0_96, %c0_97], %167 {strides = array<i32>} : memref<9x128xf32, #tpu.memory_space<vmem>>, vector<8x128xf32>,
    %cst_98 = arith.constant dense<0.000000e+00> : vector<128xf32>
    %169 = vector.multi_reduction <add>, %158, %cst_98 [0] : vector<16x128xf32> to vector<128xf32>
    %170 = vector.shape_cast %169 : vector<128xf32> to vector<1x128xf32>
    %171 = arith.addf %153, %170 : vector<1x128xf32>
    %c9_i32 = arith.constant 9 : i32
    %c16_i32_99 = arith.constant 16 : i32
    %172 = arith.muli %c9_i32, %c16_i32_99 : i32
    %173 = tpu.assume_multiple %172, 16 : i32
    %174 = arith.index_cast %173 : i32 to index
    %c0_100 = arith.constant 0 : index
    %175 = vector.load %arg4[%174, %c0_100] : memref<256x128xbf16, #tpu.memory_space<vmem>>, vector<16x128xbf16>
    %176 = arith.extf %175 : vector<16x128xbf16> to vector<16x128xf32>
    %c0_101 = arith.constant 0 : index
    %177 = arith.index_cast %173 : i32 to index
    %c0_102 = arith.constant 0 : index
    %178 = vector.load %arg5[%c0_101, %177, %c0_102] : memref<8x256x128xbf16, #tpu.memory_space<vmem>>, vector<8x16x128xbf16>
    %179 = arith.extf %178 : vector<8x16x128xbf16> to vector<8x16x128xf32>
    %c0_103 = arith.constant 0 : index
    %c0_104 = arith.constant 0 : index
    %180 = vector.load %arg9[%c0_103, %c0_104] : memref<9x128xf32, #tpu.memory_space<vmem>>, vector<8x128xf32>
    %181 = vector.shape_cast %176 : vector<16x128xf32> to vector<1x16x128xf32>
    %182 = vector.broadcast %181 : vector<1x16x128xf32> to vector<8x16x128xf32>
    %183 = arith.mulf %182, %179 : vector<8x16x128xf32>
    %cst_105 = arith.constant dense<0.000000e+00> : vector<8x128xf32>
    %184 = vector.multi_reduction <add>, %183, %cst_105 [1] : vector<8x16x128xf32> to vector<8x128xf32>
    %185 = arith.addf %180, %184 : vector<8x128xf32>
    %c0_106 = arith.constant 0 : index
    %c0_107 = arith.constant 0 : index
    %186 = vector.load %arg9[%c0_106, %c0_107] : memref<9x128xf32, #tpu.memory_space<vmem>>, vector<8x128xf32>
    tpu.vector_store %arg9[%c0_106, %c0_107], %185 {strides = array<i32>} : memref<9x128xf32, #tpu.memory_space<vmem>>, vector<8x128xf32>,
    %cst_108 = arith.constant dense<0.000000e+00> : vector<128xf32>
    %187 = vector.multi_reduction <add>, %176, %cst_108 [0] : vector<16x128xf32> to vector<128xf32>
    %188 = vector.shape_cast %187 : vector<128xf32> to vector<1x128xf32>
    %189 = arith.addf %171, %188 : vector<1x128xf32>
    %c10_i32 = arith.constant 10 : i32
    %c16_i32_109 = arith.constant 16 : i32
    %190 = arith.muli %c10_i32, %c16_i32_109 : i32
    %191 = tpu.assume_multiple %190, 16 : i32
    %192 = arith.index_cast %191 : i32 to index
    %c0_110 = arith.constant 0 : index
    %193 = vector.load %arg4[%192, %c0_110] : memref<256x128xbf16, #tpu.memory_space<vmem>>, vector<16x128xbf16>
    %194 = arith.extf %193 : vector<16x128xbf16> to vector<16x128xf32>
    %c0_111 = arith.constant 0 : index
    %195 = arith.index_cast %191 : i32 to index
    %c0_112 = arith.constant 0 : index
    %196 = vector.load %arg5[%c0_111, %195, %c0_112] : memref<8x256x128xbf16, #tpu.memory_space<vmem>>, vector<8x16x128xbf16>
    %197 = arith.extf %196 : vector<8x16x128xbf16> to vector<8x16x128xf32>
    %c0_113 = arith.constant 0 : index
    %c0_114 = arith.constant 0 : index
    %198 = vector.load %arg9[%c0_113, %c0_114] : memref<9x128xf32, #tpu.memory_space<vmem>>, vector<8x128xf32>
    %199 = vector.shape_cast %194 : vector<16x128xf32> to vector<1x16x128xf32>
    %200 = vector.broadcast %199 : vector<1x16x128xf32> to vector<8x16x128xf32>
    %201 = arith.mulf %200, %197 : vector<8x16x128xf32>
    %cst_115 = arith.constant dense<0.000000e+00> : vector<8x128xf32>
    %202 = vector.multi_reduction <add>, %201, %cst_115 [1] : vector<8x16x128xf32> to vector<8x128xf32>
    %203 = arith.addf %198, %202 : vector<8x128xf32>
    %c0_116 = arith.constant 0 : index
    %c0_117 = arith.constant 0 : index
    %204 = vector.load %arg9[%c0_116, %c0_117] : memref<9x128xf32, #tpu.memory_space<vmem>>, vector<8x128xf32>
    tpu.vector_store %arg9[%c0_116, %c0_117], %203 {strides = array<i32>} : memref<9x128xf32, #tpu.memory_space<vmem>>, vector<8x128xf32>,
    %cst_118 = arith.constant dense<0.000000e+00> : vector<128xf32>
    %205 = vector.multi_reduction <add>, %194, %cst_118 [0] : vector<16x128xf32> to vector<128xf32>
    %206 = vector.shape_cast %205 : vector<128xf32> to vector<1x128xf32>
    %207 = arith.addf %189, %206 : vector<1x128xf32>
    %c11_i32 = arith.constant 11 : i32
    %c16_i32_119 = arith.constant 16 : i32
    %208 = arith.muli %c11_i32, %c16_i32_119 : i32
    %209 = tpu.assume_multiple %208, 16 : i32
    %210 = arith.index_cast %209 : i32 to index
    %c0_120 = arith.constant 0 : index
    %211 = vector.load %arg4[%210, %c0_120] : memref<256x128xbf16, #tpu.memory_space<vmem>>, vector<16x128xbf16>
    %212 = arith.extf %211 : vector<16x128xbf16> to vector<16x128xf32>
    %c0_121 = arith.constant 0 : index
    %213 = arith.index_cast %209 : i32 to index
    %c0_122 = arith.constant 0 : index
    %214 = vector.load %arg5[%c0_121, %213, %c0_122] : memref<8x256x128xbf16, #tpu.memory_space<vmem>>, vector<8x16x128xbf16>
    %215 = arith.extf %214 : vector<8x16x128xbf16> to vector<8x16x128xf32>
    %c0_123 = arith.constant 0 : index
    %c0_124 = arith.constant 0 : index
    %216 = vector.load %arg9[%c0_123, %c0_124] : memref<9x128xf32, #tpu.memory_space<vmem>>, vector<8x128xf32>
    %217 = vector.shape_cast %212 : vector<16x128xf32> to vector<1x16x128xf32>
    %218 = vector.broadcast %217 : vector<1x16x128xf32> to vector<8x16x128xf32>
    %219 = arith.mulf %218, %215 : vector<8x16x128xf32>
    %cst_125 = arith.constant dense<0.000000e+00> : vector<8x128xf32>
    %220 = vector.multi_reduction <add>, %219, %cst_125 [1] : vector<8x16x128xf32> to vector<8x128xf32>
    %221 = arith.addf %216, %220 : vector<8x128xf32>
    %c0_126 = arith.constant 0 : index
    %c0_127 = arith.constant 0 : index
    %222 = vector.load %arg9[%c0_126, %c0_127] : memref<9x128xf32, #tpu.memory_space<vmem>>, vector<8x128xf32>
    tpu.vector_store %arg9[%c0_126, %c0_127], %221 {strides = array<i32>} : memref<9x128xf32, #tpu.memory_space<vmem>>, vector<8x128xf32>,
    %cst_128 = arith.constant dense<0.000000e+00> : vector<128xf32>
    %223 = vector.multi_reduction <add>, %212, %cst_128 [0] : vector<16x128xf32> to vector<128xf32>
    %224 = vector.shape_cast %223 : vector<128xf32> to vector<1x128xf32>
    %225 = arith.addf %207, %224 : vector<1x128xf32>
    %c12_i32 = arith.constant 12 : i32
    %c16_i32_129 = arith.constant 16 : i32
    %226 = arith.muli %c12_i32, %c16_i32_129 : i32
    %227 = tpu.assume_multiple %226, 16 : i32
    %228 = arith.index_cast %227 : i32 to index
    %c0_130 = arith.constant 0 : index
    %229 = vector.load %arg4[%228, %c0_130] : memref<256x128xbf16, #tpu.memory_space<vmem>>, vector<16x128xbf16>
    %230 = arith.extf %229 : vector<16x128xbf16> to vector<16x128xf32>
    %c0_131 = arith.constant 0 : index
    %231 = arith.index_cast %227 : i32 to index
    %c0_132 = arith.constant 0 : index
    %232 = vector.load %arg5[%c0_131, %231, %c0_132] : memref<8x256x128xbf16, #tpu.memory_space<vmem>>, vector<8x16x128xbf16>
    %233 = arith.extf %232 : vector<8x16x128xbf16> to vector<8x16x128xf32>
    %c0_133 = arith.constant 0 : index
    %c0_134 = arith.constant 0 : index
    %234 = vector.load %arg9[%c0_133, %c0_134] : memref<9x128xf32, #tpu.memory_space<vmem>>, vector<8x128xf32>
    %235 = vector.shape_cast %230 : vector<16x128xf32> to vector<1x16x128xf32>
    %236 = vector.broadcast %235 : vector<1x16x128xf32> to vector<8x16x128xf32>
    %237 = arith.mulf %236, %233 : vector<8x16x128xf32>
    %cst_135 = arith.constant dense<0.000000e+00> : vector<8x128xf32>
    %238 = vector.multi_reduction <add>, %237, %cst_135 [1] : vector<8x16x128xf32> to vector<8x128xf32>
    %239 = arith.addf %234, %238 : vector<8x128xf32>
    %c0_136 = arith.constant 0 : index
    %c0_137 = arith.constant 0 : index
    %240 = vector.load %arg9[%c0_136, %c0_137] : memref<9x128xf32, #tpu.memory_space<vmem>>, vector<8x128xf32>
    tpu.vector_store %arg9[%c0_136, %c0_137], %239 {strides = array<i32>} : memref<9x128xf32, #tpu.memory_space<vmem>>, vector<8x128xf32>,
    %cst_138 = arith.constant dense<0.000000e+00> : vector<128xf32>
    %241 = vector.multi_reduction <add>, %230, %cst_138 [0] : vector<16x128xf32> to vector<128xf32>
    %242 = vector.shape_cast %241 : vector<128xf32> to vector<1x128xf32>
    %243 = arith.addf %225, %242 : vector<1x128xf32>
    %c13_i32 = arith.constant 13 : i32
    %c16_i32_139 = arith.constant 16 : i32
    %244 = arith.muli %c13_i32, %c16_i32_139 : i32
    %245 = tpu.assume_multiple %244, 16 : i32
    %246 = arith.index_cast %245 : i32 to index
    %c0_140 = arith.constant 0 : index
    %247 = vector.load %arg4[%246, %c0_140] : memref<256x128xbf16, #tpu.memory_space<vmem>>, vector<16x128xbf16>
    %248 = arith.extf %247 : vector<16x128xbf16> to vector<16x128xf32>
    %c0_141 = arith.constant 0 : index
    %249 = arith.index_cast %245 : i32 to index
    %c0_142 = arith.constant 0 : index
    %250 = vector.load %arg5[%c0_141, %249, %c0_142] : memref<8x256x128xbf16, #tpu.memory_space<vmem>>, vector<8x16x128xbf16>
    %251 = arith.extf %250 : vector<8x16x128xbf16> to vector<8x16x128xf32>
    %c0_143 = arith.constant 0 : index
    %c0_144 = arith.constant 0 : index
    %252 = vector.load %arg9[%c0_143, %c0_144] : memref<9x128xf32, #tpu.memory_space<vmem>>, vector<8x128xf32>
    %253 = vector.shape_cast %248 : vector<16x128xf32> to vector<1x16x128xf32>
    %254 = vector.broadcast %253 : vector<1x16x128xf32> to vector<8x16x128xf32>
    %255 = arith.mulf %254, %251 : vector<8x16x128xf32>
    %cst_145 = arith.constant dense<0.000000e+00> : vector<8x128xf32>
    %256 = vector.multi_reduction <add>, %255, %cst_145 [1] : vector<8x16x128xf32> to vector<8x128xf32>
    %257 = arith.addf %252, %256 : vector<8x128xf32>
    %c0_146 = arith.constant 0 : index
    %c0_147 = arith.constant 0 : index
    %258 = vector.load %arg9[%c0_146, %c0_147] : memref<9x128xf32, #tpu.memory_space<vmem>>, vector<8x128xf32>
    tpu.vector_store %arg9[%c0_146, %c0_147], %257 {strides = array<i32>} : memref<9x128xf32, #tpu.memory_space<vmem>>, vector<8x128xf32>,
    %cst_148 = arith.constant dense<0.000000e+00> : vector<128xf32>
    %259 = vector.multi_reduction <add>, %248, %cst_148 [0] : vector<16x128xf32> to vector<128xf32>
    %260 = vector.shape_cast %259 : vector<128xf32> to vector<1x128xf32>
    %261 = arith.addf %243, %260 : vector<1x128xf32>
    %c14_i32 = arith.constant 14 : i32
    %c16_i32_149 = arith.constant 16 : i32
    %262 = arith.muli %c14_i32, %c16_i32_149 : i32
    %263 = tpu.assume_multiple %262, 16 : i32
    %264 = arith.index_cast %263 : i32 to index
    %c0_150 = arith.constant 0 : index
    %265 = vector.load %arg4[%264, %c0_150] : memref<256x128xbf16, #tpu.memory_space<vmem>>, vector<16x128xbf16>
    %266 = arith.extf %265 : vector<16x128xbf16> to vector<16x128xf32>
    %c0_151 = arith.constant 0 : index
    %267 = arith.index_cast %263 : i32 to index
    %c0_152 = arith.constant 0 : index
    %268 = vector.load %arg5[%c0_151, %267, %c0_152] : memref<8x256x128xbf16, #tpu.memory_space<vmem>>, vector<8x16x128xbf16>
    %269 = arith.extf %268 : vector<8x16x128xbf16> to vector<8x16x128xf32>
    %c0_153 = arith.constant 0 : index
    %c0_154 = arith.constant 0 : index
    %270 = vector.load %arg9[%c0_153, %c0_154] : memref<9x128xf32, #tpu.memory_space<vmem>>, vector<8x128xf32>
    %271 = vector.shape_cast %266 : vector<16x128xf32> to vector<1x16x128xf32>
    %272 = vector.broadcast %271 : vector<1x16x128xf32> to vector<8x16x128xf32>
    %273 = arith.mulf %272, %269 : vector<8x16x128xf32>
    %cst_155 = arith.constant dense<0.000000e+00> : vector<8x128xf32>
    %274 = vector.multi_reduction <add>, %273, %cst_155 [1] : vector<8x16x128xf32> to vector<8x128xf32>
    %275 = arith.addf %270, %274 : vector<8x128xf32>
    %c0_156 = arith.constant 0 : index
    %c0_157 = arith.constant 0 : index
    %276 = vector.load %arg9[%c0_156, %c0_157] : memref<9x128xf32, #tpu.memory_space<vmem>>, vector<8x128xf32>
    tpu.vector_store %arg9[%c0_156, %c0_157], %275 {strides = array<i32>} : memref<9x128xf32, #tpu.memory_space<vmem>>, vector<8x128xf32>,
    %cst_158 = arith.constant dense<0.000000e+00> : vector<128xf32>
    %277 = vector.multi_reduction <add>, %266, %cst_158 [0] : vector<16x128xf32> to vector<128xf32>
    %278 = vector.shape_cast %277 : vector<128xf32> to vector<1x128xf32>
    %279 = arith.addf %261, %278 : vector<1x128xf32>
    %c15_i32 = arith.constant 15 : i32
    %c16_i32_159 = arith.constant 16 : i32
    %280 = arith.muli %c15_i32, %c16_i32_159 : i32
    %281 = tpu.assume_multiple %280, 16 : i32
    %282 = arith.index_cast %281 : i32 to index
    %c0_160 = arith.constant 0 : index
    %283 = vector.load %arg4[%282, %c0_160] : memref<256x128xbf16, #tpu.memory_space<vmem>>, vector<16x128xbf16>
    %284 = arith.extf %283 : vector<16x128xbf16> to vector<16x128xf32>
    %c0_161 = arith.constant 0 : index
    %285 = arith.index_cast %281 : i32 to index
    %c0_162 = arith.constant 0 : index
    %286 = vector.load %arg5[%c0_161, %285, %c0_162] : memref<8x256x128xbf16, #tpu.memory_space<vmem>>, vector<8x16x128xbf16>
    %287 = arith.extf %286 : vector<8x16x128xbf16> to vector<8x16x128xf32>
    %c0_163 = arith.constant 0 : index
    %c0_164 = arith.constant 0 : index
    %288 = vector.load %arg9[%c0_163, %c0_164] : memref<9x128xf32, #tpu.memory_space<vmem>>, vector<8x128xf32>
    %289 = vector.shape_cast %284 : vector<16x128xf32> to vector<1x16x128xf32>
    %290 = vector.broadcast %289 : vector<1x16x128xf32> to vector<8x16x128xf32>
    %291 = arith.mulf %290, %287 : vector<8x16x128xf32>
    %cst_165 = arith.constant dense<0.000000e+00> : vector<8x128xf32>
    %292 = vector.multi_reduction <add>, %291, %cst_165 [1] : vector<8x16x128xf32> to vector<8x128xf32>
    %293 = arith.addf %288, %292 : vector<8x128xf32>
    %c0_166 = arith.constant 0 : index
    %c0_167 = arith.constant 0 : index
    %294 = vector.load %arg9[%c0_166, %c0_167] : memref<9x128xf32, #tpu.memory_space<vmem>>, vector<8x128xf32>
    tpu.vector_store %arg9[%c0_166, %c0_167], %293 {strides = array<i32>} : memref<9x128xf32, #tpu.memory_space<vmem>>, vector<8x128xf32>,
    %cst_168 = arith.constant dense<0.000000e+00> : vector<128xf32>
    %295 = vector.multi_reduction <add>, %284, %cst_168 [0] : vector<16x128xf32> to vector<128xf32>
    %296 = vector.shape_cast %295 : vector<128xf32> to vector<1x128xf32>
    %297 = arith.addf %279, %296 : vector<1x128xf32>
    %c16_i32_169 = arith.constant 16 : i32
    %c8 = arith.constant 8 : index
    %c0_170 = arith.constant 0 : index
    %298 = vector.load %arg9[%c8, %c0_170] : memref<9x128xf32, #tpu.memory_space<vmem>>, vector<1x128xf32>
    %299 = arith.addf %298, %297 : vector<1x128xf32>
    %c8_171 = arith.constant 8 : index
    %c0_172 = arith.constant 0 : index
    %300 = vector.load %arg9[%c8_171, %c0_172] : memref<9x128xf32, #tpu.memory_space<vmem>>, vector<1x128xf32>
    tpu.vector_store %arg9[%c8_171, %c0_172], %299 {strides = array<i32>} : memref<9x128xf32, #tpu.memory_space<vmem>>, vector<1x128xf32>,
    %c0_i32_173 = arith.constant 0 : i32
    %301 = arith.cmpi eq, %arg1, %c0_i32_173 : i32
    %302 = arith.extui %301 : i1 to i32
    %c0_i32_174 = arith.constant 0 : i32
    %303 = arith.cmpi ne, %302, %c0_i32_174 : i32
    scf.if %303 {
      %c0_175 = arith.constant 0 : index
      %c0_176 = arith.constant 0 : index
      %304 = vector.load %arg9[%c0_175, %c0_176] : memref<9x128xf32, #tpu.memory_space<vmem>>, vector<9x128xf32>
      %c0_177 = arith.constant 0 : index
      %c0_178 = arith.constant 0 : index
      %305 = vector.load %arg7[%c0_177, %c0_178] : memref<9x128xf32, #tpu.memory_space<vmem>>, vector<9x128xf32>
      %cst_179 = arith.constant dense<0.000000e+00> : vector<128x128xf32>
      %306 = tpu.matmul %304, %305, %cst_179 {dimension_numbers = #tpu.dot_dimension_numbers<[0], [0], [1], [1], [0, 1, 1, 1], [], []>} : vector<9x128xf32>, vector<9x128xf32>, vector<128x128xf32> -> vector<128x128xf32>
      %c0_180 = arith.constant 0 : index
      %c0_181 = arith.constant 0 : index
      %307 = vector.load %arg8[%c0_180, %c0_181] : memref<128x128xf32, #tpu.memory_space<vmem>>, vector<128x128xf32>
      %308 = arith.addf %307, %306 : vector<128x128xf32>
      %cst_182 = arith.constant 0.000000e+00 : f32
      %309 = vector.broadcast %cst_182 : f32 to vector<128x128xf32>
      %310 = arith.maximumf %308, %309 : vector<128x128xf32>
      %c0_183 = arith.constant 0 : index
      %c0_184 = arith.constant 0 : index
      %311 = vector.load %arg8[%c0_183, %c0_184] : memref<128x128xf32, #tpu.memory_space<vmem>>, vector<128x128xf32>
      tpu.vector_store %arg8[%c0_183, %c0_184], %310 {strides = array<i32>} : memref<128x128xf32, #tpu.memory_space<vmem>>, vector<128x128xf32>,
    } else {
    }
    return
  }
  func.func @transform_0(%arg0: i32, %arg1: i32) -> (i32, i32) {
    %c0_i32 = arith.constant 0 : i32
    return %arg0, %arg1 : i32, i32
  }
  func.func @transform_1(%arg0: i32, %arg1: i32) -> (i32, i32) {
    %c0_i32 = arith.constant 0 : i32
    %c0_i32_0 = arith.constant 0 : i32
    return %arg1, %c0_i32 : i32, i32
  }
  func.func @transform_2(%arg0: i32, %arg1: i32) -> (i32, i32) {
    %c0_i32 = arith.constant 0 : i32
    return %arg1, %arg0 : i32, i32
  }
  func.func @transform_3(%arg0: i32, %arg1: i32) -> (i32, i32, i32) {
    %c0_i32 = arith.constant 0 : i32
    %c0_i32_0 = arith.constant 0 : i32
    return %c0_i32, %arg1, %arg0 : i32, i32, i32
  }
  func.func @transform_4(%arg0: i32, %arg1: i32) -> (i32, i32) {
    %c0_i32 = arith.constant 0 : i32
    %c0_i32_0 = arith.constant 0 : i32
    return %arg0, %c0_i32 : i32, i32
  }
  func.func @transform_5(%arg0: i32, %arg1: i32) -> (i32, i32) {
    %c0_i32 = arith.constant 0 : i32
    %c0_i32_0 = arith.constant 0 : i32
    %c0_i32_1 = arith.constant 0 : i32
    return %c0_i32, %c0_i32_0 : i32, i32
  }
  func.func @transform_6(%arg0: i32, %arg1: i32) -> (i32, i32) {
    %c0_i32 = arith.constant 0 : i32
    %c0_i32_0 = arith.constant 0 : i32
    return %arg0, %c0_i32 : i32, i32
  }
}

</mosaic_0001>

<bundles_post_ra>
// kernel: image_gcn_forward.2
= control target key start
LH: loop header
LB: loop body
LE: loop exit
PB: predicated region body
PF: predicated region fallthrough
CT: control target
= control target key end

     0   :  { %s1828_s30 = smov 0   ;;  %s2054_s0 = inlined_call_operand.vmem [shape: f32[256,16], index: 0, kind: input, shape index: {}]   ;;  %s2055_s1 = inlined_call_operand.vmem [shape: f32[256,1], index: 1, kind: input, shape index: {}]   ;;  %s2056_s2 = inlined_call_operand.vmem [shape: f32[256,1], index: 2, kind: input, shape index: {}]   ;;  %s2057_s3 = inlined_call_operand.vmem [shape: f32[16,16], index: 3, kind: input, shape index: {}]   ;;  %s2058_s4 = inlined_call_operand.vmem [shape: f32[1,16], index: 4, kind: input, shape index: {}]   ;;  %s2059_s5 = inlined_call_operand.vmem [shape: f32[16,128], index: 5, kind: input, shape index: {}]   ;;  %s2060_s6 = inlined_call_operand.vmem [shape: f32[16,128], index: 6, kind: input, shape index: {}]   ;;  %s2061_s7 = inlined_call_operand.vmem [shape: f32[1,128], index: 7, kind: input, shape index: {}]   ;;  %s2062_s8 = inlined_call_operand.vmem [shape: f32[256,128], index: 8, kind: output, shape index: {0}]   ;;  %s2063_s9 = inlined_call_operand.vmem [shape: bf16[256,128], index: 9, kind: output, shape index: {1}]  }
   0x1 LB: > { %s1460_s10 = sadd.s32 4294967295, %s1775_s30   ;;  %p1464_p0 = scmp.ge.s32.totalorder %s1775_s30, 1  ;;  %s1775_s30 = sphi %s1828_s30, %s20_s30  }
   0x2   : > { %p313_p1 = scmp.lt.s32.totalorder %s1775_s30, 3 }
   0x4   : > { %p314_p2 = pnand %p1464_p0, %p313_p1 }
   0x5   : > { %v410_v0 = vld [vmem:[%s2057_s3] sm:$0xff] (!%p314_p2)  ;;  %v411_v1 = vld [vmem:[%s2057_s3 + $0x8] sm:$0xff] (!%p314_p2)  ;;  %s1465_s15 = sshll.u32 (!%p314_p2), %s1460_s10, 4  ;;  %v1777_v3 = vmov (!%p314_p2), 0   ;;  %vm419_vm0 = vcmask (!%p314_p2), 130048  }
   0x6   : > { %317 = sbr.rel (%p314_p2) target bundleno = 482 (0x1e2), region = 52  ;;  %v1744_v2 = vpack.c.bf16 (!%p314_p2), %v411_v1, %v410_v0  ;;  %p365_p3 = scmp.lt.s32.totalorder (!%p314_p2), %s1465_s15, 31  ;;  %1767 = vset.pattern.permute.xlu0 (!%p314_p2), %v1777_v3  ;;  %1768 = vset.pattern.permute.xlu1 (!%p314_p2), %v1777_v3  ;;  %v725_v46 = vld [vmem:[%s2060_s6] sm:$0xff] (!%p314_p2)  ;;  %v726_v47 = vld [vmem:[%s2060_s6 + $0x8] sm:$0xff] (!%p314_p2) }
   0x7   : > { %v920_v48 = vld [vmem:[%s2059_s5] sm:$0xff] (!%p314_p2)  ;;  %v1748_v49 = vpack.c.bf16 (!%p314_p2), %v726_v47, %v725_v46  ;;  %v921_v50 = vld [vmem:[%s2059_s5 + $0x8] sm:$0xff] (!%p314_p2) }
   0x8   : > { %1745 = vmatprep.subr.bf16.mxu0 (!%p314_p2), %v1744_v2  ;;  %1756 = vmatprep.subr.bf16.mxu1 (!%p314_p2), %v1744_v2  ;;  %v1752_v53 = vpack.c.bf16 (!%p314_p2), %v921_v50, %v920_v48  ;;  %v1944_v63 = vld [vmem:[%s2058_s4] ss:$0 sm:$0xff] (!%p314_p2) }
   0x9   : > { %1747 = vmatpush3.bf16.msra.mxu0 (!%p314_p2), %v1744_v2  ;;  %1757 = vmatpush3.bf16.msra.mxu1 (!%p314_p2), %v1744_v2 }
   0xa   : > { %1749 = vmatprep.subr.bf16.mxu1 (!%p314_p2), %v1748_v49  ;;  %1753 = vmatprep.subr.bf16.mxu0 (!%p314_p2), %v1752_v53 }
   0xd   : > { %s2065_s15 = smov (!%p365_p3, %s1465_s15), 31 }
   0xe   : > { %s1845_s16 = sshll.u32 %s2065_s15, 3  ;;  %s1474_s20 = sshll.u32 %s2065_s15, 2 }
   0xf   : > { %s1851_s19 = scalar_lea.vmem %s2054_s0, %s1845_s16  ;;  %s1867_s22 = scalar_lea.vmem %s2055_s1, %s1845_s16 }
  0x10   : > { %v394_v4 = vld [vmem:[%s1851_s19] sm:$0xff]  ;;  %v395_v6 = vld [vmem:[%s1851_s19 + $0x8] sm:$0xff]  ;;  %v396_v8 = vld [vmem:[%s1851_s19 + $0x10] sm:$0xff]  ;;  %s1911_s25 = scalar_lea.vmem %s2056_s2, %s1845_s16  ;;  %s2004_s23 = scalar_lea.vmem %s2063_s9, %s1474_s20 }
  0x11   : > { %v402_v5 = vld [vmem:[%s1851_s19 + $0x40] sm:$0xff]  ;;  %1664 = vmatprep.mubr.msk.f32.mxu0 %vm419_vm0, %v394_v4  ;;  %v403_v7 = vld [vmem:[%s1851_s19 + $0x48] sm:$0xff]  ;;  %v404_v9 = vld [vmem:[%s1851_s19 + $0x50] sm:$0xff]  ;;  %s2011_s26 = scalar_lea.vmem %s2062_s8, %s1845_s16 }
  0x12   : > { %1676 = vmatprep.mubr.msk.f32.mxu1 %vm419_vm0, %v402_v5  ;;  %1665 = vmatmul.mubr.msk.f32.vlgmr.msra.gmra.mrb[0].mxu0 %vm419_vm0, %v395_v6  ;;  %v397_v10 = vld [vmem:[%s1851_s19 + $0x18] sm:$0xff]  ;;  %v398_v12 = vld [vmem:[%s1851_s19 + $0x20] sm:$0xff]  ;;  %v615_v15 = vld [vmem:[%s1867_s22 + $0x10] sm:$0xff] }
  0x13   : > { %1677 = vmatmul.mubr.msk.f32.vlgmr.msra.gmra.mrb[0].mxu1 %vm419_vm0, %v403_v7  ;;  %1667 = vmatprep.mubr.msk.f32.mxu0 %vm419_vm0, %v396_v8  ;;  %v405_v11 = vld [vmem:[%s1851_s19 + $0x58] sm:$0xff]  ;;  %v406_v13 = vld [vmem:[%s1851_s19 + $0x60] sm:$0xff]  ;;  %v399_v16 = vld [vmem:[%s1851_s19 + $0x28] sm:$0xff] }
  0x14   : > { %1679 = vmatprep.mubr.msk.f32.mxu1 %vm419_vm0, %v404_v9  ;;  %v613_v14 = vld [vmem:[%s1867_s22] sm:$0xff]  ;;  %v407_v17 = vld [vmem:[%s1851_s19 + $0x68] sm:$0xff]  ;;  %v400_v18 = vld [vmem:[%s1851_s19 + $0x30] sm:$0xff]  ;;  %641 = vperm.xlu1 %1768, %v615_v15  }
  0x15   : > { %v408_v19 = vld [vmem:[%s1851_s19 + $0x70] sm:$0xff]  ;;  %631 = vperm.xlu0 %1767, %v613_v14   ;;  %v614_v20 = vld [vmem:[%s1867_s22 + $0x8] sm:$0xff]  ;;  %v616_v21 = vld [vmem:[%s1867_s22 + $0x18] sm:$0xff]  ;;  %1751 = vmatpush3.bf16.msra.mxu1 %v1748_v49 }
  0x16   : > { %1668 = vmatmul.mubr.msk.f32.gmra.mrb[2].mxu0 %vm419_vm0, %v397_v10  ;;  %v401_v22 = vld [vmem:[%s1851_s19 + $0x38] sm:$0xff]  ;;  %v617_v24 = vld [vmem:[%s1867_s22 + $0x20] sm:$0xff]  ;;  %v618_v25 = vld [vmem:[%s1867_s22 + $0x28] sm:$0xff] }
  0x17   : > { %1680 = vmatmul.mubr.msk.f32.gmra.mrb[2].mxu1 %vm419_vm0, %v405_v11  ;;  %1670 = vmatprep.mubr.msk.f32.mxu0 %vm419_vm0, %v398_v12  ;;  %v409_v23 = vld [vmem:[%s1851_s19 + $0x78] sm:$0xff]  ;;  %v619_v26 = vld [vmem:[%s1867_s22 + $0x30] sm:$0xff]  ;;  %v621_v28 = vld [vmem:[%s1867_s22 + $0x40] sm:$0xff] }
  0x18   : > { %1682 = vmatprep.mubr.msk.f32.mxu1 %vm419_vm0, %v406_v13  ;;  %646 = vperm.xlu1 %1768, %v616_v21   ;;  %v620_v27 = vld [vmem:[%s1867_s22 + $0x38] sm:$0xff]  ;;  %v622_v29 = vld [vmem:[%s1867_s22 + $0x48] sm:$0xff]  ;;  %v623_v30 = vld [vmem:[%s1867_s22 + $0x50] sm:$0xff] }
  0x19   : > { %636 = vperm.xlu0 %1767, %v614_v20   ;;  %v624_v31 = vld [vmem:[%s1867_s22 + $0x58] sm:$0xff]  ;;  %v625_v32 = vld [vmem:[%s1867_s22 + $0x60] sm:$0xff]  ;;  %v626_v33 = vld [vmem:[%s1867_s22 + $0x68] sm:$0xff]  ;;  %1755 = vmatpush3.bf16.msra.mxu0 %v1752_v53 }
  0x1a   : > { %1671 = vmatmul.mubr.msk.f32.gmra.mrb[4].mxu0 %vm419_vm0, %v399_v16  ;;  %v627_v34 = vld [vmem:[%s1867_s22 + $0x70] sm:$0xff]  ;;  %v628_v35 = vld [vmem:[%s1867_s22 + $0x78] sm:$0xff]  ;;  %v1122_v36 = vld [vmem:[%s1911_s25] sm:$0xff] }
  0x1b   : > { %1683 = vmatmul.mubr.msk.f32.gmra.mrb[4].mxu1 %vm419_vm0, %v407_v17  ;;  %1673 = vmatprep.mubr.msk.f32.mxu0 %vm419_vm0, %v400_v18  ;;  %v1123_v37 = vld [vmem:[%s1911_s25 + $0x8] sm:$0xff]  ;;  %v1124_v38 = vld [vmem:[%s1911_s25 + $0x10] sm:$0xff]  ;;  %v1125_v39 = vld [vmem:[%s1911_s25 + $0x18] sm:$0xff] }
  0x1c   : > { %1685 = vmatprep.mubr.msk.f32.mxu1 %vm419_vm0, %v408_v19  ;;  %656 = vperm.xlu1 %1768, %v618_v25   ;;  %v1126_v40 = vld [vmem:[%s1911_s25 + $0x20] sm:$0xff]  ;;  %v1127_v41 = vld [vmem:[%s1911_s25 + $0x28] sm:$0xff]  ;;  %v1128_v42 = vld [vmem:[%s1911_s25 + $0x30] sm:$0xff] }
  0x1d   : > { %651 = vperm.xlu0 %1767, %v617_v24   ;;  %v1129_v43 = vld [vmem:[%s1911_s25 + $0x38] sm:$0xff]  ;;  %v1130_v44 = vld [vmem:[%s1911_s25 + $0x40] sm:$0xff]  ;;  %v1131_v45 = vld [vmem:[%s1911_s25 + $0x48] sm:$0xff] }
  0x1e   : > { %1674 = vmatmul.mubr.msk.f32.gmra.mrb[6].mxu0 %vm419_vm0, %v401_v22  ;;  %v1132_v51 = vld [vmem:[%s1911_s25 + $0x50] sm:$0xff]  ;;  %v1133_v52 = vld [vmem:[%s1911_s25 + $0x58] sm:$0xff]  ;;  %v1134_v54 = vld [vmem:[%s1911_s25 + $0x60] sm:$0xff] }
  0x1f   : > { %1686 = vmatmul.mubr.msk.f32.gmra.mrb[6].mxu1 %vm419_vm0, %v409_v23  ;;  %v1135_v55 = vld [vmem:[%s1911_s25 + $0x68] sm:$0xff]  ;;  %v1136_v56 = vld [vmem:[%s1911_s25 + $0x70] sm:$0xff]  ;;  %v1137_v57 = vld [vmem:[%s1911_s25 + $0x78] sm:$0xff] }
  0x20   : > { %666 = vperm.xlu1 %1768, %v620_v27  }
  0x21   : > { %661 = vperm.xlu0 %1767, %v619_v26  }
  0x24   : > { %676 = vperm.xlu1 %1768, %v622_v29  }
  0x25   : > { %671 = vperm.xlu0 %1767, %v621_v28  }
  0x28   : > { %686 = vperm.xlu1 %1768, %v624_v31  }
  0x29   : > { %681 = vperm.xlu0 %1767, %v623_v30  }
  0x2c   : > { %696 = vperm.xlu1 %1768, %v626_v33  }
  0x2d   : > { %691 = vperm.xlu0 %1767, %v625_v32  }
  0x30   : > { %706 = vperm.xlu1 %1768, %v628_v35  }
  0x31   : > { %701 = vperm.xlu0 %1767, %v627_v34  }
  0x34   : > { %1145 = vperm.xlu1 %1768, %v1123_v37  }
  0x35   : > { %1140 = vperm.xlu0 %1767, %v1122_v36  }
  0x38   : > { %1155 = vperm.xlu1 %1768, %v1125_v39  }
  0x39   : > { %1150 = vperm.xlu0 %1767, %v1124_v38  }
  0x3c   : > { %1165 = vperm.xlu1 %1768, %v1127_v41  }
  0x3d   : > { %1160 = vperm.xlu0 %1767, %v1126_v40  }
  0x40   : > { %1175 = vperm.xlu1 %1768, %v1129_v43  }
  0x41   : > { %1170 = vperm.xlu0 %1767, %v1128_v42  }
  0x44   : > { %1185 = vperm.xlu1 %1768, %v1131_v45  }
  0x45   : > { %1180 = vperm.xlu0 %1767, %v1130_v44  }
  0x48   : > { %1195 = vperm.xlu1 %1768, %v1133_v52  }
  0x49   : > { %1190 = vperm.xlu0 %1767, %v1132_v51  }
  0x4c   : > { %1205 = vperm.xlu1 %1768, %v1135_v55  }
  0x4d   : > { %1200 = vperm.xlu0 %1767, %v1134_v54  }
  0x50   : > { %1215 = vperm.xlu1 %1768, %v1137_v57  }
  0x51   : > { %1210 = vperm.xlu0 %1767, %v1136_v56  }
  0x93   : > { %v642_v59 = vpop.permute.xlu1 %641 }
  0x94   : > { %v632_v58 = vpop.permute.xlu0 %631 }
  0x97   : > { %v647_v61 = vpop.permute.xlu1 %646 }
  0x98   : > { %v637_v60 = vpop.permute.xlu0 %636 }
  0x9b   : > { %v657_v0 = vpop.permute.xlu1 %656 }
  0x9c   : > { %v652_v62 = vpop.permute.xlu0 %651 }
  0x9f   : > { %v667_v16 = vpop.permute.xlu1 %666 }
  0xa0   : > { %v662_v7 = vpop.permute.xlu0 %661 }
  0xa3   : > { %v677_v33 = vpop.permute.xlu1 %676 }
  0xa4   : > { %v672_v25 = vpop.permute.xlu0 %671 }
  0xa7   : > { %v687_v42 = vpop.permute.xlu1 %686 }
  0xa8   : > { %v682_v37 = vpop.permute.xlu0 %681 }
  0xab   : > { %v697_v50 = vpop.permute.xlu1 %696 }
  0xac   : > { %v692_v47 = vpop.permute.xlu0 %691 }
  0xaf   : > { %v707_v57 = vpop.permute.xlu1 %706 }
  0xb0   : > { %v702_v53 = vpop.permute.xlu0 %701 }
  0xe5   : > { %v1666_v1 = vpop.f32.mrb[0].mxu0 }
  0xe6   : > { %v1678_v2 = vpop.f32.mrb[0].mxu1  ;;  %v540_v3 = vadd.f32 %v1666_v1, %v1944_v63  ;;  %v534_v4 = vpop.f32.mrb[1].mxu0  ;;  %v1997_v1 = vld [vmem:[%s2061_s7] ss:$0 sm:$0xff] }
  0xe7   : > { %v574_v5 = vpop.f32.mrb[1].mxu1  ;;  %v535_v6 = vadd.f32 %v1944_v63, %v534_v4  ;;  %v580_v38 = vadd.f32 %v1678_v2, %v1944_v63 }
  0xe8   : > { %v710_v11 = vmul.f32 %v637_v60, %v540_v3  ;;  %v575_v34 = vadd.f32 %v1944_v63, %v574_v5  ;;  %v1141_v60 = vpop.permute.xlu0 %1140 }
  0xe9   : > { %v709_v8 = vmul.f32 %v632_v58, %v535_v6  ;;  %v1669_v9 = vpop.f32.mrb[2].mxu0  ;;  %1720 = vmatprep.mubr.msk.f32.mxu0 %vm419_vm0, %v535_v6  ;;  %v718_v43 = vmul.f32 %v677_v33, %v580_v38 }
  0xea   : > { %v1681_v10 = vpop.f32.mrb[2].mxu1  ;;  %v550_v12 = vadd.f32 %v1669_v9, %v1944_v63  ;;  %v544_v13 = vpop.f32.mrb[3].mxu0  ;;  %1721 = vmatmul.mubr.msk.f32.vlgmr.msra.gmra.mrb[8].mxu0 %vm419_vm0, %v540_v3  ;;  %v717_v40 = vmul.f32 %v672_v25, %v575_v34 }
  0xeb   : > { %v584_v14 = vpop.f32.mrb[3].mxu1  ;;  %v545_v15 = vadd.f32 %v1944_v63, %v544_v13  ;;  %1692 = vmatprep.mubr.msk.f32.mxu1 %vm419_vm0, %v709_v8  ;;  %v590_v44 = vadd.f32 %v1681_v10, %v1944_v63 }
  0xec   : > { %1693 = vmatmul.mubr.msk.f32.vlgmr.msra.gmra.mrb[8].mxu1 %vm419_vm0, %v710_v11  ;;  %v712_v20 = vmul.f32 %v647_v61, %v550_v12  ;;  %v585_v41 = vadd.f32 %v1944_v63, %v584_v14 }
  0xed   : > { %v711_v17 = vmul.f32 %v642_v59, %v545_v15  ;;  %v1672_v18 = vpop.f32.mrb[4].mxu0  ;;  %1723 = vmatprep.mubr.msk.f32.mxu0 %vm419_vm0, %v545_v15  ;;  %v720_v48 = vmul.f32 %v687_v42, %v590_v44  ;;  %v1146_v59 = vpop.permute.xlu1 %1145 }
  0xee   : > { %v1684_v19 = vpop.f32.mrb[4].mxu1  ;;  %v560_v21 = vadd.f32 %v1672_v18, %v1944_v63  ;;  %v554_v22 = vpop.f32.mrb[5].mxu0  ;;  %1724 = vmatmul.mubr.msk.f32.gmra.mrb[10].mxu0 %vm419_vm0, %v550_v12  ;;  %v719_v45 = vmul.f32 %v682_v37, %v585_v41 }
  0xef   : > { %v594_v23 = vpop.f32.mrb[5].mxu1  ;;  %v555_v24 = vadd.f32 %v1944_v63, %v554_v22  ;;  %1695 = vmatprep.mubr.msk.f32.mxu1 %vm419_vm0, %v711_v17  ;;  %v600_v49 = vadd.f32 %v1684_v19, %v1944_v63 }
  0xf0   : > { %1696 = vmatmul.mubr.msk.f32.gmra.mrb[10].mxu1 %vm419_vm0, %v712_v20  ;;  %v714_v29 = vmul.f32 %v657_v0, %v560_v21  ;;  %v595_v46 = vadd.f32 %v1944_v63, %v594_v23 }
  0xf1   : > { %v713_v26 = vmul.f32 %v652_v62, %v555_v24  ;;  %v1675_v27 = vpop.f32.mrb[6].mxu0  ;;  %1726 = vmatprep.mubr.msk.f32.mxu0 %vm419_vm0, %v555_v24  ;;  %v722_v54 = vmul.f32 %v697_v50, %v600_v49  ;;  %v1156_v61 = vpop.permute.xlu1 %1155 }
  0xf2   : > { %v1687_v28 = vpop.f32.mrb[6].mxu1  ;;  %v570_v30 = vadd.f32 %v1675_v27, %v1944_v63  ;;  %v564_v31 = vpop.f32.mrb[7].mxu0  ;;  %1727 = vmatmul.mubr.msk.f32.gmra.mrb[12].mxu0 %vm419_vm0, %v560_v21  ;;  %v721_v51 = vmul.f32 %v692_v47, %v595_v46 }
  0xf3   : > { %v604_v32 = vpop.f32.mrb[7].mxu1  ;;  %v565_v35 = vadd.f32 %v1944_v63, %v564_v31  ;;  %1698 = vmatprep.mubr.msk.f32.mxu1 %vm419_vm0, %v713_v26  ;;  %v610_v55 = vadd.f32 %v1687_v28, %v1944_v63  ;;  %v1151_v62 = vpop.permute.xlu0 %1150 }
  0xf4   : > { %1699 = vmatmul.mubr.msk.f32.gmra.mrb[12].mxu1 %vm419_vm0, %v714_v29  ;;  %v716_v39 = vmul.f32 %v667_v16, %v570_v30  ;;  %v605_v52 = vadd.f32 %v1944_v63, %v604_v32 }
  0xf5   : > { %v715_v36 = vmul.f32 %v662_v7, %v565_v35  ;;  %1729 = vmatprep.mubr.msk.f32.mxu0 %vm419_vm0, %v565_v35  ;;  %v724_v58 = vmul.f32 %v707_v57, %v610_v55  ;;  %v1166_v63 = vpop.permute.xlu1 %1165 }
  0xf6   : > { %1730 = vmatmul.mubr.msk.f32.gmra.mrb[14].mxu0 %vm419_vm0, %v570_v30  ;;  %v723_v56 = vmul.f32 %v702_v53, %v605_v52 }
  0xf7   : > { %1701 = vmatprep.mubr.msk.f32.mxu1 %vm419_vm0, %v715_v36  ;;  %1732 = vmatprep.mubr.msk.f32.mxu0 %vm419_vm0, %v575_v34  ;;  %v1161_v2 = vpop.permute.xlu0 %1160 }
  0xf8   : > { %1702 = vmatmul.mubr.msk.f32.gmra.mrb[14].mxu1 %vm419_vm0, %v716_v39 }
  0xf9   : > { %1704 = vmatprep.mubr.msk.f32.mxu1 %vm419_vm0, %v717_v40  ;;  %v1176_v14 = vpop.permute.xlu1 %1175 }
  0xfa   : > { %1733 = vmatmul.mubr.msk.f32.gmra.mrb[16].mxu0 %vm419_vm0, %v580_v38 }
  0xfb   : > { %1735 = vmatprep.mubr.msk.f32.mxu0 %vm419_vm0, %v585_v41  ;;  %v1171_v17 = vpop.permute.xlu0 %1170 }
  0xfc   : > { %1705 = vmatmul.mubr.msk.f32.gmra.mrb[16].mxu1 %vm419_vm0, %v718_v43 }
  0xfd   : > { %1707 = vmatprep.mubr.msk.f32.mxu1 %vm419_vm0, %v719_v45  ;;  %v1186_v32 = vpop.permute.xlu1 %1185 }
  0xfe   : > { %1736 = vmatmul.mubr.msk.f32.gmra.mrb[18].mxu0 %vm419_vm0, %v590_v44 }
  0xff   : > { %1738 = vmatprep.mubr.msk.f32.mxu0 %vm419_vm0, %v595_v46  ;;  %v1181_v37 = vpop.permute.xlu0 %1180 }
 0x100   : > { %1708 = vmatmul.mubr.msk.f32.gmra.mrb[18].mxu1 %vm419_vm0, %v720_v48 }
 0x101   : > { %1710 = vmatprep.mubr.msk.f32.mxu1 %vm419_vm0, %v721_v51  ;;  %v1196_v51 = vpop.permute.xlu1 %1195 }
 0x102   : > { %1739 = vmatmul.mubr.msk.f32.gmra.mrb[20].mxu0 %vm419_vm0, %v600_v49 }
 0x103   : > { %1741 = vmatprep.mubr.msk.f32.mxu0 %vm419_vm0, %v605_v52 }
 0x104   : > { %1711 = vmatmul.mubr.msk.f32.gmra.mrb[20].mxu1 %vm419_vm0, %v722_v54  ;;  %v1191_v54 = vpop.permute.xlu0 %1190 }
 0x105   : > { %1713 = vmatprep.mubr.msk.f32.mxu1 %vm419_vm0, %v723_v56 }
 0x106   : > { %1742 = vmatmul.mubr.msk.f32.gmra.mrb[22].mxu0 %vm419_vm0, %v610_v55 }
 0x108   : > { %1714 = vmatmul.mubr.msk.f32.gmra.mrb[22].mxu1 %vm419_vm0, %v724_v58 }
 0x1bd   : > { %v1722_v0 = vpop.f32.mrb[8].mxu0 }
 0x1be   : > { %v1043_v3 = vpop.f32.mrb[9].mxu0  ;;  %v1049_v5 = vadd.f32 %v1722_v0, %v1997_v1 }
 0x1bf   : > { %v1694_v4 = vpop.f32.mrb[8].mxu1  ;;  %v1044_v8 = vadd.f32 %v1997_v1, %v1043_v3 }
 0x1c0   : > { %v1219_v6 = vmul.f32 %v1694_v4, %v1146_v59  ;;  %v841_v7 = vpop.f32.mrb[9].mxu1 }
 0x1c1   : > { %v1218_v9 = vmul.f32 %v1141_v60, %v841_v7  ;;  %v1562_v10 = vpack.c.bf16 %v1694_v4, %v841_v7  ;;  %v1725_v11 = vpop.f32.mrb[10].mxu0 }
 0x1c2   : > { %v1235_v12 = vadd.f32 %v1219_v6, %v1049_v5  ;;  %v1053_v13 = vpop.f32.mrb[11].mxu0  ;;  %v1059_v18 = vadd.f32 %v1725_v11, %v1997_v1  ;;  %v1206_v6 = vpop.permute.xlu1 %1205 }
 0x1c3   : > { %v1234_v15 = vadd.f32 %v1218_v9, %v1044_v8  ;;  %1563 = vst [vmem:[%s2004_s23] sm:$0xff] %v1562_v10   ;;  %v1697_v16 = vpop.f32.mrb[10].mxu1  ;;  %v1054_v21 = vadd.f32 %v1997_v1, %v1053_v13  ;;  %v1201_v11 = vpop.permute.xlu0 %1200 }
 0x1c4   : > { %1251 = vst [vmem:[%s2011_s26 + $0x8] sm:$0xff] %v1235_v12  ;;  %v1221_v19 = vmul.f32 %v1697_v16, %v1156_v61  ;;  %v851_v20 = vpop.f32.mrb[11].mxu1 }
 0x1c5   : > { %1250 = vst [vmem:[%s2011_s26] sm:$0xff] %v1234_v15  ;;  %v1220_v22 = vmul.f32 %v1151_v62, %v851_v20  ;;  %v1567_v23 = vpack.c.bf16 %v1697_v16, %v851_v20  ;;  %v1728_v24 = vpop.f32.mrb[12].mxu0 }
 0x1c6   : > { %v1237_v25 = vadd.f32 %v1221_v19, %v1059_v18  ;;  %v1063_v26 = vpop.f32.mrb[13].mxu0  ;;  %v1069_v29 = vadd.f32 %v1728_v24, %v1997_v1 }
 0x1c7   : > { %v1236_v27 = vadd.f32 %v1220_v22, %v1054_v21  ;;  %1599 = vst [vmem:[%s2004_s23 + $0x8] sm:$0xff] %v1567_v23   ;;  %v1700_v28 = vpop.f32.mrb[12].mxu1  ;;  %v1064_v33 = vadd.f32 %v1997_v1, %v1063_v26 }
 0x1c8   : > { %1253 = vst [vmem:[%s2011_s26 + $0x18] sm:$0xff] %v1237_v25  ;;  %v1223_v30 = vmul.f32 %v1700_v28, %v1166_v63  ;;  %v861_v31 = vpop.f32.mrb[13].mxu1  ;;  %v1216_v25 = vpop.permute.xlu1 %1215 }
 0x1c9   : > { %1252 = vst [vmem:[%s2011_s26 + $0x10] sm:$0xff] %v1236_v27  ;;  %v1222_v34 = vmul.f32 %v1161_v2, %v861_v31  ;;  %v1572_v35 = vpack.c.bf16 %v1700_v28, %v861_v31  ;;  %v1731_v36 = vpop.f32.mrb[14].mxu0  ;;  %v1211_v28 = vpop.permute.xlu0 %1210 }
 0x1ca   : > { %v1239_v38 = vadd.f32 %v1223_v30, %v1069_v29  ;;  %v1073_v39 = vpop.f32.mrb[15].mxu0  ;;  %v1079_v42 = vadd.f32 %v1731_v36, %v1997_v1 }
 0x1cb   : > { %v1238_v40 = vadd.f32 %v1222_v34, %v1064_v33  ;;  %1600 = vst [vmem:[%s2004_s23 + $0x10] sm:$0xff] %v1572_v35   ;;  %v1703_v41 = vpop.f32.mrb[14].mxu1  ;;  %v1074_v45 = vadd.f32 %v1997_v1, %v1073_v39 }
 0x1cc   : > { %1255 = vst [vmem:[%s2011_s26 + $0x28] sm:$0xff] %v1239_v38  ;;  %v1225_v43 = vmul.f32 %v1703_v41, %v1176_v14  ;;  %v871_v44 = vpop.f32.mrb[15].mxu1 }
 0x1cd   : > { %1254 = vst [vmem:[%s2011_s26 + $0x20] sm:$0xff] %v1238_v40  ;;  %v1224_v46 = vmul.f32 %v1171_v17, %v871_v44  ;;  %v1577_v47 = vpack.c.bf16 %v1703_v41, %v871_v44  ;;  %v1734_v48 = vpop.f32.mrb[16].mxu0 }
 0x1ce   : > { %v1241_v49 = vadd.f32 %v1225_v43, %v1079_v42  ;;  %v1083_v50 = vpop.f32.mrb[17].mxu0  ;;  %v1089_v55 = vadd.f32 %v1734_v48, %v1997_v1 }
 0x1cf   : > { %v1240_v52 = vadd.f32 %v1224_v46, %v1074_v45  ;;  %1601 = vst [vmem:[%s2004_s23 + $0x18] sm:$0xff] %v1577_v47   ;;  %v1706_v53 = vpop.f32.mrb[16].mxu1  ;;  %v1084_v58 = vadd.f32 %v1997_v1, %v1083_v50 }
 0x1d0   : > { %1257 = vst [vmem:[%s2011_s26 + $0x38] sm:$0xff] %v1241_v49  ;;  %v1227_v56 = vmul.f32 %v1706_v53, %v1186_v32  ;;  %v881_v57 = vpop.f32.mrb[17].mxu1 }
 0x1d1   : > { %1256 = vst [vmem:[%s2011_s26 + $0x30] sm:$0xff] %v1240_v52  ;;  %v1226_v59 = vmul.f32 %v1181_v37, %v881_v57  ;;  %v1582_v60 = vpack.c.bf16 %v1706_v53, %v881_v57  ;;  %v1737_v61 = vpop.f32.mrb[18].mxu0 }
 0x1d2   : > { %v1243_v62 = vadd.f32 %v1227_v56, %v1089_v55  ;;  %v1093_v63 = vpop.f32.mrb[19].mxu0  ;;  %v1099_v3 = vadd.f32 %v1737_v61, %v1997_v1 }
 0x1d3   : > { %v1242_v0 = vadd.f32 %v1226_v59, %v1084_v58  ;;  %1602 = vst [vmem:[%s2004_s23 + $0x20] sm:$0xff] %v1582_v60   ;;  %v1709_v2 = vpop.f32.mrb[18].mxu1  ;;  %v1094_v7 = vadd.f32 %v1997_v1, %v1093_v63 }
 0x1d4   : > { %1259 = vst [vmem:[%s2011_s26 + $0x48] sm:$0xff] %v1243_v62  ;;  %v1229_v4 = vmul.f32 %v1709_v2, %v1196_v51  ;;  %v891_v5 = vpop.f32.mrb[19].mxu1 }
 0x1d5   : > { %1258 = vst [vmem:[%s2011_s26 + $0x40] sm:$0xff] %v1242_v0  ;;  %v1228_v8 = vmul.f32 %v1191_v54, %v891_v5  ;;  %v1587_v9 = vpack.c.bf16 %v1709_v2, %v891_v5  ;;  %v1740_v10 = vpop.f32.mrb[20].mxu0 }
 0x1d6   : > { %v1245_v12 = vadd.f32 %v1229_v4, %v1099_v3  ;;  %v1103_v13 = vpop.f32.mrb[21].mxu0  ;;  %v1109_v16 = vadd.f32 %v1740_v10, %v1997_v1 }
 0x1d7   : > { %v1244_v14 = vadd.f32 %v1228_v8, %v1094_v7  ;;  %1603 = vst [vmem:[%s2004_s23 + $0x28] sm:$0xff] %v1587_v9   ;;  %v1712_v15 = vpop.f32.mrb[20].mxu1  ;;  %v1104_v19 = vadd.f32 %v1997_v1, %v1103_v13 }
 0x1d8   : > { %1261 = vst [vmem:[%s2011_s26 + $0x58] sm:$0xff] %v1245_v12  ;;  %v1231_v17 = vmul.f32 %v1712_v15, %v1206_v6  ;;  %v901_v18 = vpop.f32.mrb[21].mxu1 }
 0x1d9   : > { %1260 = vst [vmem:[%s2011_s26 + $0x50] sm:$0xff] %v1244_v14  ;;  %v1230_v20 = vmul.f32 %v1201_v11, %v901_v18  ;;  %v1592_v21 = vpack.c.bf16 %v1712_v15, %v901_v18  ;;  %v1743_v22 = vpop.f32.mrb[22].mxu0 }
 0x1da   : > { %v1247_v23 = vadd.f32 %v1231_v17, %v1109_v16  ;;  %v1113_v24 = vpop.f32.mrb[23].mxu0  ;;  %v1119_v29 = vadd.f32 %v1743_v22, %v1997_v1 }
 0x1db   : > { %v1246_v26 = vadd.f32 %v1230_v20, %v1104_v19  ;;  %1604 = vst [vmem:[%s2004_s23 + $0x30] sm:$0xff] %v1592_v21   ;;  %v1715_v27 = vpop.f32.mrb[22].mxu1  ;;  %v1114_v32 = vadd.f32 %v1997_v1, %v1113_v24 }
 0x1dc   : > { %1263 = vst [vmem:[%s2011_s26 + $0x68] sm:$0xff] %v1247_v23  ;;  %v1233_v30 = vmul.f32 %v1715_v27, %v1216_v25  ;;  %v911_v31 = vpop.f32.mrb[23].mxu1 }
 0x1dd   : > { %1262 = vst [vmem:[%s2011_s26 + $0x60] sm:$0xff] %v1246_v26  ;;  %v1232_v33 = vmul.f32 %v1211_v28, %v911_v31  ;;  %v1597_v34 = vpack.c.bf16 %v1715_v27, %v911_v31 }
 0x1de   : > { %v1249_v35 = vadd.f32 %v1233_v30, %v1119_v29 }
 0x1df   : > { %v1248_v36 = vadd.f32 %v1232_v33, %v1114_v32  ;;  %1605 = vst [vmem:[%s2004_s23 + $0x38] sm:$0xff] %v1597_v34  }
 0x1e0   : > { %1265 = vst [vmem:[%s2011_s26 + $0x78] sm:$0xff] %v1249_v35 }
 0x1e1   : > { %1264 = vst [vmem:[%s2011_s26 + $0x70] sm:$0xff] %v1248_v36 }
 0x1e2 PF: > { %s20_s30 = sadd.s32 1, %s1775_s30  }
 0x1e3   : > { %p17_p4 = scmp.ge.s32.totalorder %s20_s30, 4  }
 0x1e5   :  { %19 = sbr.rel (!%p17_p4) target bundleno = 1 (0x1), region = 100 }

// kernel: image_gcn_forward.3
= control target key start
LH: loop header
LB: loop body
LE: loop exit
PB: predicated region body
PF: predicated region fallthrough
CT: control target
= control target key end

     0   :  { %s6005_s21 = smov 0   ;;  %s6007_s22 = smov 0   ;;  %s7489_s0 = inlined_call_operand.vmem [shape: bf16[256,256], index: 0, kind: input, shape index: {}]   ;;  %s7490_s1 = inlined_call_operand.vmem [shape: bf16[256,128], index: 1, kind: input, shape index: {}]   ;;  %s7491_s2 = inlined_call_operand.vmem [shape: bf16[256,256], index: 2, kind: input, shape index: {}]   ;;  %s7492_s3 = inlined_call_operand.vmem [shape: bf16[8,256,256], index: 3, kind: input, shape index: {}]   ;;  %s7493_s4 = inlined_call_operand.vmem [shape: f32[256,128], index: 4, kind: input, shape index: {}]   ;;  %s7494_s5 = inlined_call_operand.vmem [shape: f32[9,128], index: 5, kind: input, shape index: {}]   ;;  %s7495_s6 = inlined_call_operand.vmem [shape: f32[256,128], index: 6, kind: output, shape index: {}]  }
   0x1   :  { %s6009_s23 = smov 0   ;;  %s6011_s24 = smov 0  }
   0x2   :  { %s6013_s25 = smov 0  }
   0x3 LB: > { %s28_s26 = sadd.s32 1, %s5962_s24  ;;  %p98_p1 = scmp.ne.s32.totalorder %s5954_s22, %s5950_s21  ;;  %s5966_s25 = sphi %s6013_s25, %s16_s25   ;;  %s5962_s24 = sphi %s6011_s24, %s7516_s24   ;;  %s5958_s23 = sphi %s6009_s23, %s7515_s23   ;;  %s5954_s22 = sphi %s6007_s22, %s7514_s22   ;;  %s5950_s21 = sphi %s6005_s21, %s7513_s21  }
   0x4   : > { %p30_p0 = scmp.ge.s32.totalorder %s28_s26, 2  ;;  %p99_p2 = scmp.eq.s32.totalorder %s5966_s25, 0 }
   0x5   : > { %s91_s29 = sadd.s32 1, %s5954_s22  ;;  %p4659_p5 = scmp.ge.s32.totalorder %s5966_s25, 2 }
   0x6   : > { %s7518_s26 = smov (%p30_p0, %s28_s26), 0  ;;  %p6036_p3 = por %p99_p2, %p98_p1 }
   0x7   : > { %s87_s28 = ssub.s32 %s5962_s24, %s7518_s26  ;;  %237 = sbr.rel (%p4659_p5) target bundleno = 213 (0xd5), region = 24 }
   0x8   : > { %p89_p4 = scmp.eq.s32.totalorder %s87_s28, 0 }
   0xa   : > { %s6044_s30 = scalar_select %p89_p4, %s5954_s22, %s91_s29  }
   0xe   : > { %255 = sbr.rel (!%p6036_p3) target bundleno = 39 (0x27), region = 32  ;;  %s257_s7 = sand.u32 (%p6036_p3), 1, %s5954_s22  }
   0xf   : > { %s4661_s8 = sshll.u32 (%p6036_p3), %s5962_s24, 2  ;;  %s4660_s9 = sshll.u32 (%p6036_p3), %s257_s7, 7 }
  0x10   : > { %s6054_s12 = scalar_lea.vmem (%p6036_p3), %s7491_s2, %s4661_s8  ;;  %s6058_s13 = scalar_lea.vmem (%p6036_p3), [#allocation3], %s4660_s9 }
  0x11   : > { %v280_v0 = vld [vmem:[%s6054_s12] sm:$0xf] (%p6036_p3)  ;;  %v282_v1 = vld [vmem:[%s6054_s12 + $0x8] sm:$0xf] (%p6036_p3)  ;;  %v284_v2 = vld [vmem:[%s6054_s12 + $0x10] sm:$0xf] (%p6036_p3) }
  0x12   : > { %281 = vst [vmem:[%s6058_s13] sm:$0xf] (%p6036_p3), %v280_v0  ;;  %283 = vst [vmem:[%s6058_s13 + $0x4] sm:$0xf] (%p6036_p3), %v282_v1  ;;  %v286_v3 = vld [vmem:[%s6054_s12 + $0x18] sm:$0xf] (%p6036_p3) }
  0x13   : > { %v288_v4 = vld [vmem:[%s6054_s12 + $0x20] sm:$0xf] (%p6036_p3)  ;;  %285 = vst [vmem:[%s6058_s13 + $0x8] sm:$0xf] (%p6036_p3), %v284_v2  ;;  %287 = vst [vmem:[%s6058_s13 + $0xc] sm:$0xf] (%p6036_p3), %v286_v3 }
  0x14   : > { %289 = vst [vmem:[%s6058_s13 + $0x10] sm:$0xf] (%p6036_p3), %v288_v4  ;;  %v290_v5 = vld [vmem:[%s6054_s12 + $0x28] sm:$0xf] (%p6036_p3)  ;;  %v292_v6 = vld [vmem:[%s6054_s12 + $0x30] sm:$0xf] (%p6036_p3) }
  0x15   : > { %v294_v7 = vld [vmem:[%s6054_s12 + $0x38] sm:$0xf]  ;;  %291 = vst [vmem:[%s6058_s13 + $0x14] sm:$0xf] %v290_v5  ;;  %293 = vst [vmem:[%s6058_s13 + $0x18] sm:$0xf] %v292_v6 }
  0x16   : > { %295 = vst [vmem:[%s6058_s13 + $0x1c] sm:$0xf] %v294_v7  ;;  %v296_v8 = vld [vmem:[%s6054_s12 + $0x40] sm:$0xf]  ;;  %v298_v9 = vld [vmem:[%s6054_s12 + $0x48] sm:$0xf] }
  0x17   : > { %v300_v10 = vld [vmem:[%s6054_s12 + $0x50] sm:$0xf]  ;;  %297 = vst [vmem:[%s6058_s13 + $0x20] sm:$0xf] %v296_v8  ;;  %299 = vst [vmem:[%s6058_s13 + $0x24] sm:$0xf] %v298_v9 }
  0x18   : > { %301 = vst [vmem:[%s6058_s13 + $0x28] sm:$0xf] %v300_v10  ;;  %v302_v11 = vld [vmem:[%s6054_s12 + $0x58] sm:$0xf]  ;;  %v304_v12 = vld [vmem:[%s6054_s12 + $0x60] sm:$0xf] }
  0x19   : > { %v306_v13 = vld [vmem:[%s6054_s12 + $0x68] sm:$0xf]  ;;  %303 = vst [vmem:[%s6058_s13 + $0x2c] sm:$0xf] %v302_v11  ;;  %305 = vst [vmem:[%s6058_s13 + $0x30] sm:$0xf] %v304_v12 }
  0x1a   : > { %307 = vst [vmem:[%s6058_s13 + $0x34] sm:$0xf] %v306_v13  ;;  %v308_v14 = vld [vmem:[%s6054_s12 + $0x70] sm:$0xf]  ;;  %v310_v15 = vld [vmem:[%s6054_s12 + $0x78] sm:$0xf] }
  0x1b   : > { %v312_v16 = vld [vmem:[%s6054_s12 + $0x80] sm:$0xf]  ;;  %309 = vst [vmem:[%s6058_s13 + $0x38] sm:$0xf] %v308_v14  ;;  %311 = vst [vmem:[%s6058_s13 + $0x3c] sm:$0xf] %v310_v15 }
  0x1c   : > { %313 = vst [vmem:[%s6058_s13 + $0x40] sm:$0xf] %v312_v16  ;;  %v314_v17 = vld [vmem:[%s6054_s12 + $0x88] sm:$0xf]  ;;  %v316_v18 = vld [vmem:[%s6054_s12 + $0x90] sm:$0xf] }
  0x1d   : > { %v318_v19 = vld [vmem:[%s6054_s12 + $0x98] sm:$0xf]  ;;  %315 = vst [vmem:[%s6058_s13 + $0x44] sm:$0xf] %v314_v17  ;;  %317 = vst [vmem:[%s6058_s13 + $0x48] sm:$0xf] %v316_v18 }
  0x1e   : > { %319 = vst [vmem:[%s6058_s13 + $0x4c] sm:$0xf] %v318_v19  ;;  %v320_v20 = vld [vmem:[%s6054_s12 + $0xa0] sm:$0xf]  ;;  %v322_v21 = vld [vmem:[%s6054_s12 + $0xa8] sm:$0xf] }
  0x1f   : > { %v324_v22 = vld [vmem:[%s6054_s12 + $0xb0] sm:$0xf]  ;;  %321 = vst [vmem:[%s6058_s13 + $0x50] sm:$0xf] %v320_v20  ;;  %323 = vst [vmem:[%s6058_s13 + $0x54] sm:$0xf] %v322_v21 }
  0x20   : > { %325 = vst [vmem:[%s6058_s13 + $0x58] sm:$0xf] %v324_v22  ;;  %v326_v23 = vld [vmem:[%s6054_s12 + $0xb8] sm:$0xf]  ;;  %v328_v24 = vld [vmem:[%s6054_s12 + $0xc0] sm:$0xf] }
  0x21   : > { %v330_v25 = vld [vmem:[%s6054_s12 + $0xc8] sm:$0xf]  ;;  %327 = vst [vmem:[%s6058_s13 + $0x5c] sm:$0xf] %v326_v23  ;;  %329 = vst [vmem:[%s6058_s13 + $0x60] sm:$0xf] %v328_v24 }
  0x22   : > { %331 = vst [vmem:[%s6058_s13 + $0x64] sm:$0xf] %v330_v25  ;;  %v332_v26 = vld [vmem:[%s6054_s12 + $0xd0] sm:$0xf]  ;;  %v334_v27 = vld [vmem:[%s6054_s12 + $0xd8] sm:$0xf] }
  0x23   : > { %v336_v28 = vld [vmem:[%s6054_s12 + $0xe0] sm:$0xf]  ;;  %333 = vst [vmem:[%s6058_s13 + $0x68] sm:$0xf] %v332_v26  ;;  %335 = vst [vmem:[%s6058_s13 + $0x6c] sm:$0xf] %v334_v27 }
  0x24   : > { %337 = vst [vmem:[%s6058_s13 + $0x70] sm:$0xf] %v336_v28  ;;  %v338_v29 = vld [vmem:[%s6054_s12 + $0xe8] sm:$0xf]  ;;  %v340_v30 = vld [vmem:[%s6054_s12 + $0xf0] sm:$0xf] }
  0x25   : > { %v342_v31 = vld [vmem:[%s6054_s12 + $0xf8] sm:$0xf]  ;;  %339 = vst [vmem:[%s6058_s13 + $0x74] sm:$0xf] %v338_v29  ;;  %341 = vst [vmem:[%s6058_s13 + $0x78] sm:$0xf] %v340_v30 }
  0x26   : > { %343 = vst [vmem:[%s6058_s13 + $0x7c] sm:$0xf] %v342_v31 }
  0x27 PF: > { %430 = sbr.rel (!%p6036_p3) target bundleno = 213 (0xd5), region = 73  ;;  %s432_s14 = sand.u32 (%p6036_p3), 1, %s5954_s22  }
  0x28   : > { %s4663_s15 = sshll.u32 (%p6036_p3), %s5962_s24, 2  ;;  %s4662_s16 = sshll.u32 (%p6036_p3), %s432_s14, 10 }
  0x29   : > { %s6129_s19 = scalar_lea.vmem (%p6036_p3), %s7492_s3, %s4663_s15  ;;  %s6133_s20 = scalar_lea.vmem (%p6036_p3), [#allocation4], %s4662_s16 }
  0x2a   : > { %v455_v32 = vld [vmem:[%s6129_s19] sm:$0xf] (%p6036_p3)  ;;  %v457_v33 = vld [vmem:[%s6129_s19 + $0x8] sm:$0xf] (%p6036_p3)  ;;  %v459_v34 = vld [vmem:[%s6129_s19 + $0x10] sm:$0xf] (%p6036_p3) }
  0x2b   : > { %456 = vst [vmem:[%s6133_s20] sm:$0xf] (%p6036_p3), %v455_v32  ;;  %458 = vst [vmem:[%s6133_s20 + $0x4] sm:$0xf] (%p6036_p3), %v457_v33  ;;  %v461_v35 = vld [vmem:[%s6129_s19 + $0x18] sm:$0xf] (%p6036_p3) }
  0x2c   : > { %v463_v36 = vld [vmem:[%s6129_s19 + $0x20] sm:$0xf] (%p6036_p3)  ;;  %460 = vst [vmem:[%s6133_s20 + $0x8] sm:$0xf] (%p6036_p3), %v459_v34  ;;  %462 = vst [vmem:[%s6133_s20 + $0xc] sm:$0xf] (%p6036_p3), %v461_v35 }
  0x2d   : > { %464 = vst [vmem:[%s6133_s20 + $0x10] sm:$0xf] (%p6036_p3), %v463_v36  ;;  %v465_v37 = vld [vmem:[%s6129_s19 + $0x28] sm:$0xf] (%p6036_p3)  ;;  %v467_v38 = vld [vmem:[%s6129_s19 + $0x30] sm:$0xf] (%p6036_p3) }
  0x2e   : > { %v469_v39 = vld [vmem:[%s6129_s19 + $0x38] sm:$0xf]  ;;  %466 = vst [vmem:[%s6133_s20 + $0x14] sm:$0xf] %v465_v37  ;;  %468 = vst [vmem:[%s6133_s20 + $0x18] sm:$0xf] %v467_v38 }
  0x2f   : > { %470 = vst [vmem:[%s6133_s20 + $0x1c] sm:$0xf] %v469_v39  ;;  %v471_v40 = vld [vmem:[%s6129_s19 + $0x40] sm:$0xf]  ;;  %v473_v41 = vld [vmem:[%s6129_s19 + $0x48] sm:$0xf] }
  0x30   : > { %v475_v42 = vld [vmem:[%s6129_s19 + $0x50] sm:$0xf]  ;;  %472 = vst [vmem:[%s6133_s20 + $0x20] sm:$0xf] %v471_v40  ;;  %474 = vst [vmem:[%s6133_s20 + $0x24] sm:$0xf] %v473_v41 }
  0x31   : > { %476 = vst [vmem:[%s6133_s20 + $0x28] sm:$0xf] %v475_v42  ;;  %v477_v43 = vld [vmem:[%s6129_s19 + $0x58] sm:$0xf]  ;;  %v479_v44 = vld [vmem:[%s6129_s19 + $0x60] sm:$0xf] }
  0x32   : > { %v481_v45 = vld [vmem:[%s6129_s19 + $0x68] sm:$0xf]  ;;  %478 = vst [vmem:[%s6133_s20 + $0x2c] sm:$0xf] %v477_v43  ;;  %480 = vst [vmem:[%s6133_s20 + $0x30] sm:$0xf] %v479_v44 }
  0x33   : > { %482 = vst [vmem:[%s6133_s20 + $0x34] sm:$0xf] %v481_v45  ;;  %v483_v46 = vld [vmem:[%s6129_s19 + $0x70] sm:$0xf]  ;;  %v485_v47 = vld [vmem:[%s6129_s19 + $0x78] sm:$0xf] }
  0x34   : > { %v487_v48 = vld [vmem:[%s6129_s19 + $0x80] sm:$0xf]  ;;  %484 = vst [vmem:[%s6133_s20 + $0x38] sm:$0xf] %v483_v46  ;;  %486 = vst [vmem:[%s6133_s20 + $0x3c] sm:$0xf] %v485_v47 }
  0x35   : > { %488 = vst [vmem:[%s6133_s20 + $0x40] sm:$0xf] %v487_v48  ;;  %v489_v49 = vld [vmem:[%s6129_s19 + $0x88] sm:$0xf]  ;;  %v491_v50 = vld [vmem:[%s6129_s19 + $0x90] sm:$0xf] }
  0x36   : > { %v493_v51 = vld [vmem:[%s6129_s19 + $0x98] sm:$0xf]  ;;  %490 = vst [vmem:[%s6133_s20 + $0x44] sm:$0xf] %v489_v49  ;;  %492 = vst [vmem:[%s6133_s20 + $0x48] sm:$0xf] %v491_v50 }
  0x37   : > { %494 = vst [vmem:[%s6133_s20 + $0x4c] sm:$0xf] %v493_v51  ;;  %v495_v52 = vld [vmem:[%s6129_s19 + $0xa0] sm:$0xf]  ;;  %v497_v53 = vld [vmem:[%s6129_s19 + $0xa8] sm:$0xf] }
  0x38   : > { %v499_v54 = vld [vmem:[%s6129_s19 + $0xb0] sm:$0xf]  ;;  %496 = vst [vmem:[%s6133_s20 + $0x50] sm:$0xf] %v495_v52  ;;  %498 = vst [vmem:[%s6133_s20 + $0x54] sm:$0xf] %v497_v53 }
  0x39   : > { %500 = vst [vmem:[%s6133_s20 + $0x58] sm:$0xf] %v499_v54  ;;  %v501_v55 = vld [vmem:[%s6129_s19 + $0xb8] sm:$0xf]  ;;  %v503_v56 = vld [vmem:[%s6129_s19 + $0xc0] sm:$0xf] }
  0x3a   : > { %v505_v57 = vld [vmem:[%s6129_s19 + $0xc8] sm:$0xf]  ;;  %502 = vst [vmem:[%s6133_s20 + $0x5c] sm:$0xf] %v501_v55  ;;  %504 = vst [vmem:[%s6133_s20 + $0x60] sm:$0xf] %v503_v56 }
  0x3b   : > { %506 = vst [vmem:[%s6133_s20 + $0x64] sm:$0xf] %v505_v57  ;;  %v507_v58 = vld [vmem:[%s6129_s19 + $0xd0] sm:$0xf]  ;;  %v509_v59 = vld [vmem:[%s6129_s19 + $0xd8] sm:$0xf] }
  0x3c   : > { %v511_v60 = vld [vmem:[%s6129_s19 + $0xe0] sm:$0xf]  ;;  %508 = vst [vmem:[%s6133_s20 + $0x68] sm:$0xf] %v507_v58  ;;  %510 = vst [vmem:[%s6133_s20 + $0x6c] sm:$0xf] %v509_v59 }
  0x3d   : > { %512 = vst [vmem:[%s6133_s20 + $0x70] sm:$0xf] %v511_v60  ;;  %v513_v61 = vld [vmem:[%s6129_s19 + $0xe8] sm:$0xf]  ;;  %v515_v62 = vld [vmem:[%s6129_s19 + $0xf0] sm:$0xf] }
  0x3e   : > { %v517_v63 = vld [vmem:[%s6129_s19 + $0xf8] sm:$0xf]  ;;  %514 = vst [vmem:[%s6133_s20 + $0x74] sm:$0xf] %v513_v61  ;;  %516 = vst [vmem:[%s6133_s20 + $0x78] sm:$0xf] %v515_v62 }
  0x3f   : > { %518 = vst [vmem:[%s6133_s20 + $0x7c] sm:$0xf] %v517_v63  ;;  %v519_v0 = vld [vmem:[%s6129_s19 + $0x100] sm:$0xf]  ;;  %v521_v1 = vld [vmem:[%s6129_s19 + $0x108] sm:$0xf] }
  0x40   : > { %v523_v2 = vld [vmem:[%s6129_s19 + $0x110] sm:$0xf]  ;;  %520 = vst [vmem:[%s6133_s20 + $0x80] sm:$0xf] %v519_v0  ;;  %522 = vst [vmem:[%s6133_s20 + $0x84] sm:$0xf] %v521_v1 }
  0x41   : > { %524 = vst [vmem:[%s6133_s20 + $0x88] sm:$0xf] %v523_v2  ;;  %v525_v3 = vld [vmem:[%s6129_s19 + $0x118] sm:$0xf]  ;;  %v527_v4 = vld [vmem:[%s6129_s19 + $0x120] sm:$0xf] }
  0x42   : > { %v529_v5 = vld [vmem:[%s6129_s19 + $0x128] sm:$0xf]  ;;  %526 = vst [vmem:[%s6133_s20 + $0x8c] sm:$0xf] %v525_v3  ;;  %528 = vst [vmem:[%s6133_s20 + $0x90] sm:$0xf] %v527_v4 }
  0x43   : > { %530 = vst [vmem:[%s6133_s20 + $0x94] sm:$0xf] %v529_v5  ;;  %v531_v6 = vld [vmem:[%s6129_s19 + $0x130] sm:$0xf]  ;;  %v533_v7 = vld [vmem:[%s6129_s19 + $0x138] sm:$0xf] }
  0x44   : > { %v535_v8 = vld [vmem:[%s6129_s19 + $0x140] sm:$0xf]  ;;  %532 = vst [vmem:[%s6133_s20 + $0x98] sm:$0xf] %v531_v6  ;;  %534 = vst [vmem:[%s6133_s20 + $0x9c] sm:$0xf] %v533_v7 }
  0x45   : > { %536 = vst [vmem:[%s6133_s20 + $0xa0] sm:$0xf] %v535_v8  ;;  %v537_v9 = vld [vmem:[%s6129_s19 + $0x148] sm:$0xf]  ;;  %v539_v10 = vld [vmem:[%s6129_s19 + $0x150] sm:$0xf] }
  0x46   : > { %v541_v11 = vld [vmem:[%s6129_s19 + $0x158] sm:$0xf]  ;;  %538 = vst [vmem:[%s6133_s20 + $0xa4] sm:$0xf] %v537_v9  ;;  %540 = vst [vmem:[%s6133_s20 + $0xa8] sm:$0xf] %v539_v10 }
  0x47   : > { %542 = vst [vmem:[%s6133_s20 + $0xac] sm:$0xf] %v541_v11  ;;  %v543_v12 = vld [vmem:[%s6129_s19 + $0x160] sm:$0xf]  ;;  %v545_v13 = vld [vmem:[%s6129_s19 + $0x168] sm:$0xf] }
  0x48   : > { %v547_v14 = vld [vmem:[%s6129_s19 + $0x170] sm:$0xf]  ;;  %544 = vst [vmem:[%s6133_s20 + $0xb0] sm:$0xf] %v543_v12  ;;  %546 = vst [vmem:[%s6133_s20 + $0xb4] sm:$0xf] %v545_v13 }
  0x49   : > { %548 = vst [vmem:[%s6133_s20 + $0xb8] sm:$0xf] %v547_v14  ;;  %v549_v15 = vld [vmem:[%s6129_s19 + $0x178] sm:$0xf]  ;;  %v551_v16 = vld [vmem:[%s6129_s19 + $0x180] sm:$0xf] }
  0x4a   : > { %v553_v17 = vld [vmem:[%s6129_s19 + $0x188] sm:$0xf]  ;;  %550 = vst [vmem:[%s6133_s20 + $0xbc] sm:$0xf] %v549_v15  ;;  %552 = vst [vmem:[%s6133_s20 + $0xc0] sm:$0xf] %v551_v16 }
  0x4b   : > { %554 = vst [vmem:[%s6133_s20 + $0xc4] sm:$0xf] %v553_v17  ;;  %v555_v18 = vld [vmem:[%s6129_s19 + $0x190] sm:$0xf]  ;;  %v557_v19 = vld [vmem:[%s6129_s19 + $0x198] sm:$0xf] }
  0x4c   : > { %v559_v20 = vld [vmem:[%s6129_s19 + $0x1a0] sm:$0xf]  ;;  %556 = vst [vmem:[%s6133_s20 + $0xc8] sm:$0xf] %v555_v18  ;;  %558 = vst [vmem:[%s6133_s20 + $0xcc] sm:$0xf] %v557_v19 }
  0x4d   : > { %560 = vst [vmem:[%s6133_s20 + $0xd0] sm:$0xf] %v559_v20  ;;  %v561_v21 = vld [vmem:[%s6129_s19 + $0x1a8] sm:$0xf]  ;;  %v563_v22 = vld [vmem:[%s6129_s19 + $0x1b0] sm:$0xf] }
  0x4e   : > { %v565_v23 = vld [vmem:[%s6129_s19 + $0x1b8] sm:$0xf]  ;;  %562 = vst [vmem:[%s6133_s20 + $0xd4] sm:$0xf] %v561_v21  ;;  %564 = vst [vmem:[%s6133_s20 + $0xd8] sm:$0xf] %v563_v22 }
  0x4f   : > { %566 = vst [vmem:[%s6133_s20 + $0xdc] sm:$0xf] %v565_v23  ;;  %v567_v24 = vld [vmem:[%s6129_s19 + $0x1c0] sm:$0xf]  ;;  %v569_v25 = vld [vmem:[%s6129_s19 + $0x1c8] sm:$0xf] }
  0x50   : > { %v571_v26 = vld [vmem:[%s6129_s19 + $0x1d0] sm:$0xf]  ;;  %568 = vst [vmem:[%s6133_s20 + $0xe0] sm:$0xf] %v567_v24  ;;  %570 = vst [vmem:[%s6133_s20 + $0xe4] sm:$0xf] %v569_v25 }
  0x51   : > { %572 = vst [vmem:[%s6133_s20 + $0xe8] sm:$0xf] %v571_v26  ;;  %v573_v27 = vld [vmem:[%s6129_s19 + $0x1d8] sm:$0xf]  ;;  %v575_v28 = vld [vmem:[%s6129_s19 + $0x1e0] sm:$0xf] }
  0x52   : > { %v577_v29 = vld [vmem:[%s6129_s19 + $0x1e8] sm:$0xf]  ;;  %574 = vst [vmem:[%s6133_s20 + $0xec] sm:$0xf] %v573_v27  ;;  %576 = vst [vmem:[%s6133_s20 + $0xf0] sm:$0xf] %v575_v28 }
  0x53   : > { %578 = vst [vmem:[%s6133_s20 + $0xf4] sm:$0xf] %v577_v29  ;;  %v579_v30 = vld [vmem:[%s6129_s19 + $0x1f0] sm:$0xf]  ;;  %v581_v31 = vld [vmem:[%s6129_s19 + $0x1f8] sm:$0xf] }
  0x54   : > { %v583_v32 = vld [vmem:[%s6129_s19 + $0x200] sm:$0xf]  ;;  %580 = vst [vmem:[%s6133_s20 + $0xf8] sm:$0xf] %v579_v30  ;;  %582 = vst [vmem:[%s6133_s20 + $0xfc] sm:$0xf] %v581_v31 }
  0x55   : > { %584 = vst [vmem:[%s6133_s20 + $0x100] sm:$0xf] %v583_v32  ;;  %v585_v33 = vld [vmem:[%s6129_s19 + $0x208] sm:$0xf]  ;;  %v587_v34 = vld [vmem:[%s6129_s19 + $0x210] sm:$0xf] }
  0x56   : > { %v589_v35 = vld [vmem:[%s6129_s19 + $0x218] sm:$0xf]  ;;  %586 = vst [vmem:[%s6133_s20 + $0x104] sm:$0xf] %v585_v33  ;;  %588 = vst [vmem:[%s6133_s20 + $0x108] sm:$0xf] %v587_v34 }
  0x57   : > { %590 = vst [vmem:[%s6133_s20 + $0x10c] sm:$0xf] %v589_v35  ;;  %v591_v36 = vld [vmem:[%s6129_s19 + $0x220] sm:$0xf]  ;;  %v593_v37 = vld [vmem:[%s6129_s19 + $0x228] sm:$0xf] }
  0x58   : > { %v595_v38 = vld [vmem:[%s6129_s19 + $0x230] sm:$0xf]  ;;  %592 = vst [vmem:[%s6133_s20 + $0x110] sm:$0xf] %v591_v36  ;;  %594 = vst [vmem:[%s6133_s20 + $0x114] sm:$0xf] %v593_v37 }
  0x59   : > { %596 = vst [vmem:[%s6133_s20 + $0x118] sm:$0xf] %v595_v38  ;;  %v597_v39 = vld [vmem:[%s6129_s19 + $0x238] sm:$0xf]  ;;  %v599_v40 = vld [vmem:[%s6129_s19 + $0x240] sm:$0xf] }
  0x5a   : > { %v601_v41 = vld [vmem:[%s6129_s19 + $0x248] sm:$0xf]  ;;  %598 = vst [vmem:[%s6133_s20 + $0x11c] sm:$0xf] %v597_v39  ;;  %600 = vst [vmem:[%s6133_s20 + $0x120] sm:$0xf] %v599_v40 }
  0x5b   : > { %602 = vst [vmem:[%s6133_s20 + $0x124] sm:$0xf] %v601_v41  ;;  %v603_v42 = vld [vmem:[%s6129_s19 + $0x250] sm:$0xf]  ;;  %v605_v43 = vld [vmem:[%s6129_s19 + $0x258] sm:$0xf] }
  0x5c   : > { %v607_v44 = vld [vmem:[%s6129_s19 + $0x260] sm:$0xf]  ;;  %604 = vst [vmem:[%s6133_s20 + $0x128] sm:$0xf] %v603_v42  ;;  %606 = vst [vmem:[%s6133_s20 + $0x12c] sm:$0xf] %v605_v43 }
  0x5d   : > { %608 = vst [vmem:[%s6133_s20 + $0x130] sm:$0xf] %v607_v44  ;;  %v609_v45 = vld [vmem:[%s6129_s19 + $0x268] sm:$0xf]  ;;  %v611_v46 = vld [vmem:[%s6129_s19 + $0x270] sm:$0xf] }
  0x5e   : > { %v613_v47 = vld [vmem:[%s6129_s19 + $0x278] sm:$0xf]  ;;  %610 = vst [vmem:[%s6133_s20 + $0x134] sm:$0xf] %v609_v45  ;;  %612 = vst [vmem:[%s6133_s20 + $0x138] sm:$0xf] %v611_v46 }
  0x5f   : > { %614 = vst [vmem:[%s6133_s20 + $0x13c] sm:$0xf] %v613_v47  ;;  %v615_v48 = vld [vmem:[%s6129_s19 + $0x280] sm:$0xf]  ;;  %v617_v49 = vld [vmem:[%s6129_s19 + $0x288] sm:$0xf] }
  0x60   : > { %v619_v50 = vld [vmem:[%s6129_s19 + $0x290] sm:$0xf]  ;;  %616 = vst [vmem:[%s6133_s20 + $0x140] sm:$0xf] %v615_v48  ;;  %618 = vst [vmem:[%s6133_s20 + $0x144] sm:$0xf] %v617_v49 }
  0x61   : > { %620 = vst [vmem:[%s6133_s20 + $0x148] sm:$0xf] %v619_v50  ;;  %v621_v51 = vld [vmem:[%s6129_s19 + $0x298] sm:$0xf]  ;;  %v623_v52 = vld [vmem:[%s6129_s19 + $0x2a0] sm:$0xf] }
  0x62   : > { %v625_v53 = vld [vmem:[%s6129_s19 + $0x2a8] sm:$0xf]  ;;  %622 = vst [vmem:[%s6133_s20 + $0x14c] sm:$0xf] %v621_v51  ;;  %624 = vst [vmem:[%s6133_s20 + $0x150] sm:$0xf] %v623_v52 }
  0x63   : > { %626 = vst [vmem:[%s6133_s20 + $0x154] sm:$0xf] %v625_v53  ;;  %v627_v54 = vld [vmem:[%s6129_s19 + $0x2b0] sm:$0xf]  ;;  %v629_v55 = vld [vmem:[%s6129_s19 + $0x2b8] sm:$0xf] }
  0x64   : > { %v631_v56 = vld [vmem:[%s6129_s19 + $0x2c0] sm:$0xf]  ;;  %628 = vst [vmem:[%s6133_s20 + $0x158] sm:$0xf] %v627_v54  ;;  %630 = vst [vmem:[%s6133_s20 + $0x15c] sm:$0xf] %v629_v55 }
  0x65   : > { %632 = vst [vmem:[%s6133_s20 + $0x160] sm:$0xf] %v631_v56  ;;  %v633_v57 = vld [vmem:[%s6129_s19 + $0x2c8] sm:$0xf]  ;;  %v635_v58 = vld [vmem:[%s6129_s19 + $0x2d0] sm:$0xf] }
  0x66   : > { %v637_v59 = vld [vmem:[%s6129_s19 + $0x2d8] sm:$0xf]  ;;  %634 = vst [vmem:[%s6133_s20 + $0x164] sm:$0xf] %v633_v57  ;;  %636 = vst [vmem:[%s6133_s20 + $0x168] sm:$0xf] %v635_v58 }
  0x67   : > { %638 = vst [vmem:[%s6133_s20 + $0x16c] sm:$0xf] %v637_v59  ;;  %v639_v60 = vld [vmem:[%s6129_s19 + $0x2e0] sm:$0xf]  ;;  %v641_v61 = vld [vmem:[%s6129_s19 + $0x2e8] sm:$0xf] }
  0x68   : > { %v643_v62 = vld [vmem:[%s6129_s19 + $0x2f0] sm:$0xf]  ;;  %640 = vst [vmem:[%s6133_s20 + $0x170] sm:$0xf] %v639_v60  ;;  %642 = vst [vmem:[%s6133_s20 + $0x174] sm:$0xf] %v641_v61 }
  0x69   : > { %644 = vst [vmem:[%s6133_s20 + $0x178] sm:$0xf] %v643_v62  ;;  %v645_v63 = vld [vmem:[%s6129_s19 + $0x2f8] sm:$0xf]  ;;  %v647_v0 = vld [vmem:[%s6129_s19 + $0x300] sm:$0xf] }
  0x6a   : > { %v649_v1 = vld [vmem:[%s6129_s19 + $0x308] sm:$0xf]  ;;  %646 = vst [vmem:[%s6133_s20 + $0x17c] sm:$0xf] %v645_v63  ;;  %648 = vst [vmem:[%s6133_s20 + $0x180] sm:$0xf] %v647_v0 }
  0x6b   : > { %650 = vst [vmem:[%s6133_s20 + $0x184] sm:$0xf] %v649_v1  ;;  %v651_v2 = vld [vmem:[%s6129_s19 + $0x310] sm:$0xf]  ;;  %v653_v3 = vld [vmem:[%s6129_s19 + $0x318] sm:$0xf] }
  0x6c   : > { %v655_v4 = vld [vmem:[%s6129_s19 + $0x320] sm:$0xf]  ;;  %652 = vst [vmem:[%s6133_s20 + $0x188] sm:$0xf] %v651_v2  ;;  %654 = vst [vmem:[%s6133_s20 + $0x18c] sm:$0xf] %v653_v3 }
  0x6d   : > { %656 = vst [vmem:[%s6133_s20 + $0x190] sm:$0xf] %v655_v4  ;;  %v657_v5 = vld [vmem:[%s6129_s19 + $0x328] sm:$0xf]  ;;  %v659_v6 = vld [vmem:[%s6129_s19 + $0x330] sm:$0xf] }
  0x6e   : > { %v661_v7 = vld [vmem:[%s6129_s19 + $0x338] sm:$0xf]  ;;  %658 = vst [vmem:[%s6133_s20 + $0x194] sm:$0xf] %v657_v5  ;;  %660 = vst [vmem:[%s6133_s20 + $0x198] sm:$0xf] %v659_v6 }
  0x6f   : > { %662 = vst [vmem:[%s6133_s20 + $0x19c] sm:$0xf] %v661_v7  ;;  %v663_v8 = vld [vmem:[%s6129_s19 + $0x340] sm:$0xf]  ;;  %v665_v9 = vld [vmem:[%s6129_s19 + $0x348] sm:$0xf] }
  0x70   : > { %v667_v10 = vld [vmem:[%s6129_s19 + $0x350] sm:$0xf]  ;;  %664 = vst [vmem:[%s6133_s20 + $0x1a0] sm:$0xf] %v663_v8  ;;  %666 = vst [vmem:[%s6133_s20 + $0x1a4] sm:$0xf] %v665_v9 }
  0x71   : > { %668 = vst [vmem:[%s6133_s20 + $0x1a8] sm:$0xf] %v667_v10  ;;  %v669_v11 = vld [vmem:[%s6129_s19 + $0x358] sm:$0xf]  ;;  %v671_v12 = vld [vmem:[%s6129_s19 + $0x360] sm:$0xf] }
  0x72   : > { %v673_v13 = vld [vmem:[%s6129_s19 + $0x368] sm:$0xf]  ;;  %670 = vst [vmem:[%s6133_s20 + $0x1ac] sm:$0xf] %v669_v11  ;;  %672 = vst [vmem:[%s6133_s20 + $0x1b0] sm:$0xf] %v671_v12 }
  0x73   : > { %674 = vst [vmem:[%s6133_s20 + $0x1b4] sm:$0xf] %v673_v13  ;;  %v675_v14 = vld [vmem:[%s6129_s19 + $0x370] sm:$0xf]  ;;  %v677_v15 = vld [vmem:[%s6129_s19 + $0x378] sm:$0xf] }
  0x74   : > { %v679_v16 = vld [vmem:[%s6129_s19 + $0x380] sm:$0xf]  ;;  %676 = vst [vmem:[%s6133_s20 + $0x1b8] sm:$0xf] %v675_v14  ;;  %678 = vst [vmem:[%s6133_s20 + $0x1bc] sm:$0xf] %v677_v15 }
  0x75   : > { %680 = vst [vmem:[%s6133_s20 + $0x1c0] sm:$0xf] %v679_v16  ;;  %v681_v17 = vld [vmem:[%s6129_s19 + $0x388] sm:$0xf]  ;;  %v683_v18 = vld [vmem:[%s6129_s19 + $0x390] sm:$0xf] }
  0x76   : > { %v685_v19 = vld [vmem:[%s6129_s19 + $0x398] sm:$0xf]  ;;  %682 = vst [vmem:[%s6133_s20 + $0x1c4] sm:$0xf] %v681_v17  ;;  %684 = vst [vmem:[%s6133_s20 + $0x1c8] sm:$0xf] %v683_v18 }
  0x77   : > { %686 = vst [vmem:[%s6133_s20 + $0x1cc] sm:$0xf] %v685_v19  ;;  %v687_v20 = vld [vmem:[%s6129_s19 + $0x3a0] sm:$0xf]  ;;  %v689_v21 = vld [vmem:[%s6129_s19 + $0x3a8] sm:$0xf] }
  0x78   : > { %v691_v22 = vld [vmem:[%s6129_s19 + $0x3b0] sm:$0xf]  ;;  %688 = vst [vmem:[%s6133_s20 + $0x1d0] sm:$0xf] %v687_v20  ;;  %690 = vst [vmem:[%s6133_s20 + $0x1d4] sm:$0xf] %v689_v21 }
  0x79   : > { %692 = vst [vmem:[%s6133_s20 + $0x1d8] sm:$0xf] %v691_v22  ;;  %v693_v23 = vld [vmem:[%s6129_s19 + $0x3b8] sm:$0xf]  ;;  %v695_v24 = vld [vmem:[%s6129_s19 + $0x3c0] sm:$0xf] }
  0x7a   : > { %v697_v25 = vld [vmem:[%s6129_s19 + $0x3c8] sm:$0xf]  ;;  %694 = vst [vmem:[%s6133_s20 + $0x1dc] sm:$0xf] %v693_v23  ;;  %696 = vst [vmem:[%s6133_s20 + $0x1e0] sm:$0xf] %v695_v24 }
  0x7b   : > { %698 = vst [vmem:[%s6133_s20 + $0x1e4] sm:$0xf] %v697_v25  ;;  %v699_v26 = vld [vmem:[%s6129_s19 + $0x3d0] sm:$0xf]  ;;  %v701_v27 = vld [vmem:[%s6129_s19 + $0x3d8] sm:$0xf] }
  0x7c   : > { %v703_v28 = vld [vmem:[%s6129_s19 + $0x3e0] sm:$0xf]  ;;  %700 = vst [vmem:[%s6133_s20 + $0x1e8] sm:$0xf] %v699_v26  ;;  %702 = vst [vmem:[%s6133_s20 + $0x1ec] sm:$0xf] %v701_v27 }
  0x7d   : > { %704 = vst [vmem:[%s6133_s20 + $0x1f0] sm:$0xf] %v703_v28  ;;  %v705_v29 = vld [vmem:[%s6129_s19 + $0x3e8] sm:$0xf]  ;;  %v707_v30 = vld [vmem:[%s6129_s19 + $0x3f0] sm:$0xf] }
  0x7e   : > { %v709_v31 = vld [vmem:[%s6129_s19 + $0x3f8] sm:$0xf]  ;;  %706 = vst [vmem:[%s6133_s20 + $0x1f4] sm:$0xf] %v705_v29  ;;  %708 = vst [vmem:[%s6133_s20 + $0x1f8] sm:$0xf] %v707_v30 }
  0x7f   : > { %710 = vst [vmem:[%s6133_s20 + $0x1fc] sm:$0xf] %v709_v31  ;;  %v711_v32 = vld [vmem:[%s6129_s19 + $0x400] sm:$0xf]  ;;  %v713_v33 = vld [vmem:[%s6129_s19 + $0x408] sm:$0xf] }
  0x80   : > { %v715_v34 = vld [vmem:[%s6129_s19 + $0x410] sm:$0xf]  ;;  %712 = vst [vmem:[%s6133_s20 + $0x200] sm:$0xf] %v711_v32  ;;  %714 = vst [vmem:[%s6133_s20 + $0x204] sm:$0xf] %v713_v33 }
  0x81   : > { %716 = vst [vmem:[%s6133_s20 + $0x208] sm:$0xf] %v715_v34  ;;  %v717_v35 = vld [vmem:[%s6129_s19 + $0x418] sm:$0xf]  ;;  %v719_v36 = vld [vmem:[%s6129_s19 + $0x420] sm:$0xf] }
  0x82   : > { %v721_v37 = vld [vmem:[%s6129_s19 + $0x428] sm:$0xf]  ;;  %718 = vst [vmem:[%s6133_s20 + $0x20c] sm:$0xf] %v717_v35  ;;  %720 = vst [vmem:[%s6133_s20 + $0x210] sm:$0xf] %v719_v36 }
  0x83   : > { %722 = vst [vmem:[%s6133_s20 + $0x214] sm:$0xf] %v721_v37  ;;  %v723_v38 = vld [vmem:[%s6129_s19 + $0x430] sm:$0xf]  ;;  %v725_v39 = vld [vmem:[%s6129_s19 + $0x438] sm:$0xf] }
  0x84   : > { %v727_v40 = vld [vmem:[%s6129_s19 + $0x440] sm:$0xf]  ;;  %724 = vst [vmem:[%s6133_s20 + $0x218] sm:$0xf] %v723_v38  ;;  %726 = vst [vmem:[%s6133_s20 + $0x21c] sm:$0xf] %v725_v39 }
  0x85   : > { %728 = vst [vmem:[%s6133_s20 + $0x220] sm:$0xf] %v727_v40  ;;  %v729_v41 = vld [vmem:[%s6129_s19 + $0x448] sm:$0xf]  ;;  %v731_v42 = vld [vmem:[%s6129_s19 + $0x450] sm:$0xf] }
  0x86   : > { %v733_v43 = vld [vmem:[%s6129_s19 + $0x458] sm:$0xf]  ;;  %730 = vst [vmem:[%s6133_s20 + $0x224] sm:$0xf] %v729_v41  ;;  %732 = vst [vmem:[%s6133_s20 + $0x228] sm:$0xf] %v731_v42 }
  0x87   : > { %734 = vst [vmem:[%s6133_s20 + $0x22c] sm:$0xf] %v733_v43  ;;  %v735_v44 = vld [vmem:[%s6129_s19 + $0x460] sm:$0xf]  ;;  %v737_v45 = vld [vmem:[%s6129_s19 + $0x468] sm:$0xf] }
  0x88   : > { %v739_v46 = vld [vmem:[%s6129_s19 + $0x470] sm:$0xf]  ;;  %736 = vst [vmem:[%s6133_s20 + $0x230] sm:$0xf] %v735_v44  ;;  %738 = vst [vmem:[%s6133_s20 + $0x234] sm:$0xf] %v737_v45 }
  0x89   : > { %740 = vst [vmem:[%s6133_s20 + $0x238] sm:$0xf] %v739_v46  ;;  %v741_v47 = vld [vmem:[%s6129_s19 + $0x478] sm:$0xf]  ;;  %v743_v48 = vld [vmem:[%s6129_s19 + $0x480] sm:$0xf] }
  0x8a   : > { %v745_v49 = vld [vmem:[%s6129_s19 + $0x488] sm:$0xf]  ;;  %742 = vst [vmem:[%s6133_s20 + $0x23c] sm:$0xf] %v741_v47  ;;  %744 = vst [vmem:[%s6133_s20 + $0x240] sm:$0xf] %v743_v48 }
  0x8b   : > { %746 = vst [vmem:[%s6133_s20 + $0x244] sm:$0xf] %v745_v49  ;;  %v747_v50 = vld [vmem:[%s6129_s19 + $0x490] sm:$0xf]  ;;  %v749_v51 = vld [vmem:[%s6129_s19 + $0x498] sm:$0xf] }
  0x8c   : > { %v751_v52 = vld [vmem:[%s6129_s19 + $0x4a0] sm:$0xf]  ;;  %748 = vst [vmem:[%s6133_s20 + $0x248] sm:$0xf] %v747_v50  ;;  %750 = vst [vmem:[%s6133_s20 + $0x24c] sm:$0xf] %v749_v51 }
  0x8d   : > { %752 = vst [vmem:[%s6133_s20 + $0x250] sm:$0xf] %v751_v52  ;;  %v753_v53 = vld [vmem:[%s6129_s19 + $0x4a8] sm:$0xf]  ;;  %v755_v54 = vld [vmem:[%s6129_s19 + $0x4b0] sm:$0xf] }
  0x8e   : > { %v757_v55 = vld [vmem:[%s6129_s19 + $0x4b8] sm:$0xf]  ;;  %754 = vst [vmem:[%s6133_s20 + $0x254] sm:$0xf] %v753_v53  ;;  %756 = vst [vmem:[%s6133_s20 + $0x258] sm:$0xf] %v755_v54 }
  0x8f   : > { %758 = vst [vmem:[%s6133_s20 + $0x25c] sm:$0xf] %v757_v55  ;;  %v759_v56 = vld [vmem:[%s6129_s19 + $0x4c0] sm:$0xf]  ;;  %v761_v57 = vld [vmem:[%s6129_s19 + $0x4c8] sm:$0xf] }
  0x90   : > { %v763_v58 = vld [vmem:[%s6129_s19 + $0x4d0] sm:$0xf]  ;;  %760 = vst [vmem:[%s6133_s20 + $0x260] sm:$0xf] %v759_v56  ;;  %762 = vst [vmem:[%s6133_s20 + $0x264] sm:$0xf] %v761_v57 }
  0x91   : > { %764 = vst [vmem:[%s6133_s20 + $0x268] sm:$0xf] %v763_v58  ;;  %v765_v59 = vld [vmem:[%s6129_s19 + $0x4d8] sm:$0xf]  ;;  %v767_v60 = vld [vmem:[%s6129_s19 + $0x4e0] sm:$0xf] }
  0x92   : > { %v769_v61 = vld [vmem:[%s6129_s19 + $0x4e8] sm:$0xf]  ;;  %766 = vst [vmem:[%s6133_s20 + $0x26c] sm:$0xf] %v765_v59  ;;  %768 = vst [vmem:[%s6133_s20 + $0x270] sm:$0xf] %v767_v60 }
  0x93   : > { %770 = vst [vmem:[%s6133_s20 + $0x274] sm:$0xf] %v769_v61  ;;  %v771_v62 = vld [vmem:[%s6129_s19 + $0x4f0] sm:$0xf]  ;;  %v773_v63 = vld [vmem:[%s6129_s19 + $0x4f8] sm:$0xf] }
  0x94   : > { %v775_v0 = vld [vmem:[%s6129_s19 + $0x500] sm:$0xf]  ;;  %772 = vst [vmem:[%s6133_s20 + $0x278] sm:$0xf] %v771_v62  ;;  %774 = vst [vmem:[%s6133_s20 + $0x27c] sm:$0xf] %v773_v63 }
  0x95   : > { %776 = vst [vmem:[%s6133_s20 + $0x280] sm:$0xf] %v775_v0  ;;  %v777_v1 = vld [vmem:[%s6129_s19 + $0x508] sm:$0xf]  ;;  %v779_v2 = vld [vmem:[%s6129_s19 + $0x510] sm:$0xf] }
  0x96   : > { %v781_v3 = vld [vmem:[%s6129_s19 + $0x518] sm:$0xf]  ;;  %778 = vst [vmem:[%s6133_s20 + $0x284] sm:$0xf] %v777_v1  ;;  %780 = vst [vmem:[%s6133_s20 + $0x288] sm:$0xf] %v779_v2 }
  0x97   : > { %782 = vst [vmem:[%s6133_s20 + $0x28c] sm:$0xf] %v781_v3  ;;  %v783_v4 = vld [vmem:[%s6129_s19 + $0x520] sm:$0xf]  ;;  %v785_v5 = vld [vmem:[%s6129_s19 + $0x528] sm:$0xf] }
  0x98   : > { %v787_v6 = vld [vmem:[%s6129_s19 + $0x530] sm:$0xf]  ;;  %784 = vst [vmem:[%s6133_s20 + $0x290] sm:$0xf] %v783_v4  ;;  %786 = vst [vmem:[%s6133_s20 + $0x294] sm:$0xf] %v785_v5 }
  0x99   : > { %788 = vst [vmem:[%s6133_s20 + $0x298] sm:$0xf] %v787_v6  ;;  %v789_v7 = vld [vmem:[%s6129_s19 + $0x538] sm:$0xf]  ;;  %v791_v8 = vld [vmem:[%s6129_s19 + $0x540] sm:$0xf] }
  0x9a   : > { %v793_v9 = vld [vmem:[%s6129_s19 + $0x548] sm:$0xf]  ;;  %790 = vst [vmem:[%s6133_s20 + $0x29c] sm:$0xf] %v789_v7  ;;  %792 = vst [vmem:[%s6133_s20 + $0x2a0] sm:$0xf] %v791_v8 }
  0x9b   : > { %794 = vst [vmem:[%s6133_s20 + $0x2a4] sm:$0xf] %v793_v9  ;;  %v795_v10 = vld [vmem:[%s6129_s19 + $0x550] sm:$0xf]  ;;  %v797_v11 = vld [vmem:[%s6129_s19 + $0x558] sm:$0xf] }
  0x9c   : > { %v799_v12 = vld [vmem:[%s6129_s19 + $0x560] sm:$0xf]  ;;  %796 = vst [vmem:[%s6133_s20 + $0x2a8] sm:$0xf] %v795_v10  ;;  %798 = vst [vmem:[%s6133_s20 + $0x2ac] sm:$0xf] %v797_v11 }
  0x9d   : > { %800 = vst [vmem:[%s6133_s20 + $0x2b0] sm:$0xf] %v799_v12  ;;  %v801_v13 = vld [vmem:[%s6129_s19 + $0x568] sm:$0xf]  ;;  %v803_v14 = vld [vmem:[%s6129_s19 + $0x570] sm:$0xf] }
  0x9e   : > { %v805_v15 = vld [vmem:[%s6129_s19 + $0x578] sm:$0xf]  ;;  %802 = vst [vmem:[%s6133_s20 + $0x2b4] sm:$0xf] %v801_v13  ;;  %804 = vst [vmem:[%s6133_s20 + $0x2b8] sm:$0xf] %v803_v14 }
  0x9f   : > { %806 = vst [vmem:[%s6133_s20 + $0x2bc] sm:$0xf] %v805_v15  ;;  %v807_v16 = vld [vmem:[%s6129_s19 + $0x580] sm:$0xf]  ;;  %v809_v17 = vld [vmem:[%s6129_s19 + $0x588] sm:$0xf] }
  0xa0   : > { %v811_v18 = vld [vmem:[%s6129_s19 + $0x590] sm:$0xf]  ;;  %808 = vst [vmem:[%s6133_s20 + $0x2c0] sm:$0xf] %v807_v16  ;;  %810 = vst [vmem:[%s6133_s20 + $0x2c4] sm:$0xf] %v809_v17 }
  0xa1   : > { %812 = vst [vmem:[%s6133_s20 + $0x2c8] sm:$0xf] %v811_v18  ;;  %v813_v19 = vld [vmem:[%s6129_s19 + $0x598] sm:$0xf]  ;;  %v815_v20 = vld [vmem:[%s6129_s19 + $0x5a0] sm:$0xf] }
  0xa2   : > { %v817_v21 = vld [vmem:[%s6129_s19 + $0x5a8] sm:$0xf]  ;;  %814 = vst [vmem:[%s6133_s20 + $0x2cc] sm:$0xf] %v813_v19  ;;  %816 = vst [vmem:[%s6133_s20 + $0x2d0] sm:$0xf] %v815_v20 }
  0xa3   : > { %818 = vst [vmem:[%s6133_s20 + $0x2d4] sm:$0xf] %v817_v21  ;;  %v819_v22 = vld [vmem:[%s6129_s19 + $0x5b0] sm:$0xf]  ;;  %v821_v23 = vld [vmem:[%s6129_s19 + $0x5b8] sm:$0xf] }
  0xa4   : > { %v823_v24 = vld [vmem:[%s6129_s19 + $0x5c0] sm:$0xf]  ;;  %820 = vst [vmem:[%s6133_s20 + $0x2d8] sm:$0xf] %v819_v22  ;;  %822 = vst [vmem:[%s6133_s20 + $0x2dc] sm:$0xf] %v821_v23 }
  0xa5   : > { %824 = vst [vmem:[%s6133_s20 + $0x2e0] sm:$0xf] %v823_v24  ;;  %v825_v25 = vld [vmem:[%s6129_s19 + $0x5c8] sm:$0xf]  ;;  %v827_v26 = vld [vmem:[%s6129_s19 + $0x5d0] sm:$0xf] }
  0xa6   : > { %v829_v27 = vld [vmem:[%s6129_s19 + $0x5d8] sm:$0xf]  ;;  %826 = vst [vmem:[%s6133_s20 + $0x2e4] sm:$0xf] %v825_v25  ;;  %828 = vst [vmem:[%s6133_s20 + $0x2e8] sm:$0xf] %v827_v26 }
  0xa7   : > { %830 = vst [vmem:[%s6133_s20 + $0x2ec] sm:$0xf] %v829_v27  ;;  %v831_v28 = vld [vmem:[%s6129_s19 + $0x5e0] sm:$0xf]  ;;  %v833_v29 = vld [vmem:[%s6129_s19 + $0x5e8] sm:$0xf] }
  0xa8   : > { %v835_v30 = vld [vmem:[%s6129_s19 + $0x5f0] sm:$0xf]  ;;  %832 = vst [vmem:[%s6133_s20 + $0x2f0] sm:$0xf] %v831_v28  ;;  %834 = vst [vmem:[%s6133_s20 + $0x2f4] sm:$0xf] %v833_v29 }
  0xa9   : > { %836 = vst [vmem:[%s6133_s20 + $0x2f8] sm:$0xf] %v835_v30  ;;  %v837_v31 = vld [vmem:[%s6129_s19 + $0x5f8] sm:$0xf]  ;;  %v839_v32 = vld [vmem:[%s6129_s19 + $0x600] sm:$0xf] }
  0xaa   : > { %v841_v33 = vld [vmem:[%s6129_s19 + $0x608] sm:$0xf]  ;;  %838 = vst [vmem:[%s6133_s20 + $0x2fc] sm:$0xf] %v837_v31  ;;  %840 = vst [vmem:[%s6133_s20 + $0x300] sm:$0xf] %v839_v32 }
  0xab   : > { %842 = vst [vmem:[%s6133_s20 + $0x304] sm:$0xf] %v841_v33  ;;  %v843_v34 = vld [vmem:[%s6129_s19 + $0x610] sm:$0xf]  ;;  %v845_v35 = vld [vmem:[%s6129_s19 + $0x618] sm:$0xf] }
  0xac   : > { %v847_v36 = vld [vmem:[%s6129_s19 + $0x620] sm:$0xf]  ;;  %844 = vst [vmem:[%s6133_s20 + $0x308] sm:$0xf] %v843_v34  ;;  %846 = vst [vmem:[%s6133_s20 + $0x30c] sm:$0xf] %v845_v35 }
  0xad   : > { %848 = vst [vmem:[%s6133_s20 + $0x310] sm:$0xf] %v847_v36  ;;  %v849_v37 = vld [vmem:[%s6129_s19 + $0x628] sm:$0xf]  ;;  %v851_v38 = vld [vmem:[%s6129_s19 + $0x630] sm:$0xf] }
  0xae   : > { %v853_v39 = vld [vmem:[%s6129_s19 + $0x638] sm:$0xf]  ;;  %850 = vst [vmem:[%s6133_s20 + $0x314] sm:$0xf] %v849_v37  ;;  %852 = vst [vmem:[%s6133_s20 + $0x318] sm:$0xf] %v851_v38 }
  0xaf   : > { %854 = vst [vmem:[%s6133_s20 + $0x31c] sm:$0xf] %v853_v39  ;;  %v855_v40 = vld [vmem:[%s6129_s19 + $0x640] sm:$0xf]  ;;  %v857_v41 = vld [vmem:[%s6129_s19 + $0x648] sm:$0xf] }
  0xb0   : > { %v859_v42 = vld [vmem:[%s6129_s19 + $0x650] sm:$0xf]  ;;  %856 = vst [vmem:[%s6133_s20 + $0x320] sm:$0xf] %v855_v40  ;;  %858 = vst [vmem:[%s6133_s20 + $0x324] sm:$0xf] %v857_v41 }
  0xb1   : > { %860 = vst [vmem:[%s6133_s20 + $0x328] sm:$0xf] %v859_v42  ;;  %v861_v43 = vld [vmem:[%s6129_s19 + $0x658] sm:$0xf]  ;;  %v863_v44 = vld [vmem:[%s6129_s19 + $0x660] sm:$0xf] }
  0xb2   : > { %v865_v45 = vld [vmem:[%s6129_s19 + $0x668] sm:$0xf]  ;;  %862 = vst [vmem:[%s6133_s20 + $0x32c] sm:$0xf] %v861_v43  ;;  %864 = vst [vmem:[%s6133_s20 + $0x330] sm:$0xf] %v863_v44 }
  0xb3   : > { %866 = vst [vmem:[%s6133_s20 + $0x334] sm:$0xf] %v865_v45  ;;  %v867_v46 = vld [vmem:[%s6129_s19 + $0x670] sm:$0xf]  ;;  %v869_v47 = vld [vmem:[%s6129_s19 + $0x678] sm:$0xf] }
  0xb4   : > { %v871_v48 = vld [vmem:[%s6129_s19 + $0x680] sm:$0xf]  ;;  %868 = vst [vmem:[%s6133_s20 + $0x338] sm:$0xf] %v867_v46  ;;  %870 = vst [vmem:[%s6133_s20 + $0x33c] sm:$0xf] %v869_v47 }
  0xb5   : > { %872 = vst [vmem:[%s6133_s20 + $0x340] sm:$0xf] %v871_v48  ;;  %v873_v49 = vld [vmem:[%s6129_s19 + $0x688] sm:$0xf]  ;;  %v875_v50 = vld [vmem:[%s6129_s19 + $0x690] sm:$0xf] }
  0xb6   : > { %v877_v51 = vld [vmem:[%s6129_s19 + $0x698] sm:$0xf]  ;;  %874 = vst [vmem:[%s6133_s20 + $0x344] sm:$0xf] %v873_v49  ;;  %876 = vst [vmem:[%s6133_s20 + $0x348] sm:$0xf] %v875_v50 }
  0xb7   : > { %878 = vst [vmem:[%s6133_s20 + $0x34c] sm:$0xf] %v877_v51  ;;  %v879_v52 = vld [vmem:[%s6129_s19 + $0x6a0] sm:$0xf]  ;;  %v881_v53 = vld [vmem:[%s6129_s19 + $0x6a8] sm:$0xf] }
  0xb8   : > { %v883_v54 = vld [vmem:[%s6129_s19 + $0x6b0] sm:$0xf]  ;;  %880 = vst [vmem:[%s6133_s20 + $0x350] sm:$0xf] %v879_v52  ;;  %882 = vst [vmem:[%s6133_s20 + $0x354] sm:$0xf] %v881_v53 }
  0xb9   : > { %884 = vst [vmem:[%s6133_s20 + $0x358] sm:$0xf] %v883_v54  ;;  %v885_v55 = vld [vmem:[%s6129_s19 + $0x6b8] sm:$0xf]  ;;  %v887_v56 = vld [vmem:[%s6129_s19 + $0x6c0] sm:$0xf] }
  0xba   : > { %v889_v57 = vld [vmem:[%s6129_s19 + $0x6c8] sm:$0xf]  ;;  %886 = vst [vmem:[%s6133_s20 + $0x35c] sm:$0xf] %v885_v55  ;;  %888 = vst [vmem:[%s6133_s20 + $0x360] sm:$0xf] %v887_v56 }
  0xbb   : > { %890 = vst [vmem:[%s6133_s20 + $0x364] sm:$0xf] %v889_v57  ;;  %v891_v58 = vld [vmem:[%s6129_s19 + $0x6d0] sm:$0xf]  ;;  %v893_v59 = vld [vmem:[%s6129_s19 + $0x6d8] sm:$0xf] }
  0xbc   : > { %v895_v60 = vld [vmem:[%s6129_s19 + $0x6e0] sm:$0xf]  ;;  %892 = vst [vmem:[%s6133_s20 + $0x368] sm:$0xf] %v891_v58  ;;  %894 = vst [vmem:[%s6133_s20 + $0x36c] sm:$0xf] %v893_v59 }
  0xbd   : > { %896 = vst [vmem:[%s6133_s20 + $0x370] sm:$0xf] %v895_v60  ;;  %v897_v61 = vld [vmem:[%s6129_s19 + $0x6e8] sm:$0xf]  ;;  %v899_v62 = vld [vmem:[%s6129_s19 + $0x6f0] sm:$0xf] }
  0xbe   : > { %v901_v63 = vld [vmem:[%s6129_s19 + $0x6f8] sm:$0xf]  ;;  %898 = vst [vmem:[%s6133_s20 + $0x374] sm:$0xf] %v897_v61  ;;  %900 = vst [vmem:[%s6133_s20 + $0x378] sm:$0xf] %v899_v62 }
  0xbf   : > { %902 = vst [vmem:[%s6133_s20 + $0x37c] sm:$0xf] %v901_v63  ;;  %v903_v0 = vld [vmem:[%s6129_s19 + $0x700] sm:$0xf]  ;;  %v905_v1 = vld [vmem:[%s6129_s19 + $0x708] sm:$0xf] }
  0xc0   : > { %v907_v2 = vld [vmem:[%s6129_s19 + $0x710] sm:$0xf]  ;;  %904 = vst [vmem:[%s6133_s20 + $0x380] sm:$0xf] %v903_v0  ;;  %906 = vst [vmem:[%s6133_s20 + $0x384] sm:$0xf] %v905_v1 }
  0xc1   : > { %908 = vst [vmem:[%s6133_s20 + $0x388] sm:$0xf] %v907_v2  ;;  %v909_v3 = vld [vmem:[%s6129_s19 + $0x718] sm:$0xf]  ;;  %v911_v4 = vld [vmem:[%s6129_s19 + $0x720] sm:$0xf] }
  0xc2   : > { %v913_v5 = vld [vmem:[%s6129_s19 + $0x728] sm:$0xf]  ;;  %910 = vst [vmem:[%s6133_s20 + $0x38c] sm:$0xf] %v909_v3  ;;  %912 = vst [vmem:[%s6133_s20 + $0x390] sm:$0xf] %v911_v4 }
  0xc3   : > { %914 = vst [vmem:[%s6133_s20 + $0x394] sm:$0xf] %v913_v5  ;;  %v915_v6 = vld [vmem:[%s6129_s19 + $0x730] sm:$0xf]  ;;  %v917_v7 = vld [vmem:[%s6129_s19 + $0x738] sm:$0xf] }
  0xc4   : > { %v919_v8 = vld [vmem:[%s6129_s19 + $0x740] sm:$0xf]  ;;  %916 = vst [vmem:[%s6133_s20 + $0x398] sm:$0xf] %v915_v6  ;;  %918 = vst [vmem:[%s6133_s20 + $0x39c] sm:$0xf] %v917_v7 }
  0xc5   : > { %920 = vst [vmem:[%s6133_s20 + $0x3a0] sm:$0xf] %v919_v8  ;;  %v921_v9 = vld [vmem:[%s6129_s19 + $0x748] sm:$0xf]  ;;  %v923_v10 = vld [vmem:[%s6129_s19 + $0x750] sm:$0xf] }
  0xc6   : > { %v925_v11 = vld [vmem:[%s6129_s19 + $0x758] sm:$0xf]  ;;  %922 = vst [vmem:[%s6133_s20 + $0x3a4] sm:$0xf] %v921_v9  ;;  %924 = vst [vmem:[%s6133_s20 + $0x3a8] sm:$0xf] %v923_v10 }
  0xc7   : > { %926 = vst [vmem:[%s6133_s20 + $0x3ac] sm:$0xf] %v925_v11  ;;  %v927_v12 = vld [vmem:[%s6129_s19 + $0x760] sm:$0xf]  ;;  %v929_v13 = vld [vmem:[%s6129_s19 + $0x768] sm:$0xf] }
  0xc8   : > { %v931_v14 = vld [vmem:[%s6129_s19 + $0x770] sm:$0xf]  ;;  %928 = vst [vmem:[%s6133_s20 + $0x3b0] sm:$0xf] %v927_v12  ;;  %930 = vst [vmem:[%s6133_s20 + $0x3b4] sm:$0xf] %v929_v13 }
  0xc9   : > { %932 = vst [vmem:[%s6133_s20 + $0x3b8] sm:$0xf] %v931_v14  ;;  %v933_v15 = vld [vmem:[%s6129_s19 + $0x778] sm:$0xf]  ;;  %v935_v16 = vld [vmem:[%s6129_s19 + $0x780] sm:$0xf] }
  0xca   : > { %v937_v17 = vld [vmem:[%s6129_s19 + $0x788] sm:$0xf]  ;;  %934 = vst [vmem:[%s6133_s20 + $0x3bc] sm:$0xf] %v933_v15  ;;  %936 = vst [vmem:[%s6133_s20 + $0x3c0] sm:$0xf] %v935_v16 }
  0xcb   : > { %938 = vst [vmem:[%s6133_s20 + $0x3c4] sm:$0xf] %v937_v17  ;;  %v939_v18 = vld [vmem:[%s6129_s19 + $0x790] sm:$0xf]  ;;  %v941_v19 = vld [vmem:[%s6129_s19 + $0x798] sm:$0xf] }
  0xcc   : > { %v943_v20 = vld [vmem:[%s6129_s19 + $0x7a0] sm:$0xf]  ;;  %940 = vst [vmem:[%s6133_s20 + $0x3c8] sm:$0xf] %v939_v18  ;;  %942 = vst [vmem:[%s6133_s20 + $0x3cc] sm:$0xf] %v941_v19 }
  0xcd   : > { %944 = vst [vmem:[%s6133_s20 + $0x3d0] sm:$0xf] %v943_v20  ;;  %v945_v21 = vld [vmem:[%s6129_s19 + $0x7a8] sm:$0xf]  ;;  %v947_v22 = vld [vmem:[%s6129_s19 + $0x7b0] sm:$0xf] }
  0xce   : > { %v949_v23 = vld [vmem:[%s6129_s19 + $0x7b8] sm:$0xf]  ;;  %946 = vst [vmem:[%s6133_s20 + $0x3d4] sm:$0xf] %v945_v21  ;;  %948 = vst [vmem:[%s6133_s20 + $0x3d8] sm:$0xf] %v947_v22 }
  0xcf   : > { %950 = vst [vmem:[%s6133_s20 + $0x3dc] sm:$0xf] %v949_v23  ;;  %v951_v24 = vld [vmem:[%s6129_s19 + $0x7c0] sm:$0xf]  ;;  %v953_v25 = vld [vmem:[%s6129_s19 + $0x7c8] sm:$0xf] }
  0xd0   : > { %v955_v26 = vld [vmem:[%s6129_s19 + $0x7d0] sm:$0xf]  ;;  %952 = vst [vmem:[%s6133_s20 + $0x3e0] sm:$0xf] %v951_v24  ;;  %954 = vst [vmem:[%s6133_s20 + $0x3e4] sm:$0xf] %v953_v25 }
  0xd1   : > { %956 = vst [vmem:[%s6133_s20 + $0x3e8] sm:$0xf] %v955_v26  ;;  %v957_v27 = vld [vmem:[%s6129_s19 + $0x7d8] sm:$0xf]  ;;  %v959_v28 = vld [vmem:[%s6129_s19 + $0x7e0] sm:$0xf] }
  0xd2   : > { %v961_v29 = vld [vmem:[%s6129_s19 + $0x7e8] sm:$0xf]  ;;  %958 = vst [vmem:[%s6133_s20 + $0x3ec] sm:$0xf] %v957_v27  ;;  %960 = vst [vmem:[%s6133_s20 + $0x3f0] sm:$0xf] %v959_v28 }
  0xd3   : > { %962 = vst [vmem:[%s6133_s20 + $0x3f4] sm:$0xf] %v961_v29  ;;  %v963_v30 = vld [vmem:[%s6129_s19 + $0x7f0] sm:$0xf]  ;;  %v965_v31 = vld [vmem:[%s6129_s19 + $0x7f8] sm:$0xf] }
  0xd4   : > { %964 = vst [vmem:[%s6133_s20 + $0x3f8] sm:$0xf] %v963_v30  ;;  %966 = vst [vmem:[%s6133_s20 + $0x3fc] sm:$0xf] %v965_v31 }
  0xd5 PF: > { %p4664_p6 = scmp.ge.s32.totalorder %s5966_s25, 1  ;;  %p1509_p7 = scmp.lt.s32.totalorder %s5966_s25, 3 }
  0xd7   : > { %p1510_p8 = pnand %p4664_p6, %p1509_p7 }
  0xd9   : > { %1513 = sbr.rel (%p1510_p8) target bundleno = 1076 (0x434), region = 118 }
  0xe0   : > { %s1516_s27 = sand.u32 1, %s5950_s21   ;;  %v5968_v32 = vmov 0.0   ;;  %vm2133_vm0 = vcmask 1041409   ;;  %vm2135_vm1 = vcmask 1042434   ;;  %vm2137_vm2 = vcmask 1043459   ;;  %s4667_s14 = sshll.u32 %s5958_s23, 4 }
  0xe1   : > { %s4665_s28 = sshll.u32 %s1516_s27, 7  ;;  %s4666_s29 = sshll.u32 %s1516_s27, 10  ;;  %1646 = vst [vmem:[#allocation2 + $0x8] sm:$0x1] %v5968_v32  ;;  %vm2139_vm3 = vcmask 1044484   ;;  %vm2141_vm4 = vcmask 1045509  }
  0xe2   : > { %s6648_s7 = scalar_lea.vmem [#allocation3], %s4665_s28  ;;  %s6651_s8 = scalar_lea.vmem [#allocation4], %s4666_s29  ;;  %vm2143_vm5 = vcmask 1046534   ;;  %vm2145_vm6 = vcmask 1047559   ;;  %vm4304_vm7 = vcmask 1040384   ;;  %vm5969_vm8 = vmmov 1  }
  0xe3   : > { %v4997_v33 = vld [vmem:[%s6648_s7] sm:$0xff]   ;;  %p7171_p9 = scmp.lt.s32.totalorder %s4667_s14, 31  ;;  %vm5825_vm9 = vmpackc.low %vm4304_vm7, %vm5969_vm8  ;;  %vm4255_vm10 = vcmask 72704  }
  0xe4   : > { %v5001_v34 = vld [vmem:[%s6651_s8] sm:$0xff]   ;;  %v6655_v36 = vunpack.c.l.bf16 %v4997_v33  ;;  %v6657_v37 = vunpack.c.h.bf16 %v4997_v33 }
  0xe5   : > { %v5572_v35 = vld [vmem:[%s6651_s8 + $0x80] sm:$0xff]   ;;  %v5002_v38 = vunpack.c.l.bf16 %v5001_v34  ;;  %v5003_v39 = vunpack.c.h.bf16 %v5001_v34  ;;  %s7520_s14 = smov (!%p7171_p9, %s4667_s14), 31 }
  0xe6   : > { %v5573_v40 = vld [vmem:[%s6651_s8 + $0x100] sm:$0xff]   ;;  %v5006_v43 = vunpack.c.l.bf16 %v5572_v35  ;;  %v5007_v44 = vunpack.c.h.bf16 %v5572_v35  ;;  %s7189_s19 = sshll.u32 %s7520_s14, 3 }
  0xe7   : > { %v5574_v41 = vld [vmem:[%s6651_s8 + $0x180] sm:$0xff]   ;;  %v5010_v45 = vunpack.c.l.bf16 %v5573_v40  ;;  %v5011_v46 = vunpack.c.h.bf16 %v5573_v40  ;;  %v2053_v60 = vmul.f32 %v5002_v38, %v6655_v36  ;;  %v2054_v61 = vmul.f32 %v5003_v39, %v6657_v37  ;;  %s7197_s28 = scalar_lea.vmem %s7489_s0, %s7189_s19  ;;  %s7394_s17 = scalar_lea.vmem %s7493_s4, %s7189_s19 }
  0xe8   : > { %v5575_v42 = vld [vmem:[%s6651_s8 + $0x200] sm:$0xff]   ;;  %v5014_v50 = vunpack.c.l.bf16 %v5574_v41  ;;  %v5015_v51 = vunpack.c.h.bf16 %v5574_v41  ;;  %v2055_v62 = vmul.f32 %v5006_v43, %v6655_v36  ;;  %v2056_v63 = vmul.f32 %v5007_v44, %v6657_v37  ;;  %s7449_s20 = scalar_lea.vmem %s7495_s6, %s7189_s19 }
  0xe9   : > { %v5576_v47 = vld [vmem:[%s6651_s8 + $0x280] sm:$0xff]   ;;  %v5018_v52 = vunpack.c.l.bf16 %v5575_v42  ;;  %v5019_v53 = vunpack.c.h.bf16 %v5575_v42  ;;  %v2057_v0 = vmul.f32 %v5010_v45, %v6655_v36  ;;  %v2058_v1 = vmul.f32 %v5011_v46, %v6657_v37 }
  0xea   : > { %v5577_v48 = vld [vmem:[%s6651_s8 + $0x300] sm:$0xff]   ;;  %v5022_v54 = vunpack.c.l.bf16 %v5576_v47  ;;  %v5023_v55 = vunpack.c.h.bf16 %v5576_v47  ;;  %v2059_v2 = vmul.f32 %v5014_v50, %v6655_v36  ;;  %v2060_v3 = vmul.f32 %v5015_v51, %v6657_v37 }
  0xeb   : > { %v5578_v49 = vld [vmem:[%s6651_s8 + $0x380] sm:$0xff]   ;;  %v5026_v56 = vunpack.c.l.bf16 %v5577_v48  ;;  %v5027_v57 = vunpack.c.h.bf16 %v5577_v48  ;;  %v2061_v4 = vmul.f32 %v5018_v52, %v6655_v36  ;;  %v2062_v5 = vmul.f32 %v5019_v53, %v6657_v37 }
  0xec   : > { %v5030_v58 = vunpack.c.l.bf16 %v5578_v49  ;;  %v5031_v59 = vunpack.c.h.bf16 %v5578_v49  ;;  %v2063_v6 = vmul.f32 %v5022_v54, %v6655_v36  ;;  %v2064_v7 = vmul.f32 %v5023_v55, %v6657_v37 }
  0xed   : > { %v2065_v8 = vmul.f32 %v5026_v56, %v6655_v36  ;;  %v2066_v9 = vmul.f32 %v5027_v57, %v6657_v37  ;;  %v2069_v12 = vadd.f32 %v2054_v61, %v2053_v60  ;;  %v2076_v13 = vadd.f32 %v2056_v63, %v2055_v62  ;;  %v5579_v56 = vld [vmem:[%s6648_s7 + $0x8] sm:$0xff]  }
  0xee   : > { %v2067_v10 = vmul.f32 %v5030_v58, %v6655_v36  ;;  %v2068_v11 = vmul.f32 %v5031_v59, %v6657_v37  ;;  %v2083_v14 = vadd.f32 %v2058_v1, %v2057_v0  ;;  %v2090_v15 = vadd.f32 %v2060_v3, %v2059_v2  ;;  %v5580_v61 = vld [vmem:[%s6651_s8 + $0x8] sm:$0xff]  }
  0xef   : > { %v2097_v16 = vadd.f32 %v2062_v5, %v2061_v4  ;;  %v2104_v17 = vadd.f32 %v2064_v7, %v2063_v6  ;;  %v2070_v18 = vrot.slane %v2069_v12, 4  ;;  %v2077_v19 = vrot.slane %v2076_v13, 4  ;;  %v5581_v62 = vld [vmem:[%s6651_s8 + $0x88] sm:$0xff]  }
  0xf0   : > { %v2111_v20 = vadd.f32 %v2066_v9, %v2065_v8  ;;  %v2118_v21 = vadd.f32 %v2068_v11, %v2067_v10  ;;  %v2084_v22 = vrot.slane %v2083_v14, 4  ;;  %v2091_v23 = vrot.slane %v2090_v15, 4  ;;  %v5582_v3 = vld [vmem:[%s6651_s8 + $0x108] sm:$0xff]  }
  0xf1   : > { %v2098_v24 = vrot.slane %v2097_v16, 4  ;;  %v2105_v25 = vrot.slane %v2104_v17, 4  ;;  %v2071_v26 = vadd.f32 %v2070_v18, %v2069_v12  ;;  %v2078_v27 = vadd.f32 %v2077_v19, %v2076_v13  ;;  %v5583_v4 = vld [vmem:[%s6651_s8 + $0x188] sm:$0xff]  }
  0xf2   : > { %v2112_v28 = vrot.slane %v2111_v20, 4  ;;  %v2119_v29 = vrot.slane %v2118_v21, 4  ;;  %v2085_v30 = vadd.f32 %v2084_v22, %v2083_v14  ;;  %v2092_v31 = vadd.f32 %v2091_v23, %v2090_v15  ;;  %v5584_v9 = vld [vmem:[%s6651_s8 + $0x208] sm:$0xff]  }
  0xf3   : > { %v2099_v32 = vadd.f32 %v2098_v24, %v2097_v16  ;;  %v2106_v33 = vadd.f32 %v2105_v25, %v2104_v17  ;;  %v2072_v34 = vrot.slane %v2071_v26, 2  ;;  %v2079_v35 = vrot.slane %v2078_v27, 2  ;;  %v5585_v14 = vld [vmem:[%s6651_s8 + $0x288] sm:$0xff]  }
  0xf4   : > { %v2113_v38 = vadd.f32 %v2112_v28, %v2111_v20  ;;  %v2120_v39 = vadd.f32 %v2119_v29, %v2118_v21  ;;  %v2086_v40 = vrot.slane %v2085_v30, 2  ;;  %v2093_v41 = vrot.slane %v2092_v31, 2  ;;  %v5586_v19 = vld [vmem:[%s6651_s8 + $0x308] sm:$0xff]  }
  0xf5   : > { %v2100_v42 = vrot.slane %v2099_v32, 2  ;;  %v2107_v43 = vrot.slane %v2106_v33, 2  ;;  %v2073_v44 = vadd.f32 %v2072_v34, %v2071_v26  ;;  %v2080_v45 = vadd.f32 %v2079_v35, %v2078_v27  ;;  %v5587_v24 = vld [vmem:[%s6651_s8 + $0x388] sm:$0xff]  }
  0xf6   : > { %v2114_v46 = vrot.slane %v2113_v38, 2  ;;  %v2121_v47 = vrot.slane %v2120_v39, 2  ;;  %v2087_v48 = vadd.f32 %v2086_v40, %v2085_v30  ;;  %v2094_v49 = vadd.f32 %v2093_v41, %v2092_v31 }
  0xf7   : > { %v2101_v50 = vadd.f32 %v2100_v42, %v2099_v32  ;;  %v2108_v51 = vadd.f32 %v2107_v43, %v2106_v33  ;;  %v2074_v52 = vrot.slane %v2073_v44, 1  ;;  %v2081_v53 = vrot.slane %v2080_v45, 1 }
  0xf8   : > { %v2115_v54 = vadd.f32 %v2114_v46, %v2113_v38  ;;  %v2122_v55 = vadd.f32 %v2121_v47, %v2120_v39  ;;  %v2088_v57 = vrot.slane %v2087_v48, 1  ;;  %v2095_v58 = vrot.slane %v2094_v49, 1 }
  0xf9   : > { %v2102_v59 = vrot.slane %v2101_v50, 1  ;;  %v2109_v60 = vrot.slane %v2108_v51, 1  ;;  %v2075_v63 = vadd.f32 %v2074_v52, %v2073_v44  ;;  %v2082_v0 = vadd.f32 %v2081_v53, %v2080_v45 }
  0xfa   : > { %v2116_v1 = vrot.slane %v2115_v54, 1  ;;  %v2123_v2 = vrot.slane %v2122_v55, 1  ;;  %v2089_v5 = vadd.f32 %v2088_v57, %v2087_v48  ;;  %v2096_v6 = vadd.f32 %v2095_v58, %v2094_v49 }
  0xfb   : > { %v2103_v7 = vadd.f32 %v2102_v59, %v2101_v50  ;;  %v2110_v8 = vadd.f32 %v2109_v60, %v2108_v51  ;;  %v2134_v12 = vsel %vm2133_vm0, %v2082_v0, %v2075_v63  ;;  %v6688_v13 = vunpack.c.l.bf16 %v5579_v56 }
  0xfc   : > { %v2117_v10 = vadd.f32 %v2116_v1, %v2115_v54  ;;  %v2124_v11 = vadd.f32 %v2123_v2, %v2122_v55  ;;  %v2136_v15 = vsel %vm2135_vm1, %v2089_v5, %v2134_v12  ;;  %v6692_v16 = vunpack.c.h.bf16 %v5579_v56 }
  0xfd   : > { %v5038_v17 = vunpack.c.l.bf16 %v5580_v61  ;;  %v5039_v18 = vunpack.c.h.bf16 %v5580_v61  ;;  %v2138_v20 = vsel %vm2137_vm2, %v2096_v6, %v2136_v15  ;;  %v5042_v21 = vunpack.c.l.bf16 %v5581_v62 }
  0xfe   : > { %v5043_v22 = vunpack.c.h.bf16 %v5581_v62  ;;  %v5046_v23 = vunpack.c.l.bf16 %v5582_v3  ;;  %v2140_v25 = vsel %vm2139_vm3, %v2103_v7, %v2138_v20  ;;  %v5047_v26 = vunpack.c.h.bf16 %v5582_v3 }
  0xff   : > { %v5050_v27 = vunpack.c.l.bf16 %v5583_v4  ;;  %v5051_v28 = vunpack.c.h.bf16 %v5583_v4  ;;  %v2142_v29 = vsel %vm2141_vm4, %v2110_v8, %v2140_v25  ;;  %v5054_v30 = vunpack.c.l.bf16 %v5584_v9 }
 0x100   : > { %v5055_v31 = vunpack.c.h.bf16 %v5584_v9  ;;  %v5058_v32 = vunpack.c.l.bf16 %v5585_v14  ;;  %v2144_v33 = vsel %vm2143_vm5, %v2117_v10, %v2142_v29  ;;  %v5059_v34 = vunpack.c.h.bf16 %v5585_v14 }
 0x101   : > { %v5062_v35 = vunpack.c.l.bf16 %v5586_v19  ;;  %v5063_v38 = vunpack.c.h.bf16 %v5586_v19  ;;  %v6701_v39 = vsel %vm2145_vm6, %v2124_v11, %v2144_v33  ;;  %v5066_v40 = vunpack.c.l.bf16 %v5587_v24 }
 0x102   : > { %v5067_v41 = vunpack.c.h.bf16 %v5587_v24  ;;  %v2197_v42 = vmul.f32 %v5038_v17, %v6688_v13  ;;  %v2198_v43 = vmul.f32 %v5039_v18, %v6692_v16  ;;  %v2199_v44 = vmul.f32 %v5042_v21, %v6688_v13 }
 0x103   : > { %v2200_v45 = vmul.f32 %v5043_v22, %v6692_v16  ;;  %v2201_v46 = vmul.f32 %v5046_v23, %v6688_v13  ;;  %v2202_v47 = vmul.f32 %v5047_v26, %v6692_v16  ;;  %v2203_v48 = vmul.f32 %v5050_v27, %v6688_v13 }
 0x104   : > { %v2204_v49 = vmul.f32 %v5051_v28, %v6692_v16  ;;  %v2205_v50 = vmul.f32 %v5054_v30, %v6688_v13  ;;  %v2206_v51 = vmul.f32 %v5055_v31, %v6692_v16  ;;  %v2207_v52 = vmul.f32 %v5058_v32, %v6688_v13 }
 0x105   : > { %v2208_v53 = vmul.f32 %v5059_v34, %v6692_v16  ;;  %v2209_v54 = vmul.f32 %v5062_v35, %v6688_v13  ;;  %v2210_v55 = vmul.f32 %v5063_v38, %v6692_v16  ;;  %v2211_v56 = vmul.f32 %v5066_v40, %v6688_v13 }
 0x106   : > { %v2212_v57 = vmul.f32 %v5067_v41, %v6692_v16  ;;  %v2213_v58 = vadd.f32 %v2198_v43, %v2197_v42  ;;  %v2220_v59 = vadd.f32 %v2200_v45, %v2199_v44  ;;  %v2227_v60 = vadd.f32 %v2202_v47, %v2201_v46  ;;  %v5588_v47 = vld [vmem:[%s6648_s7 + $0x10] sm:$0xff]  }
 0x107   : > { %v2234_v61 = vadd.f32 %v2204_v49, %v2203_v48  ;;  %v2241_v62 = vadd.f32 %v2206_v51, %v2205_v50  ;;  %v2248_v63 = vadd.f32 %v2208_v53, %v2207_v52  ;;  %v2255_v0 = vadd.f32 %v2210_v55, %v2209_v54  ;;  %v5589_v48 = vld [vmem:[%s6651_s8 + $0x10] sm:$0xff]  }
 0x108   : > { %v2262_v1 = vadd.f32 %v2212_v57, %v2211_v56  ;;  %v2214_v2 = vrot.slane %v2213_v58, 4  ;;  %v2221_v3 = vrot.slane %v2220_v59, 4  ;;  %v2228_v4 = vrot.slane %v2227_v60, 4  ;;  %v5590_v53 = vld [vmem:[%s6651_s8 + $0x90] sm:$0xff]  }
 0x109   : > { %v2235_v5 = vrot.slane %v2234_v61, 4  ;;  %v2242_v6 = vrot.slane %v2241_v62, 4  ;;  %v2249_v7 = vrot.slane %v2248_v63, 4  ;;  %v2256_v8 = vrot.slane %v2255_v0, 4 }
 0x10a   : > { %v2263_v9 = vrot.slane %v2262_v1, 4  ;;  %v2215_v10 = vadd.f32 %v2214_v2, %v2213_v58  ;;  %v2222_v11 = vadd.f32 %v2221_v3, %v2220_v59  ;;  %v2229_v12 = vadd.f32 %v2228_v4, %v2227_v60  ;;  %v5591_v58 = vld [vmem:[%s6651_s8 + $0x110] sm:$0xff]  }
 0x10b   : > { %v2236_v14 = vadd.f32 %v2235_v5, %v2234_v61  ;;  %v2243_v15 = vadd.f32 %v2242_v6, %v2241_v62  ;;  %v2250_v17 = vadd.f32 %v2249_v7, %v2248_v63  ;;  %v2257_v18 = vadd.f32 %v2256_v8, %v2255_v0  ;;  %v5592_v59 = vld [vmem:[%s6651_s8 + $0x190] sm:$0xff]  }
 0x10c   : > { %v2264_v19 = vadd.f32 %v2263_v9, %v2262_v1  ;;  %v2216_v20 = vrot.slane %v2215_v10, 2  ;;  %v2223_v21 = vrot.slane %v2222_v11, 2  ;;  %v2230_v22 = vrot.slane %v2229_v12, 2  ;;  %v5593_v0 = vld [vmem:[%s6651_s8 + $0x210] sm:$0xff]  }
 0x10d   : > { %v2237_v23 = vrot.slane %v2236_v14, 2  ;;  %v2244_v24 = vrot.slane %v2243_v15, 2  ;;  %v2251_v25 = vrot.slane %v2250_v17, 2  ;;  %v2258_v26 = vrot.slane %v2257_v18, 2  ;;  %v5594_v5 = vld [vmem:[%s6651_s8 + $0x290] sm:$0xff]  }
 0x10e   : > { %v2265_v27 = vrot.slane %v2264_v19, 2  ;;  %v2217_v28 = vadd.f32 %v2216_v20, %v2215_v10  ;;  %v2224_v29 = vadd.f32 %v2223_v21, %v2222_v11  ;;  %v2231_v30 = vadd.f32 %v2230_v22, %v2229_v12  ;;  %v5595_v6 = vld [vmem:[%s6651_s8 + $0x310] sm:$0xff]  }
 0x10f   : > { %v2238_v31 = vadd.f32 %v2237_v23, %v2236_v14  ;;  %v2245_v32 = vadd.f32 %v2244_v24, %v2243_v15  ;;  %v2252_v33 = vadd.f32 %v2251_v25, %v2250_v17  ;;  %v2259_v34 = vadd.f32 %v2258_v26, %v2257_v18  ;;  %v5596_v11 = vld [vmem:[%s6651_s8 + $0x390] sm:$0xff]  }
 0x110   : > { %v2266_v35 = vadd.f32 %v2265_v27, %v2264_v19  ;;  %v2218_v38 = vrot.slane %v2217_v28, 1  ;;  %v2225_v40 = vrot.slane %v2224_v29, 1  ;;  %v2232_v41 = vrot.slane %v2231_v30, 1 }
 0x111   : > { %v2239_v42 = vrot.slane %v2238_v31, 1  ;;  %v2246_v43 = vrot.slane %v2245_v32, 1  ;;  %v2253_v44 = vrot.slane %v2252_v33, 1  ;;  %v2260_v45 = vrot.slane %v2259_v34, 1 }
 0x112   : > { %v2267_v46 = vrot.slane %v2266_v35, 1  ;;  %v2219_v49 = vadd.f32 %v2218_v38, %v2217_v28  ;;  %v2226_v50 = vadd.f32 %v2225_v40, %v2224_v29  ;;  %v2233_v51 = vadd.f32 %v2232_v41, %v2231_v30 }
 0x113   : > { %v2240_v52 = vadd.f32 %v2239_v42, %v2238_v31  ;;  %v2247_v54 = vadd.f32 %v2246_v43, %v2245_v32  ;;  %v2254_v55 = vadd.f32 %v2253_v44, %v2252_v33  ;;  %v2261_v56 = vadd.f32 %v2260_v45, %v2259_v34 }
 0x114   : > { %v2268_v57 = vadd.f32 %v2267_v46, %v2266_v35  ;;  %v2277_v60 = vsel %vm2133_vm0, %v2226_v50, %v2219_v49  ;;  %v6725_v61 = vunpack.c.l.bf16 %v5588_v47  ;;  %v6727_v62 = vunpack.c.h.bf16 %v5588_v47 }
 0x115   : > { %v5074_v63 = vunpack.c.l.bf16 %v5589_v48  ;;  %v2278_v1 = vsel %vm2135_vm1, %v2233_v51, %v2277_v60  ;;  %v5075_v2 = vunpack.c.h.bf16 %v5589_v48  ;;  %v5078_v3 = vunpack.c.l.bf16 %v5590_v53 }
 0x116   : > { %v5079_v4 = vunpack.c.h.bf16 %v5590_v53  ;;  %v2279_v7 = vsel %vm2137_vm2, %v2240_v52, %v2278_v1  ;;  %v5082_v8 = vunpack.c.l.bf16 %v5591_v58  ;;  %v5083_v9 = vunpack.c.h.bf16 %v5591_v58 }
 0x117   : > { %v5086_v10 = vunpack.c.l.bf16 %v5592_v59  ;;  %v2280_v12 = vsel %vm2139_vm3, %v2247_v54, %v2279_v7  ;;  %v5087_v14 = vunpack.c.h.bf16 %v5592_v59  ;;  %v5090_v15 = vunpack.c.l.bf16 %v5593_v0 }
 0x118   : > { %v5091_v17 = vunpack.c.h.bf16 %v5593_v0  ;;  %v2281_v18 = vsel %vm2141_vm4, %v2254_v55, %v2280_v12  ;;  %v5094_v19 = vunpack.c.l.bf16 %v5594_v5  ;;  %v5095_v20 = vunpack.c.h.bf16 %v5594_v5 }
 0x119   : > { %v5098_v21 = vunpack.c.l.bf16 %v5595_v6  ;;  %v2282_v22 = vsel %vm2143_vm5, %v2261_v56, %v2281_v18  ;;  %v5099_v23 = vunpack.c.h.bf16 %v5595_v6  ;;  %v5102_v24 = vunpack.c.l.bf16 %v5596_v11 }
 0x11a   : > { %v5103_v25 = vunpack.c.h.bf16 %v5596_v11  ;;  %v2283_v26 = vsel %vm2145_vm6, %v2268_v57, %v2282_v22  ;;  %v2334_v27 = vmul.f32 %v5074_v63, %v6725_v61  ;;  %v2335_v28 = vmul.f32 %v5075_v2, %v6727_v62 }
 0x11b   : > { %v2336_v29 = vmul.f32 %v5078_v3, %v6725_v61  ;;  %v6743_v30 = vadd.f32 %v2283_v26, %v6701_v39  ;;  %v2337_v31 = vmul.f32 %v5079_v4, %v6727_v62  ;;  %v2338_v32 = vmul.f32 %v5082_v8, %v6725_v61 }
 0x11c   : > { %v2339_v33 = vmul.f32 %v5083_v9, %v6727_v62  ;;  %v2340_v34 = vmul.f32 %v5086_v10, %v6725_v61  ;;  %v2341_v35 = vmul.f32 %v5087_v14, %v6727_v62  ;;  %v2342_v38 = vmul.f32 %v5090_v15, %v6725_v61 }
 0x11d   : > { %v2343_v40 = vmul.f32 %v5091_v17, %v6727_v62  ;;  %v2344_v41 = vmul.f32 %v5094_v19, %v6725_v61  ;;  %v2345_v42 = vmul.f32 %v5095_v20, %v6727_v62  ;;  %v2346_v39 = vmul.f32 %v5098_v21, %v6725_v61 }
 0x11e   : > { %v2347_v43 = vmul.f32 %v5099_v23, %v6727_v62  ;;  %v2348_v44 = vmul.f32 %v5102_v24, %v6725_v61  ;;  %v2349_v45 = vmul.f32 %v5103_v25, %v6727_v62  ;;  %v2350_v46 = vadd.f32 %v2335_v28, %v2334_v27 }
 0x11f   : > { %v2357_v47 = vadd.f32 %v2337_v31, %v2336_v29  ;;  %v2364_v48 = vadd.f32 %v2339_v33, %v2338_v32  ;;  %v2371_v49 = vadd.f32 %v2341_v35, %v2340_v34  ;;  %v2378_v50 = vadd.f32 %v2343_v40, %v2342_v38  ;;  %v5597_v33 = vld [vmem:[%s6648_s7 + $0x18] sm:$0xff]  }
 0x120   : > { %v2385_v51 = vadd.f32 %v2345_v42, %v2344_v41  ;;  %v2351_v52 = vrot.slane %v2350_v46, 4  ;;  %v2392_v54 = vadd.f32 %v2347_v43, %v2346_v39  ;;  %v2399_v55 = vadd.f32 %v2349_v45, %v2348_v44  ;;  %v5598_v41 = vld [vmem:[%s6651_s8 + $0x18] sm:$0xff]  }
 0x121   : > { %v2358_v53 = vrot.slane %v2357_v47, 4  ;;  %v2365_v56 = vrot.slane %v2364_v48, 4  ;;  %v2372_v57 = vrot.slane %v2371_v49, 4  ;;  %v2379_v58 = vrot.slane %v2378_v50, 4  ;;  %v5599_v45 = vld [vmem:[%s6651_s8 + $0x98] sm:$0xff]  }
 0x122   : > { %v2386_v59 = vrot.slane %v2385_v51, 4  ;;  %v2352_v60 = vadd.f32 %v2351_v52, %v2350_v46  ;;  %v2393_v0 = vrot.slane %v2392_v54, 4  ;;  %v2400_v1 = vrot.slane %v2399_v55, 4  ;;  %v5600_v46 = vld [vmem:[%s6651_s8 + $0x118] sm:$0xff]  }
 0x123   : > { %v2359_v63 = vadd.f32 %v2358_v53, %v2357_v47  ;;  %v2366_v2 = vadd.f32 %v2365_v56, %v2364_v48  ;;  %v2373_v3 = vadd.f32 %v2372_v57, %v2371_v49  ;;  %v2380_v4 = vadd.f32 %v2379_v58, %v2378_v50  ;;  %v5602_v56 = vld [vmem:[%s6651_s8 + $0x218] sm:$0xff]  }
 0x124   : > { %v2387_v5 = vadd.f32 %v2386_v59, %v2385_v51  ;;  %v2353_v6 = vrot.slane %v2352_v60, 2  ;;  %v2394_v8 = vadd.f32 %v2393_v0, %v2392_v54  ;;  %v2401_v9 = vadd.f32 %v2400_v1, %v2399_v55  ;;  %v5601_v51 = vld [vmem:[%s6651_s8 + $0x198] sm:$0xff]  }
 0x125   : > { %v2360_v7 = vrot.slane %v2359_v63, 2  ;;  %v2367_v10 = vrot.slane %v2366_v2, 2  ;;  %v2374_v11 = vrot.slane %v2373_v3, 2  ;;  %v2381_v12 = vrot.slane %v2380_v4, 2  ;;  %v5603_v57 = vld [vmem:[%s6651_s8 + $0x298] sm:$0xff]  }
 0x126   : > { %v2388_v14 = vrot.slane %v2387_v5, 2  ;;  %v2354_v15 = vadd.f32 %v2353_v6, %v2352_v60  ;;  %v2395_v18 = vrot.slane %v2394_v8, 2  ;;  %v2402_v19 = vrot.slane %v2401_v9, 2  ;;  %v5604_v0 = vld [vmem:[%s6651_s8 + $0x318] sm:$0xff]  }
 0x127   : > { %v2361_v17 = vadd.f32 %v2360_v7, %v2359_v63  ;;  %v2368_v20 = vadd.f32 %v2367_v10, %v2366_v2  ;;  %v2375_v21 = vadd.f32 %v2374_v11, %v2373_v3  ;;  %v2382_v22 = vadd.f32 %v2381_v12, %v2380_v4 }
 0x128   : > { %v2389_v23 = vadd.f32 %v2388_v14, %v2387_v5  ;;  %v2355_v24 = vrot.slane %v2354_v15, 1  ;;  %v2396_v26 = vadd.f32 %v2395_v18, %v2394_v8  ;;  %v2403_v27 = vadd.f32 %v2402_v19, %v2401_v9  ;;  %v5605_v5 = vld [vmem:[%s6651_s8 + $0x398] sm:$0xff]  }
 0x129   : > { %v2362_v25 = vrot.slane %v2361_v17, 1  ;;  %v2369_v28 = vrot.slane %v2368_v20, 1  ;;  %v2376_v29 = vrot.slane %v2375_v21, 1  ;;  %v2383_v31 = vrot.slane %v2382_v22, 1 }
 0x12a   : > { %v2390_v32 = vrot.slane %v2389_v23, 1  ;;  %v2356_v34 = vadd.f32 %v2355_v24, %v2354_v15  ;;  %v2397_v38 = vrot.slane %v2396_v26, 1  ;;  %v2404_v40 = vrot.slane %v2403_v27, 1 }
 0x12b   : > { %v2363_v35 = vadd.f32 %v2362_v25, %v2361_v17  ;;  %v2370_v42 = vadd.f32 %v2369_v28, %v2368_v20  ;;  %v2377_v39 = vadd.f32 %v2376_v29, %v2375_v21  ;;  %v2384_v43 = vadd.f32 %v2383_v31, %v2382_v22 }
 0x12c   : > { %v2391_v44 = vadd.f32 %v2390_v32, %v2389_v23  ;;  %v2398_v47 = vadd.f32 %v2397_v38, %v2396_v26  ;;  %v2405_v48 = vadd.f32 %v2404_v40, %v2403_v27  ;;  %v6763_v50 = vunpack.c.l.bf16 %v5597_v33 }
 0x12d   : > { %v2414_v49 = vsel %vm2133_vm0, %v2363_v35, %v2356_v34  ;;  %v6767_v53 = vunpack.c.h.bf16 %v5597_v33  ;;  %v5110_v54 = vunpack.c.l.bf16 %v5598_v41  ;;  %v5111_v55 = vunpack.c.h.bf16 %v5598_v41 }
 0x12e   : > { %v2415_v52 = vsel %vm2135_vm1, %v2370_v42, %v2414_v49  ;;  %v5114_v59 = vunpack.c.l.bf16 %v5599_v45  ;;  %v5115_v60 = vunpack.c.h.bf16 %v5599_v45  ;;  %v5118_v63 = vunpack.c.l.bf16 %v5600_v46 }
 0x12f   : > { %v2416_v58 = vsel %vm2137_vm2, %v2377_v39, %v2415_v52  ;;  %v5119_v2 = vunpack.c.h.bf16 %v5600_v46  ;;  %v5122_v3 = vunpack.c.l.bf16 %v5601_v51  ;;  %v5123_v4 = vunpack.c.h.bf16 %v5601_v51 }
 0x130   : > { %v2417_v1 = vsel %vm2139_vm3, %v2384_v43, %v2416_v58  ;;  %v5126_v7 = vunpack.c.l.bf16 %v5602_v56  ;;  %v5127_v8 = vunpack.c.h.bf16 %v5602_v56  ;;  %v5130_v9 = vunpack.c.l.bf16 %v5603_v57 }
 0x131   : > { %v2418_v6 = vsel %vm2141_vm4, %v2391_v44, %v2417_v1  ;;  %v5131_v11 = vunpack.c.h.bf16 %v5603_v57  ;;  %v5134_v12 = vunpack.c.l.bf16 %v5604_v0  ;;  %v5135_v14 = vunpack.c.h.bf16 %v5604_v0 }
 0x132   : > { %v2419_v10 = vsel %vm2143_vm5, %v2398_v47, %v2418_v6  ;;  %v5138_v17 = vunpack.c.l.bf16 %v5605_v5  ;;  %v5139_v18 = vunpack.c.h.bf16 %v5605_v5  ;;  %v2471_v19 = vmul.f32 %v5110_v54, %v6763_v50 }
 0x133   : > { %v2420_v15 = vsel %vm2145_vm6, %v2405_v48, %v2419_v10  ;;  %v2472_v21 = vmul.f32 %v5111_v55, %v6767_v53  ;;  %v2473_v22 = vmul.f32 %v5114_v59, %v6763_v50  ;;  %v2474_v23 = vmul.f32 %v5115_v60, %v6767_v53 }
 0x134   : > { %v6780_v20 = vadd.f32 %v2420_v15, %v6743_v30  ;;  %v2475_v24 = vmul.f32 %v5118_v63, %v6763_v50  ;;  %v2476_v25 = vmul.f32 %v5119_v2, %v6767_v53  ;;  %v2477_v26 = vmul.f32 %v5122_v3, %v6763_v50 }
 0x135   : > { %v2478_v27 = vmul.f32 %v5123_v4, %v6767_v53  ;;  %v2479_v28 = vmul.f32 %v5126_v7, %v6763_v50  ;;  %v2480_v29 = vmul.f32 %v5127_v8, %v6767_v53  ;;  %v2481_v30 = vmul.f32 %v5130_v9, %v6763_v50 }
 0x136   : > { %v2482_v31 = vmul.f32 %v5131_v11, %v6767_v53  ;;  %v2483_v32 = vmul.f32 %v5134_v12, %v6763_v50  ;;  %v2484_v33 = vmul.f32 %v5135_v14, %v6767_v53  ;;  %v2485_v34 = vmul.f32 %v5138_v17, %v6763_v50 }
 0x137   : > { %v2486_v35 = vmul.f32 %v5139_v18, %v6767_v53  ;;  %v2487_v38 = vadd.f32 %v2472_v21, %v2471_v19  ;;  %v2494_v40 = vadd.f32 %v2474_v23, %v2473_v22  ;;  %v2501_v41 = vadd.f32 %v2476_v25, %v2475_v24 }
 0x138   : > { %v2508_v42 = vadd.f32 %v2478_v27, %v2477_v26  ;;  %v2515_v39 = vadd.f32 %v2480_v29, %v2479_v28  ;;  %v2522_v43 = vadd.f32 %v2482_v31, %v2481_v30  ;;  %v2529_v44 = vadd.f32 %v2484_v33, %v2483_v32  ;;  %v5606_v29 = vld [vmem:[%s6648_s7 + $0x20] sm:$0xff]  }
 0x139   : > { %v2536_v45 = vadd.f32 %v2486_v35, %v2485_v34  ;;  %v2488_v46 = vrot.slane %v2487_v38, 4  ;;  %v2495_v47 = vrot.slane %v2494_v40, 4  ;;  %v2502_v48 = vrot.slane %v2501_v41, 4  ;;  %v5607_v30 = vld [vmem:[%s6651_s8 + $0x20] sm:$0xff]  }
 0x13a   : > { %v2509_v49 = vrot.slane %v2508_v42, 4  ;;  %v2516_v51 = vrot.slane %v2515_v39, 4  ;;  %v2523_v52 = vrot.slane %v2522_v43, 4  ;;  %v2530_v54 = vrot.slane %v2529_v44, 4  ;;  %v5608_v35 = vld [vmem:[%s6651_s8 + $0xa0] sm:$0xff]  }
 0x13b   : > { %v2537_v55 = vrot.slane %v2536_v45, 4  ;;  %v2489_v56 = vadd.f32 %v2488_v46, %v2487_v38  ;;  %v2496_v57 = vadd.f32 %v2495_v47, %v2494_v40  ;;  %v2503_v58 = vadd.f32 %v2502_v48, %v2501_v41  ;;  %v5611_v48 = vld [vmem:[%s6651_s8 + $0x220] sm:$0xff]  }
 0x13c   : > { %v2510_v59 = vadd.f32 %v2509_v49, %v2508_v42  ;;  %v2517_v60 = vadd.f32 %v2516_v51, %v2515_v39  ;;  %v2524_v63 = vadd.f32 %v2523_v52, %v2522_v43  ;;  %v2531_v0 = vadd.f32 %v2530_v54, %v2529_v44  ;;  %v5609_v39 = vld [vmem:[%s6651_s8 + $0x120] sm:$0xff]  }
 0x13d   : > { %v2538_v1 = vadd.f32 %v2537_v55, %v2536_v45  ;;  %v2490_v2 = vrot.slane %v2489_v56, 2  ;;  %v2497_v3 = vrot.slane %v2496_v57, 2  ;;  %v2504_v4 = vrot.slane %v2503_v58, 2  ;;  %v5610_v43 = vld [vmem:[%s6651_s8 + $0x1a0] sm:$0xff]  }
 0x13e   : > { %v2511_v5 = vrot.slane %v2510_v59, 2  ;;  %v2518_v6 = vrot.slane %v2517_v60, 2  ;;  %v2525_v7 = vrot.slane %v2524_v63, 2  ;;  %v2532_v8 = vrot.slane %v2531_v0, 2  ;;  %v5612_v55 = vld [vmem:[%s6651_s8 + $0x2a0] sm:$0xff]  }
 0x13f   : > { %v2539_v9 = vrot.slane %v2538_v1, 2  ;;  %v2491_v10 = vadd.f32 %v2490_v2, %v2489_v56  ;;  %v2498_v11 = vadd.f32 %v2497_v3, %v2496_v57  ;;  %v2505_v12 = vadd.f32 %v2504_v4, %v2503_v58  ;;  %v5613_v56 = vld [vmem:[%s6651_s8 + $0x320] sm:$0xff]  }
 0x140   : > { %v2512_v14 = vadd.f32 %v2511_v5, %v2510_v59  ;;  %v2519_v15 = vadd.f32 %v2518_v6, %v2517_v60  ;;  %v2526_v17 = vadd.f32 %v2525_v7, %v2524_v63  ;;  %v2533_v18 = vadd.f32 %v2532_v8, %v2531_v0  ;;  %v5614_v63 = vld [vmem:[%s6651_s8 + $0x3a0] sm:$0xff]  }
 0x141   : > { %v2540_v19 = vadd.f32 %v2539_v9, %v2538_v1  ;;  %v2492_v21 = vrot.slane %v2491_v10, 1  ;;  %v2499_v22 = vrot.slane %v2498_v11, 1  ;;  %v2506_v23 = vrot.slane %v2505_v12, 1 }
 0x142   : > { %v2513_v24 = vrot.slane %v2512_v14, 1  ;;  %v2520_v25 = vrot.slane %v2519_v15, 1  ;;  %v2527_v26 = vrot.slane %v2526_v17, 1  ;;  %v2534_v27 = vrot.slane %v2533_v18, 1 }
 0x143   : > { %v2541_v28 = vrot.slane %v2540_v19, 1  ;;  %v2493_v31 = vadd.f32 %v2492_v21, %v2491_v10  ;;  %v2500_v32 = vadd.f32 %v2499_v22, %v2498_v11  ;;  %v2507_v33 = vadd.f32 %v2506_v23, %v2505_v12 }
 0x144   : > { %v2514_v34 = vadd.f32 %v2513_v24, %v2512_v14  ;;  %v2521_v38 = vadd.f32 %v2520_v25, %v2519_v15  ;;  %v2528_v40 = vadd.f32 %v2527_v26, %v2526_v17  ;;  %v2535_v41 = vadd.f32 %v2534_v27, %v2533_v18 }
 0x145   : > { %v2542_v42 = vadd.f32 %v2541_v28, %v2540_v19  ;;  %v2551_v44 = vsel %vm2133_vm0, %v2500_v32, %v2493_v31  ;;  %v6803_v45 = vunpack.c.l.bf16 %v5606_v29  ;;  %v6805_v46 = vunpack.c.h.bf16 %v5606_v29 }
 0x146   : > { %v5146_v47 = vunpack.c.l.bf16 %v5607_v30  ;;  %v2552_v49 = vsel %vm2135_vm1, %v2507_v33, %v2551_v44  ;;  %v5147_v51 = vunpack.c.h.bf16 %v5607_v30  ;;  %v5150_v52 = vunpack.c.l.bf16 %v5608_v35 }
 0x147   : > { %v5151_v54 = vunpack.c.h.bf16 %v5608_v35  ;;  %v2553_v57 = vsel %vm2137_vm2, %v2514_v34, %v2552_v49  ;;  %v5154_v58 = vunpack.c.l.bf16 %v5609_v39  ;;  %v5155_v59 = vunpack.c.h.bf16 %v5609_v39 }
 0x148   : > { %v5158_v60 = vunpack.c.l.bf16 %v5610_v43  ;;  %v2554_v0 = vsel %vm2139_vm3, %v2521_v38, %v2553_v57  ;;  %v5159_v1 = vunpack.c.h.bf16 %v5610_v43  ;;  %v5162_v2 = vunpack.c.l.bf16 %v5611_v48 }
 0x149   : > { %v5163_v3 = vunpack.c.h.bf16 %v5611_v48  ;;  %v2555_v4 = vsel %vm2141_vm4, %v2528_v40, %v2554_v0  ;;  %v5166_v5 = vunpack.c.l.bf16 %v5612_v55  ;;  %v5167_v6 = vunpack.c.h.bf16 %v5612_v55 }
 0x14a   : > { %v5170_v7 = vunpack.c.l.bf16 %v5613_v56  ;;  %v2556_v8 = vsel %vm2143_vm5, %v2535_v41, %v2555_v4  ;;  %v5171_v9 = vunpack.c.h.bf16 %v5613_v56  ;;  %v5174_v10 = vunpack.c.l.bf16 %v5614_v63 }
 0x14b   : > { %v5175_v11 = vunpack.c.h.bf16 %v5614_v63  ;;  %v2557_v12 = vsel %vm2145_vm6, %v2542_v42, %v2556_v8  ;;  %v2608_v14 = vmul.f32 %v5146_v47, %v6803_v45  ;;  %v2609_v15 = vmul.f32 %v5147_v51, %v6805_v46 }
 0x14c   : > { %v2610_v17 = vmul.f32 %v5150_v52, %v6803_v45  ;;  %v6821_v18 = vadd.f32 %v2557_v12, %v6780_v20  ;;  %v2611_v19 = vmul.f32 %v5151_v54, %v6805_v46  ;;  %v2612_v21 = vmul.f32 %v5154_v58, %v6803_v45 }
 0x14d   : > { %v2613_v22 = vmul.f32 %v5155_v59, %v6805_v46  ;;  %v2614_v23 = vmul.f32 %v5158_v60, %v6803_v45  ;;  %v2615_v24 = vmul.f32 %v5159_v1, %v6805_v46  ;;  %v2616_v25 = vmul.f32 %v5162_v2, %v6803_v45 }
 0x14e   : > { %v2617_v26 = vmul.f32 %v5163_v3, %v6805_v46  ;;  %v2618_v27 = vmul.f32 %v5166_v5, %v6803_v45  ;;  %v2619_v28 = vmul.f32 %v5167_v6, %v6805_v46  ;;  %v2620_v20 = vmul.f32 %v5170_v7, %v6803_v45 }
 0x14f   : > { %v2621_v29 = vmul.f32 %v5171_v9, %v6805_v46  ;;  %v2622_v30 = vmul.f32 %v5174_v10, %v6803_v45  ;;  %v2623_v31 = vmul.f32 %v5175_v11, %v6805_v46  ;;  %v2624_v32 = vadd.f32 %v2609_v15, %v2608_v14 }
 0x150   : > { %v2631_v33 = vadd.f32 %v2611_v19, %v2610_v17  ;;  %v2638_v34 = vadd.f32 %v2613_v22, %v2612_v21  ;;  %v2645_v35 = vadd.f32 %v2615_v24, %v2614_v23  ;;  %v2652_v38 = vadd.f32 %v2617_v26, %v2616_v25  ;;  %v5615_v26 = vld [vmem:[%s6648_s7 + $0x28] sm:$0xff]  }
 0x151   : > { %v2659_v40 = vadd.f32 %v2619_v28, %v2618_v27  ;;  %v2625_v41 = vrot.slane %v2624_v32, 4  ;;  %v2666_v39 = vadd.f32 %v2621_v29, %v2620_v20  ;;  %v2673_v43 = vadd.f32 %v2623_v31, %v2622_v30  ;;  %v5616_v30 = vld [vmem:[%s6651_s8 + $0x28] sm:$0xff]  }
 0x152   : > { %v2632_v42 = vrot.slane %v2631_v33, 4  ;;  %v2639_v44 = vrot.slane %v2638_v34, 4  ;;  %v2646_v47 = vrot.slane %v2645_v35, 4  ;;  %v2653_v48 = vrot.slane %v2652_v38, 4 }
 0x153   : > { %v2660_v49 = vrot.slane %v2659_v40, 4  ;;  %v2626_v51 = vadd.f32 %v2625_v41, %v2624_v32  ;;  %v2667_v54 = vrot.slane %v2666_v39, 4  ;;  %v2674_v55 = vrot.slane %v2673_v43, 4 }
 0x154   : > { %v2633_v52 = vadd.f32 %v2632_v42, %v2631_v33  ;;  %v2640_v56 = vadd.f32 %v2639_v44, %v2638_v34  ;;  %v2647_v57 = vadd.f32 %v2646_v47, %v2645_v35  ;;  %v2654_v58 = vadd.f32 %v2653_v48, %v2652_v38  ;;  %v5617_v35 = vld [vmem:[%s6651_s8 + $0xa8] sm:$0xff]  }
 0x155   : > { %v2661_v59 = vadd.f32 %v2660_v49, %v2659_v40  ;;  %v2627_v60 = vrot.slane %v2626_v51, 2  ;;  %v2668_v0 = vadd.f32 %v2667_v54, %v2666_v39  ;;  %v2675_v1 = vadd.f32 %v2674_v55, %v2673_v43  ;;  %v5618_v38 = vld [vmem:[%s6651_s8 + $0x128] sm:$0xff]  }
 0x156   : > { %v2634_v63 = vrot.slane %v2633_v52, 2  ;;  %v2641_v2 = vrot.slane %v2640_v56, 2  ;;  %v2648_v3 = vrot.slane %v2647_v57, 2  ;;  %v2655_v4 = vrot.slane %v2654_v58, 2  ;;  %v5619_v43 = vld [vmem:[%s6651_s8 + $0x1a8] sm:$0xff]  }
 0x157   : > { %v2662_v5 = vrot.slane %v2661_v59, 2  ;;  %v2628_v6 = vadd.f32 %v2627_v60, %v2626_v51  ;;  %v2669_v8 = vrot.slane %v2668_v0, 2  ;;  %v2676_v9 = vrot.slane %v2675_v1, 2  ;;  %v5620_v51 = vld [vmem:[%s6651_s8 + $0x228] sm:$0xff]  }
 0x158   : > { %v2635_v7 = vadd.f32 %v2634_v63, %v2633_v52  ;;  %v2642_v10 = vadd.f32 %v2641_v2, %v2640_v56  ;;  %v2649_v11 = vadd.f32 %v2648_v3, %v2647_v57  ;;  %v2656_v12 = vadd.f32 %v2655_v4, %v2654_v58  ;;  %v5621_v52 = vld [vmem:[%s6651_s8 + $0x2a8] sm:$0xff]  }
 0x159   : > { %v2663_v14 = vadd.f32 %v2662_v5, %v2661_v59  ;;  %v2629_v15 = vrot.slane %v2628_v6, 1  ;;  %v2670_v19 = vadd.f32 %v2669_v8, %v2668_v0  ;;  %v2677_v21 = vadd.f32 %v2676_v9, %v2675_v1  ;;  %v5622_v58 = vld [vmem:[%s6651_s8 + $0x328] sm:$0xff]  }
 0x15a   : > { %v2636_v17 = vrot.slane %v2635_v7, 1  ;;  %v2643_v22 = vrot.slane %v2642_v10, 1  ;;  %v2650_v23 = vrot.slane %v2649_v11, 1  ;;  %v2657_v24 = vrot.slane %v2656_v12, 1  ;;  %v5623_v1 = vld [vmem:[%s6651_s8 + $0x3a8] sm:$0xff]  }
 0x15b   : > { %v2664_v25 = vrot.slane %v2663_v14, 1  ;;  %v2630_v27 = vadd.f32 %v2629_v15, %v2628_v6  ;;  %v2671_v20 = vrot.slane %v2670_v19, 1  ;;  %v2678_v29 = vrot.slane %v2677_v21, 1 }
 0x15c   : > { %v2637_v28 = vadd.f32 %v2636_v17, %v2635_v7  ;;  %v2644_v31 = vadd.f32 %v2643_v22, %v2642_v10  ;;  %v2651_v32 = vadd.f32 %v2650_v23, %v2649_v11  ;;  %v2658_v33 = vadd.f32 %v2657_v24, %v2656_v12 }
 0x15d   : > { %v2665_v34 = vadd.f32 %v2664_v25, %v2663_v14  ;;  %v2672_v40 = vadd.f32 %v2671_v20, %v2670_v19  ;;  %v2679_v41 = vadd.f32 %v2678_v29, %v2677_v21  ;;  %v6841_v39 = vunpack.c.l.bf16 %v5615_v26 }
 0x15e   : > { %v2688_v42 = vsel %vm2133_vm0, %v2637_v28, %v2630_v27  ;;  %v6845_v47 = vunpack.c.h.bf16 %v5615_v26  ;;  %v5182_v48 = vunpack.c.l.bf16 %v5616_v30  ;;  %v5183_v49 = vunpack.c.h.bf16 %v5616_v30 }
 0x15f   : > { %v2689_v44 = vsel %vm2135_vm1, %v2644_v31, %v2688_v42  ;;  %v5186_v55 = vunpack.c.l.bf16 %v5617_v35  ;;  %v5187_v56 = vunpack.c.h.bf16 %v5617_v35  ;;  %v5190_v57 = vunpack.c.l.bf16 %v5618_v38 }
 0x160   : > { %v2690_v54 = vsel %vm2137_vm2, %v2651_v32, %v2689_v44  ;;  %v5191_v60 = vunpack.c.h.bf16 %v5618_v38  ;;  %v5194_v63 = vunpack.c.l.bf16 %v5619_v43  ;;  %v5195_v0 = vunpack.c.h.bf16 %v5619_v43 }
 0x161   : > { %v2691_v59 = vsel %vm2139_vm3, %v2658_v33, %v2690_v54  ;;  %v5198_v3 = vunpack.c.l.bf16 %v5620_v51  ;;  %v5199_v4 = vunpack.c.h.bf16 %v5620_v51  ;;  %v5202_v5 = vunpack.c.l.bf16 %v5621_v52 }
 0x162   : > { %v2692_v2 = vsel %vm2141_vm4, %v2665_v34, %v2691_v59  ;;  %v5203_v7 = vunpack.c.h.bf16 %v5621_v52  ;;  %v5206_v8 = vunpack.c.l.bf16 %v5622_v58  ;;  %v5207_v9 = vunpack.c.h.bf16 %v5622_v58 }
 0x163   : > { %v2693_v6 = vsel %vm2143_vm5, %v2672_v40, %v2692_v2  ;;  %v5210_v11 = vunpack.c.l.bf16 %v5623_v1  ;;  %v5211_v12 = vunpack.c.h.bf16 %v5623_v1  ;;  %v2745_v14 = vmul.f32 %v5182_v48, %v6841_v39 }
 0x164   : > { %v2694_v10 = vsel %vm2145_vm6, %v2679_v41, %v2693_v6  ;;  %v2746_v17 = vmul.f32 %v5183_v49, %v6845_v47  ;;  %v2747_v19 = vmul.f32 %v5186_v55, %v6841_v39  ;;  %v2748_v21 = vmul.f32 %v5187_v56, %v6845_v47 }
 0x165   : > { %v6858_v15 = vadd.f32 %v2694_v10, %v6821_v18  ;;  %v2749_v22 = vmul.f32 %v5190_v57, %v6841_v39  ;;  %v2750_v23 = vmul.f32 %v5191_v60, %v6845_v47  ;;  %v2751_v24 = vmul.f32 %v5194_v63, %v6841_v39 }
 0x166   : > { %v2752_v25 = vmul.f32 %v5195_v0, %v6845_v47  ;;  %v2753_v26 = vmul.f32 %v5198_v3, %v6841_v39  ;;  %v2754_v27 = vmul.f32 %v5199_v4, %v6845_v47  ;;  %v2755_v18 = vmul.f32 %v5202_v5, %v6841_v39 }
 0x167   : > { %v2756_v28 = vmul.f32 %v5203_v7, %v6845_v47  ;;  %v2757_v20 = vmul.f32 %v5206_v8, %v6841_v39  ;;  %v2758_v29 = vmul.f32 %v5207_v9, %v6845_v47  ;;  %v2759_v30 = vmul.f32 %v5210_v11, %v6841_v39 }
 0x168   : > { %v2760_v31 = vmul.f32 %v5211_v12, %v6845_v47  ;;  %v2761_v32 = vadd.f32 %v2746_v17, %v2745_v14  ;;  %v2768_v33 = vadd.f32 %v2748_v21, %v2747_v19  ;;  %v2775_v34 = vadd.f32 %v2750_v23, %v2749_v22 }
 0x169   : > { %v2782_v35 = vadd.f32 %v2752_v25, %v2751_v24  ;;  %v2789_v38 = vadd.f32 %v2754_v27, %v2753_v26  ;;  %v2796_v40 = vadd.f32 %v2756_v28, %v2755_v18  ;;  %v2803_v41 = vadd.f32 %v2758_v29, %v2757_v20  ;;  %v5624_v29 = vld [vmem:[%s6648_s7 + $0x30] sm:$0xff]  }
 0x16a   : > { %v2810_v42 = vadd.f32 %v2760_v31, %v2759_v30  ;;  %v2762_v43 = vrot.slane %v2761_v32, 4  ;;  %v2769_v44 = vrot.slane %v2768_v33, 4  ;;  %v2776_v48 = vrot.slane %v2775_v34, 4  ;;  %v5625_v30 = vld [vmem:[%s6651_s8 + $0x30] sm:$0xff]  }
 0x16b   : > { %v2783_v49 = vrot.slane %v2782_v35, 4  ;;  %v2790_v51 = vrot.slane %v2789_v38, 4  ;;  %v2797_v52 = vrot.slane %v2796_v40, 4  ;;  %v2804_v54 = vrot.slane %v2803_v41, 4 }
 0x16c   : > { %v2811_v55 = vrot.slane %v2810_v42, 4  ;;  %v2763_v56 = vadd.f32 %v2762_v43, %v2761_v32  ;;  %v2770_v57 = vadd.f32 %v2769_v44, %v2768_v33  ;;  %v2777_v58 = vadd.f32 %v2776_v48, %v2775_v34  ;;  %v5627_v43 = vld [vmem:[%s6651_s8 + $0x130] sm:$0xff]  }
 0x16d   : > { %v2784_v59 = vadd.f32 %v2783_v49, %v2782_v35  ;;  %v2791_v60 = vadd.f32 %v2790_v51, %v2789_v38  ;;  %v2798_v63 = vadd.f32 %v2797_v52, %v2796_v40  ;;  %v2805_v0 = vadd.f32 %v2804_v54, %v2803_v41  ;;  %v5626_v35 = vld [vmem:[%s6651_s8 + $0xb0] sm:$0xff]  }
 0x16e   : > { %v2812_v1 = vadd.f32 %v2811_v55, %v2810_v42  ;;  %v2764_v2 = vrot.slane %v2763_v56, 2  ;;  %v2771_v3 = vrot.slane %v2770_v57, 2  ;;  %v2778_v4 = vrot.slane %v2777_v58, 2  ;;  %v5628_v44 = vld [vmem:[%s6651_s8 + $0x1b0] sm:$0xff]  }
 0x16f   : > { %v2785_v5 = vrot.slane %v2784_v59, 2  ;;  %v2792_v6 = vrot.slane %v2791_v60, 2  ;;  %v2799_v7 = vrot.slane %v2798_v63, 2  ;;  %v2806_v8 = vrot.slane %v2805_v0, 2  ;;  %v5629_v54 = vld [vmem:[%s6651_s8 + $0x230] sm:$0xff]  }
 0x170   : > { %v2813_v9 = vrot.slane %v2812_v1, 2  ;;  %v2765_v10 = vadd.f32 %v2764_v2, %v2763_v56  ;;  %v2772_v11 = vadd.f32 %v2771_v3, %v2770_v57  ;;  %v2779_v12 = vadd.f32 %v2778_v4, %v2777_v58  ;;  %v5632_v3 = vld [vmem:[%s6651_s8 + $0x3b0] sm:$0xff]  }
 0x171   : > { %v2786_v14 = vadd.f32 %v2785_v5, %v2784_v59  ;;  %v2793_v17 = vadd.f32 %v2792_v6, %v2791_v60  ;;  %v2800_v19 = vadd.f32 %v2799_v7, %v2798_v63  ;;  %v2807_v21 = vadd.f32 %v2806_v8, %v2805_v0  ;;  %v5630_v59 = vld [vmem:[%s6651_s8 + $0x2b0] sm:$0xff]  }
 0x172   : > { %v2814_v22 = vadd.f32 %v2813_v9, %v2812_v1  ;;  %v2766_v23 = vrot.slane %v2765_v10, 1  ;;  %v2773_v24 = vrot.slane %v2772_v11, 1  ;;  %v2780_v25 = vrot.slane %v2779_v12, 1  ;;  %v5631_v60 = vld [vmem:[%s6651_s8 + $0x330] sm:$0xff]  }
 0x173   : > { %v2787_v26 = vrot.slane %v2786_v14, 1  ;;  %v2794_v27 = vrot.slane %v2793_v17, 1  ;;  %v2801_v18 = vrot.slane %v2800_v19, 1  ;;  %v2808_v28 = vrot.slane %v2807_v21, 1 }
 0x174   : > { %v2815_v20 = vrot.slane %v2814_v22, 1  ;;  %v2767_v31 = vadd.f32 %v2766_v23, %v2765_v10  ;;  %v2774_v32 = vadd.f32 %v2773_v24, %v2772_v11  ;;  %v2781_v33 = vadd.f32 %v2780_v25, %v2779_v12 }
 0x175   : > { %v2788_v34 = vadd.f32 %v2787_v26, %v2786_v14  ;;  %v2795_v38 = vadd.f32 %v2794_v27, %v2793_v17  ;;  %v2802_v40 = vadd.f32 %v2801_v18, %v2800_v19  ;;  %v2809_v41 = vadd.f32 %v2808_v28, %v2807_v21 }
 0x176   : > { %v2816_v42 = vadd.f32 %v2815_v20, %v2814_v22  ;;  %v2825_v48 = vsel %vm2133_vm0, %v2774_v32, %v2767_v31  ;;  %v6881_v49 = vunpack.c.l.bf16 %v5624_v29  ;;  %v6883_v51 = vunpack.c.h.bf16 %v5624_v29 }
 0x177   : > { %v5218_v52 = vunpack.c.l.bf16 %v5625_v30  ;;  %v2826_v55 = vsel %vm2135_vm1, %v2781_v33, %v2825_v48  ;;  %v5219_v56 = vunpack.c.h.bf16 %v5625_v30  ;;  %v5222_v57 = vunpack.c.l.bf16 %v5626_v35 }
 0x178   : > { %v5223_v58 = vunpack.c.h.bf16 %v5626_v35  ;;  %v2827_v63 = vsel %vm2137_vm2, %v2788_v34, %v2826_v55  ;;  %v5226_v0 = vunpack.c.l.bf16 %v5627_v43  ;;  %v5227_v1 = vunpack.c.h.bf16 %v5627_v43 }
 0x179   : > { %v5230_v2 = vunpack.c.l.bf16 %v5628_v44  ;;  %v2828_v4 = vsel %vm2139_vm3, %v2795_v38, %v2827_v63  ;;  %v5231_v5 = vunpack.c.h.bf16 %v5628_v44  ;;  %v5234_v6 = vunpack.c.l.bf16 %v5629_v54 }
 0x17a   : > { %v5235_v7 = vunpack.c.h.bf16 %v5629_v54  ;;  %v2829_v8 = vsel %vm2141_vm4, %v2802_v40, %v2828_v4  ;;  %v5238_v9 = vunpack.c.l.bf16 %v5630_v59  ;;  %v5239_v10 = vunpack.c.h.bf16 %v5630_v59 }
 0x17b   : > { %v5242_v11 = vunpack.c.l.bf16 %v5631_v60  ;;  %v2830_v12 = vsel %vm2143_vm5, %v2809_v41, %v2829_v8  ;;  %v5243_v14 = vunpack.c.h.bf16 %v5631_v60  ;;  %v5246_v17 = vunpack.c.l.bf16 %v5632_v3 }
 0x17c   : > { %v5247_v19 = vunpack.c.h.bf16 %v5632_v3  ;;  %v2831_v21 = vsel %vm2145_vm6, %v2816_v42, %v2830_v12  ;;  %v2882_v22 = vmul.f32 %v5218_v52, %v6881_v49  ;;  %v2883_v23 = vmul.f32 %v5219_v56, %v6883_v51 }
 0x17d   : > { %v2884_v24 = vmul.f32 %v5222_v57, %v6881_v49  ;;  %v6899_v25 = vadd.f32 %v2831_v21, %v6858_v15  ;;  %v2885_v26 = vmul.f32 %v5223_v58, %v6883_v51  ;;  %v2886_v27 = vmul.f32 %v5226_v0, %v6881_v49 }
 0x17e   : > { %v2887_v18 = vmul.f32 %v5227_v1, %v6883_v51  ;;  %v2888_v28 = vmul.f32 %v5230_v2, %v6881_v49  ;;  %v2889_v20 = vmul.f32 %v5231_v5, %v6883_v51  ;;  %v2890_v29 = vmul.f32 %v5234_v6, %v6881_v49 }
 0x17f   : > { %v2891_v30 = vmul.f32 %v5235_v7, %v6883_v51  ;;  %v2892_v31 = vmul.f32 %v5238_v9, %v6881_v49  ;;  %v2893_v32 = vmul.f32 %v5239_v10, %v6883_v51  ;;  %v2894_v15 = vmul.f32 %v5242_v11, %v6881_v49 }
 0x180   : > { %v2895_v33 = vmul.f32 %v5243_v14, %v6883_v51  ;;  %v2896_v34 = vmul.f32 %v5246_v17, %v6881_v49  ;;  %v2897_v35 = vmul.f32 %v5247_v19, %v6883_v51  ;;  %v2898_v38 = vadd.f32 %v2883_v23, %v2882_v22 }
 0x181   : > { %v2905_v40 = vadd.f32 %v2885_v26, %v2884_v24  ;;  %v2912_v41 = vadd.f32 %v2887_v18, %v2886_v27  ;;  %v2919_v42 = vadd.f32 %v2889_v20, %v2888_v28  ;;  %v2926_v43 = vadd.f32 %v2891_v30, %v2890_v29 }
 0x182   : > { %v2933_v44 = vadd.f32 %v2893_v32, %v2892_v31  ;;  %v2899_v48 = vrot.slane %v2898_v38, 4  ;;  %v2940_v54 = vadd.f32 %v2895_v33, %v2894_v15  ;;  %v2947_v55 = vadd.f32 %v2897_v35, %v2896_v34  ;;  %v5633_v33 = vld [vmem:[%s6648_s7 + $0x38] sm:$0xff]  }
 0x183   : > { %v2906_v52 = vrot.slane %v2905_v40, 4  ;;  %v2913_v56 = vrot.slane %v2912_v41, 4  ;;  %v2920_v57 = vrot.slane %v2919_v42, 4  ;;  %v2927_v58 = vrot.slane %v2926_v43, 4 }
 0x184   : > { %v2934_v59 = vrot.slane %v2933_v44, 4  ;;  %v2900_v60 = vadd.f32 %v2899_v48, %v2898_v38  ;;  %v2941_v0 = vrot.slane %v2940_v54, 4  ;;  %v2948_v1 = vrot.slane %v2947_v55, 4 }
 0x185   : > { %v2907_v63 = vadd.f32 %v2906_v52, %v2905_v40  ;;  %v2914_v2 = vadd.f32 %v2913_v56, %v2912_v41  ;;  %v2921_v3 = vadd.f32 %v2920_v57, %v2919_v42  ;;  %v2928_v4 = vadd.f32 %v2927_v58, %v2926_v43  ;;  %v5634_v41 = vld [vmem:[%s6651_s8 + $0x38] sm:$0xff]  }
 0x186   : > { %v2935_v5 = vadd.f32 %v2934_v59, %v2933_v44  ;;  %v2901_v6 = vrot.slane %v2900_v60, 2  ;;  %v2942_v8 = vadd.f32 %v2941_v0, %v2940_v54  ;;  %v2949_v9 = vadd.f32 %v2948_v1, %v2947_v55  ;;  %v5635_v52 = vld [vmem:[%s6651_s8 + $0xb8] sm:$0xff]  }
 0x187   : > { %v2908_v7 = vrot.slane %v2907_v63, 2  ;;  %v2915_v10 = vrot.slane %v2914_v2, 2  ;;  %v2922_v11 = vrot.slane %v2921_v3, 2  ;;  %v2929_v12 = vrot.slane %v2928_v4, 2  ;;  %v5636_v54 = vld [vmem:[%s6651_s8 + $0x138] sm:$0xff]  }
 0x188   : > { %v2936_v14 = vrot.slane %v2935_v5, 2  ;;  %v2902_v17 = vadd.f32 %v2901_v6, %v2900_v60  ;;  %v2943_v21 = vrot.slane %v2942_v8, 2  ;;  %v2950_v22 = vrot.slane %v2949_v9, 2  ;;  %v5637_v59 = vld [vmem:[%s6651_s8 + $0x1b8] sm:$0xff]  }
 0x189   : > { %v2909_v19 = vadd.f32 %v2908_v7, %v2907_v63  ;;  %v2916_v23 = vadd.f32 %v2915_v10, %v2914_v2  ;;  %v2923_v24 = vadd.f32 %v2922_v11, %v2921_v3  ;;  %v2930_v26 = vadd.f32 %v2929_v12, %v2928_v4  ;;  %v5638_v2 = vld [vmem:[%s6651_s8 + $0x238] sm:$0xff]  }
 0x18a   : > { %v2937_v27 = vadd.f32 %v2936_v14, %v2935_v5  ;;  %v2903_v18 = vrot.slane %v2902_v17, 1  ;;  %v2944_v20 = vadd.f32 %v2943_v21, %v2942_v8  ;;  %v2951_v29 = vadd.f32 %v2950_v22, %v2949_v9  ;;  %v5639_v3 = vld [vmem:[%s6651_s8 + $0x2b8] sm:$0xff]  }
 0x18b   : > { %v2910_v28 = vrot.slane %v2909_v19, 1  ;;  %v2917_v30 = vrot.slane %v2916_v23, 1  ;;  %v2924_v31 = vrot.slane %v2923_v24, 1  ;;  %v2931_v32 = vrot.slane %v2930_v26, 1  ;;  %v5640_v8 = vld [vmem:[%s6651_s8 + $0x338] sm:$0xff]  }
 0x18c   : > { %v2938_v15 = vrot.slane %v2937_v27, 1  ;;  %v2904_v34 = vadd.f32 %v2903_v18, %v2902_v17  ;;  %v2945_v38 = vrot.slane %v2944_v20, 1  ;;  %v2952_v40 = vrot.slane %v2951_v29, 1  ;;  %v5641_v14 = vld [vmem:[%s6651_s8 + $0x3b8] sm:$0xff]  }
 0x18d   : > { %v2911_v35 = vadd.f32 %v2910_v28, %v2909_v19  ;;  %v2918_v42 = vadd.f32 %v2917_v30, %v2916_v23  ;;  %v2925_v43 = vadd.f32 %v2924_v31, %v2923_v24  ;;  %v2932_v44 = vadd.f32 %v2931_v32, %v2930_v26 }
 0x18e   : > { %v2939_v48 = vadd.f32 %v2938_v15, %v2937_v27  ;;  %v2946_v55 = vadd.f32 %v2945_v38, %v2944_v20  ;;  %v2953_v56 = vadd.f32 %v2952_v40, %v2951_v29  ;;  %v6919_v58 = vunpack.c.l.bf16 %v5633_v33 }
 0x18f   : > { %v2962_v57 = vsel %vm2133_vm0, %v2911_v35, %v2904_v34  ;;  %v6923_v63 = vunpack.c.h.bf16 %v5633_v33  ;;  %v5254_v0 = vunpack.c.l.bf16 %v5634_v41  ;;  %v5255_v1 = vunpack.c.h.bf16 %v5634_v41 }
 0x190   : > { %v2963_v60 = vsel %vm2135_vm1, %v2918_v42, %v2962_v57  ;;  %v5258_v5 = vunpack.c.l.bf16 %v5635_v52  ;;  %v5259_v6 = vunpack.c.h.bf16 %v5635_v52  ;;  %v5262_v7 = vunpack.c.l.bf16 %v5636_v54 }
 0x191   : > { %v2964_v4 = vsel %vm2137_vm2, %v2925_v43, %v2963_v60  ;;  %v5263_v10 = vunpack.c.h.bf16 %v5636_v54  ;;  %v5266_v11 = vunpack.c.l.bf16 %v5637_v59  ;;  %v5267_v12 = vunpack.c.h.bf16 %v5637_v59 }
 0x192   : > { %v2965_v9 = vsel %vm2139_vm3, %v2932_v44, %v2964_v4  ;;  %v5270_v19 = vunpack.c.l.bf16 %v5638_v2  ;;  %v5271_v21 = vunpack.c.h.bf16 %v5638_v2  ;;  %v5274_v22 = vunpack.c.l.bf16 %v5639_v3 }
 0x193   : > { %v2966_v17 = vsel %vm2141_vm4, %v2939_v48, %v2965_v9  ;;  %v5275_v24 = vunpack.c.h.bf16 %v5639_v3  ;;  %v5278_v26 = vunpack.c.l.bf16 %v5640_v8  ;;  %v5279_v27 = vunpack.c.h.bf16 %v5640_v8 }
 0x194   : > { %v2967_v23 = vsel %vm2143_vm5, %v2946_v55, %v2966_v17  ;;  %v5282_v28 = vunpack.c.l.bf16 %v5641_v14  ;;  %v5283_v20 = vunpack.c.h.bf16 %v5641_v14  ;;  %v3019_v29 = vmul.f32 %v5254_v0, %v6919_v58 }
 0x195   : > { %v2968_v18 = vsel %vm2145_vm6, %v2953_v56, %v2967_v23  ;;  %v3020_v31 = vmul.f32 %v5255_v1, %v6923_v63  ;;  %v3021_v32 = vmul.f32 %v5258_v5, %v6919_v58  ;;  %v3022_v15 = vmul.f32 %v5259_v6, %v6923_v63 }
 0x196   : > { %v6936_v30 = vadd.f32 %v2968_v18, %v6899_v25  ;;  %v3023_v33 = vmul.f32 %v5262_v7, %v6919_v58  ;;  %v3024_v34 = vmul.f32 %v5263_v10, %v6923_v63  ;;  %v3025_v35 = vmul.f32 %v5266_v11, %v6919_v58 }
 0x197   : > { %v3026_v38 = vmul.f32 %v5267_v12, %v6923_v63  ;;  %v3027_v40 = vmul.f32 %v5270_v19, %v6919_v58  ;;  %v3028_v41 = vmul.f32 %v5271_v21, %v6923_v63  ;;  %v3029_v25 = vmul.f32 %v5274_v22, %v6919_v58 }
 0x198   : > { %v3030_v42 = vmul.f32 %v5275_v24, %v6923_v63  ;;  %v3031_v43 = vmul.f32 %v5278_v26, %v6919_v58  ;;  %v3032_v44 = vmul.f32 %v5279_v27, %v6923_v63  ;;  %v3033_v48 = vmul.f32 %v5282_v28, %v6919_v58 }
 0x199   : > { %v3034_v52 = vmul.f32 %v5283_v20, %v6923_v63  ;;  %v3035_v54 = vadd.f32 %v3020_v31, %v3019_v29  ;;  %v3042_v55 = vadd.f32 %v3022_v15, %v3021_v32  ;;  %v3049_v56 = vadd.f32 %v3024_v34, %v3023_v33 }
 0x19a   : > { %v3056_v57 = vadd.f32 %v3026_v38, %v3025_v35  ;;  %v3063_v59 = vadd.f32 %v3028_v41, %v3027_v40  ;;  %v3070_v60 = vadd.f32 %v3030_v42, %v3029_v25  ;;  %v3077_v0 = vadd.f32 %v3032_v44, %v3031_v43 }
 0x19b   : > { %v3084_v1 = vadd.f32 %v3034_v52, %v3033_v48  ;;  %v3036_v2 = vrot.slane %v3035_v54, 4  ;;  %v3043_v3 = vrot.slane %v3042_v55, 4  ;;  %v3050_v4 = vrot.slane %v3049_v56, 4 }
 0x19c   : > { %v3057_v5 = vrot.slane %v3056_v57, 4  ;;  %v3064_v6 = vrot.slane %v3063_v59, 4  ;;  %v3071_v7 = vrot.slane %v3070_v60, 4  ;;  %v3078_v8 = vrot.slane %v3077_v0, 4 }
 0x19d   : > { %v3085_v9 = vrot.slane %v3084_v1, 4  ;;  %v3037_v10 = vadd.f32 %v3036_v2, %v3035_v54  ;;  %v3044_v11 = vadd.f32 %v3043_v3, %v3042_v55  ;;  %v3051_v12 = vadd.f32 %v3050_v4, %v3049_v56  ;;  %v5642_v55 = vld [vmem:[%s6648_s7 + $0x40] sm:$0xff]  }
 0x19e   : > { %v3058_v14 = vadd.f32 %v3057_v5, %v3056_v57  ;;  %v3065_v17 = vadd.f32 %v3064_v6, %v3063_v59  ;;  %v3072_v19 = vadd.f32 %v3071_v7, %v3070_v60  ;;  %v3079_v21 = vadd.f32 %v3078_v8, %v3077_v0  ;;  %v5643_v56 = vld [vmem:[%s6651_s8 + $0x40] sm:$0xff]  }
 0x19f   : > { %v3086_v22 = vadd.f32 %v3085_v9, %v3084_v1  ;;  %v3038_v23 = vrot.slane %v3037_v10, 2  ;;  %v3045_v24 = vrot.slane %v3044_v11, 2  ;;  %v3052_v26 = vrot.slane %v3051_v12, 2  ;;  %v5644_v1 = vld [vmem:[%s6651_s8 + $0xc0] sm:$0xff]  }
 0x1a0   : > { %v3059_v27 = vrot.slane %v3058_v14, 2  ;;  %v3066_v18 = vrot.slane %v3065_v17, 2  ;;  %v3073_v28 = vrot.slane %v3072_v19, 2  ;;  %v3080_v20 = vrot.slane %v3079_v21, 2  ;;  %v5645_v6 = vld [vmem:[%s6651_s8 + $0x140] sm:$0xff]  }
 0x1a1   : > { %v3087_v29 = vrot.slane %v3086_v22, 2  ;;  %v3039_v31 = vadd.f32 %v3038_v23, %v3037_v10  ;;  %v3046_v32 = vadd.f32 %v3045_v24, %v3044_v11  ;;  %v3053_v15 = vadd.f32 %v3052_v26, %v3051_v12  ;;  %v5646_v7 = vld [vmem:[%s6651_s8 + $0x1c0] sm:$0xff]  }
 0x1a2   : > { %v3060_v33 = vadd.f32 %v3059_v27, %v3058_v14  ;;  %v3067_v34 = vadd.f32 %v3066_v18, %v3065_v17  ;;  %v3074_v35 = vadd.f32 %v3073_v28, %v3072_v19  ;;  %v3081_v38 = vadd.f32 %v3080_v20, %v3079_v21  ;;  %v5647_v12 = vld [vmem:[%s6651_s8 + $0x240] sm:$0xff]  }
 0x1a3   : > { %v3088_v40 = vadd.f32 %v3087_v29, %v3086_v22  ;;  %v3040_v41 = vrot.slane %v3039_v31, 1  ;;  %v3047_v25 = vrot.slane %v3046_v32, 1  ;;  %v3054_v42 = vrot.slane %v3053_v15, 1  ;;  %v5648_v22 = vld [vmem:[%s6651_s8 + $0x2c0] sm:$0xff]  }
 0x1a4   : > { %v3061_v43 = vrot.slane %v3060_v33, 1  ;;  %v3068_v44 = vrot.slane %v3067_v34, 1  ;;  %v3075_v48 = vrot.slane %v3074_v35, 1  ;;  %v3082_v52 = vrot.slane %v3081_v38, 1  ;;  %v5649_v23 = vld [vmem:[%s6651_s8 + $0x340] sm:$0xff]  }
 0x1a5   : > { %v3089_v54 = vrot.slane %v3088_v40, 1  ;;  %v3041_v57 = vadd.f32 %v3040_v41, %v3039_v31  ;;  %v3048_v59 = vadd.f32 %v3047_v25, %v3046_v32  ;;  %v3055_v60 = vadd.f32 %v3054_v42, %v3053_v15  ;;  %v5650_v28 = vld [vmem:[%s6651_s8 + $0x3c0] sm:$0xff]  }
 0x1a6   : > { %v3062_v0 = vadd.f32 %v3061_v43, %v3060_v33  ;;  %v3069_v2 = vadd.f32 %v3068_v44, %v3067_v34  ;;  %v3076_v3 = vadd.f32 %v3075_v48, %v3074_v35  ;;  %v3083_v4 = vadd.f32 %v3082_v52, %v3081_v38 }
 0x1a7   : > { %v3090_v5 = vadd.f32 %v3089_v54, %v3088_v40  ;;  %v3099_v8 = vsel %vm2133_vm0, %v3048_v59, %v3041_v57  ;;  %v6959_v9 = vunpack.c.l.bf16 %v5642_v55  ;;  %v6961_v10 = vunpack.c.h.bf16 %v5642_v55 }
 0x1a8   : > { %v5290_v11 = vunpack.c.l.bf16 %v5643_v56  ;;  %v3100_v14 = vsel %vm2135_vm1, %v3055_v60, %v3099_v8  ;;  %v5291_v17 = vunpack.c.h.bf16 %v5643_v56  ;;  %v5294_v19 = vunpack.c.l.bf16 %v5644_v1 }
 0x1a9   : > { %v5295_v21 = vunpack.c.h.bf16 %v5644_v1  ;;  %v3101_v24 = vsel %vm2137_vm2, %v3062_v0, %v3100_v14  ;;  %v5298_v26 = vunpack.c.l.bf16 %v5645_v6  ;;  %v5299_v27 = vunpack.c.h.bf16 %v5645_v6 }
 0x1aa   : > { %v5302_v18 = vunpack.c.l.bf16 %v5646_v7  ;;  %v3102_v20 = vsel %vm2139_vm3, %v3069_v2, %v3101_v24  ;;  %v5303_v29 = vunpack.c.h.bf16 %v5646_v7  ;;  %v5306_v31 = vunpack.c.l.bf16 %v5647_v12 }
 0x1ab   : > { %v5307_v32 = vunpack.c.h.bf16 %v5647_v12  ;;  %v3103_v15 = vsel %vm2141_vm4, %v3076_v3, %v3102_v20  ;;  %v5310_v33 = vunpack.c.l.bf16 %v5648_v22  ;;  %v5311_v34 = vunpack.c.h.bf16 %v5648_v22 }
 0x1ac   : > { %v5314_v35 = vunpack.c.l.bf16 %v5649_v23  ;;  %v3104_v38 = vsel %vm2143_vm5, %v3083_v4, %v3103_v15  ;;  %v5315_v40 = vunpack.c.h.bf16 %v5649_v23  ;;  %v5318_v41 = vunpack.c.l.bf16 %v5650_v28 }
 0x1ad   : > { %v5319_v25 = vunpack.c.h.bf16 %v5650_v28  ;;  %v3105_v42 = vsel %vm2145_vm6, %v3090_v5, %v3104_v38  ;;  %v3156_v43 = vmul.f32 %v5290_v11, %v6959_v9  ;;  %v3157_v44 = vmul.f32 %v5291_v17, %v6961_v10 }
 0x1ae   : > { %v3158_v48 = vmul.f32 %v5294_v19, %v6959_v9  ;;  %v6977_v52 = vadd.f32 %v3105_v42, %v6936_v30  ;;  %v3159_v54 = vmul.f32 %v5295_v21, %v6961_v10  ;;  %v3160_v55 = vmul.f32 %v5298_v26, %v6959_v9 }
 0x1af   : > { %v3161_v56 = vmul.f32 %v5299_v27, %v6961_v10  ;;  %v3162_v57 = vmul.f32 %v5302_v18, %v6959_v9  ;;  %v3163_v59 = vmul.f32 %v5303_v29, %v6961_v10  ;;  %v3164_v60 = vmul.f32 %v5306_v31, %v6959_v9 }
 0x1b0   : > { %v3165_v0 = vmul.f32 %v5307_v32, %v6961_v10  ;;  %v3166_v1 = vmul.f32 %v5310_v33, %v6959_v9  ;;  %v3167_v2 = vmul.f32 %v5311_v34, %v6961_v10  ;;  %v3168_v30 = vmul.f32 %v5314_v35, %v6959_v9 }
 0x1b1   : > { %v3169_v3 = vmul.f32 %v5315_v40, %v6961_v10  ;;  %v3170_v4 = vmul.f32 %v5318_v41, %v6959_v9  ;;  %v3171_v5 = vmul.f32 %v5319_v25, %v6961_v10  ;;  %v3172_v6 = vadd.f32 %v3157_v44, %v3156_v43 }
 0x1b2   : > { %v3179_v7 = vadd.f32 %v3159_v54, %v3158_v48  ;;  %v3186_v8 = vadd.f32 %v3161_v56, %v3160_v55  ;;  %v3193_v11 = vadd.f32 %v3163_v59, %v3162_v57  ;;  %v3200_v12 = vadd.f32 %v3165_v0, %v3164_v60 }
 0x1b3   : > { %v3207_v14 = vadd.f32 %v3167_v2, %v3166_v1  ;;  %v3173_v17 = vrot.slane %v3172_v6, 4  ;;  %v3214_v21 = vadd.f32 %v3169_v3, %v3168_v30  ;;  %v3221_v22 = vadd.f32 %v3171_v5, %v3170_v4 }
 0x1b4   : > { %v3180_v19 = vrot.slane %v3179_v7, 4  ;;  %v3187_v23 = vrot.slane %v3186_v8, 4  ;;  %v3194_v24 = vrot.slane %v3193_v11, 4  ;;  %v3201_v26 = vrot.slane %v3200_v12, 4 }
 0x1b5   : > { %v3208_v27 = vrot.slane %v3207_v14, 4  ;;  %v3174_v18 = vadd.f32 %v3173_v17, %v3172_v6  ;;  %v3215_v20 = vrot.slane %v3214_v21, 4  ;;  %v3222_v29 = vrot.slane %v3221_v22, 4  ;;  %v5652_v17 = vld [vmem:[%s6651_s8 + $0x48] sm:$0xff]  }
 0x1b6   : > { %v3181_v28 = vadd.f32 %v3180_v19, %v3179_v7  ;;  %v3188_v31 = vadd.f32 %v3187_v23, %v3186_v8  ;;  %v3195_v32 = vadd.f32 %v3194_v24, %v3193_v11  ;;  %v3202_v15 = vadd.f32 %v3201_v26, %v3200_v12  ;;  %v5651_v7 = vld [vmem:[%s6648_s7 + $0x48] sm:$0xff]  }
 0x1b7   : > { %v3209_v33 = vadd.f32 %v3208_v27, %v3207_v14  ;;  %v3175_v34 = vrot.slane %v3174_v18, 2  ;;  %v3216_v38 = vadd.f32 %v3215_v20, %v3214_v21  ;;  %v3223_v40 = vadd.f32 %v3222_v29, %v3221_v22  ;;  %v5653_v24 = vld [vmem:[%s6651_s8 + $0xc8] sm:$0xff]  }
 0x1b8   : > { %v3182_v35 = vrot.slane %v3181_v28, 2  ;;  %v3189_v41 = vrot.slane %v3188_v31, 2  ;;  %v3196_v25 = vrot.slane %v3195_v32, 2  ;;  %v3203_v42 = vrot.slane %v3202_v15, 2  ;;  %v5654_v26 = vld [vmem:[%s6651_s8 + $0x148] sm:$0xff]  }
 0x1b9   : > { %v3210_v43 = vrot.slane %v3209_v33, 2  ;;  %v3176_v44 = vadd.f32 %v3175_v34, %v3174_v18  ;;  %v3217_v54 = vrot.slane %v3216_v38, 2  ;;  %v3224_v55 = vrot.slane %v3223_v40, 2  ;;  %v5655_v29 = vld [vmem:[%s6651_s8 + $0x1c8] sm:$0xff]  }
 0x1ba   : > { %v3183_v48 = vadd.f32 %v3182_v35, %v3181_v28  ;;  %v3190_v56 = vadd.f32 %v3189_v41, %v3188_v31  ;;  %v3197_v57 = vadd.f32 %v3196_v25, %v3195_v32  ;;  %v3204_v59 = vadd.f32 %v3203_v42, %v3202_v15  ;;  %v5656_v34 = vld [vmem:[%s6651_s8 + $0x248] sm:$0xff]  }
 0x1bb   : > { %v3211_v60 = vadd.f32 %v3210_v43, %v3209_v33  ;;  %v3177_v0 = vrot.slane %v3176_v44, 1  ;;  %v3218_v2 = vadd.f32 %v3217_v54, %v3216_v38  ;;  %v3225_v30 = vadd.f32 %v3224_v55, %v3223_v40  ;;  %v5657_v35 = vld [vmem:[%s6651_s8 + $0x2c8] sm:$0xff]  }
 0x1bc   : > { %v3184_v1 = vrot.slane %v3183_v48, 1  ;;  %v3191_v3 = vrot.slane %v3190_v56, 1  ;;  %v3198_v4 = vrot.slane %v3197_v57, 1  ;;  %v3205_v5 = vrot.slane %v3204_v59, 1  ;;  %v5658_v42 = vld [vmem:[%s6651_s8 + $0x348] sm:$0xff]  }
 0x1bd   : > { %v3212_v6 = vrot.slane %v3211_v60, 1  ;;  %v3178_v8 = vadd.f32 %v3177_v0, %v3176_v44  ;;  %v3219_v12 = vrot.slane %v3218_v2, 1  ;;  %v3226_v14 = vrot.slane %v3225_v30, 1  ;;  %v5659_v55 = vld [vmem:[%s6651_s8 + $0x3c8] sm:$0xff]  }
 0x1be   : > { %v3185_v11 = vadd.f32 %v3184_v1, %v3183_v48  ;;  %v3192_v19 = vadd.f32 %v3191_v3, %v3190_v56  ;;  %v3199_v21 = vadd.f32 %v3198_v4, %v3197_v57  ;;  %v3206_v22 = vadd.f32 %v3205_v5, %v3204_v59 }
 0x1bf   : > { %v3213_v23 = vadd.f32 %v3212_v6, %v3211_v60  ;;  %v3220_v27 = vadd.f32 %v3219_v12, %v3218_v2  ;;  %v3227_v18 = vadd.f32 %v3226_v14, %v3225_v30  ;;  %v6997_v20 = vunpack.c.l.bf16 %v5651_v7 }
 0x1c0   : > { %v3236_v28 = vsel %vm2133_vm0, %v3185_v11, %v3178_v8  ;;  %v7001_v32 = vunpack.c.h.bf16 %v5651_v7  ;;  %v5326_v15 = vunpack.c.l.bf16 %v5652_v17  ;;  %v5327_v33 = vunpack.c.h.bf16 %v5652_v17 }
 0x1c1   : > { %v3237_v31 = vsel %vm2135_vm1, %v3192_v19, %v3236_v28  ;;  %v5330_v40 = vunpack.c.l.bf16 %v5653_v24  ;;  %v5331_v41 = vunpack.c.h.bf16 %v5653_v24  ;;  %v5334_v25 = vunpack.c.l.bf16 %v5654_v26 }
 0x1c2   : > { %v3238_v38 = vsel %vm2137_vm2, %v3199_v21, %v3237_v31  ;;  %v5335_v44 = vunpack.c.h.bf16 %v5654_v26  ;;  %v5338_v48 = vunpack.c.l.bf16 %v5655_v29  ;;  %v5339_v54 = vunpack.c.h.bf16 %v5655_v29 }
 0x1c3   : > { %v3239_v43 = vsel %vm2139_vm3, %v3206_v22, %v3238_v38  ;;  %v5342_v57 = vunpack.c.l.bf16 %v5656_v34  ;;  %v5343_v59 = vunpack.c.h.bf16 %v5656_v34  ;;  %v5346_v60 = vunpack.c.l.bf16 %v5657_v35 }
 0x1c4   : > { %v3240_v56 = vsel %vm2141_vm4, %v3213_v23, %v3239_v43  ;;  %v5347_v1 = vunpack.c.h.bf16 %v5657_v35  ;;  %v5350_v2 = vunpack.c.l.bf16 %v5658_v42  ;;  %v5351_v30 = vunpack.c.h.bf16 %v5658_v42 }
 0x1c5   : > { %v3241_v0 = vsel %vm2143_vm5, %v3220_v27, %v3240_v56  ;;  %v5354_v4 = vunpack.c.l.bf16 %v5659_v55  ;;  %v5355_v5 = vunpack.c.h.bf16 %v5659_v55  ;;  %v3293_v6 = vmul.f32 %v5326_v15, %v6997_v20 }
 0x1c6   : > { %v3242_v3 = vsel %vm2145_vm6, %v3227_v18, %v3241_v0  ;;  %v3294_v8 = vmul.f32 %v5327_v33, %v7001_v32  ;;  %v3295_v11 = vmul.f32 %v5330_v40, %v6997_v20  ;;  %v3296_v12 = vmul.f32 %v5331_v41, %v7001_v32 }
 0x1c7   : > { %v7014_v7 = vadd.f32 %v3242_v3, %v6977_v52  ;;  %v3297_v14 = vmul.f32 %v5334_v25, %v6997_v20  ;;  %v3298_v17 = vmul.f32 %v5335_v44, %v7001_v32  ;;  %v3299_v19 = vmul.f32 %v5338_v48, %v6997_v20 }
 0x1c8   : > { %v3300_v21 = vmul.f32 %v5339_v54, %v7001_v32  ;;  %v3301_v22 = vmul.f32 %v5342_v57, %v6997_v20  ;;  %v3302_v23 = vmul.f32 %v5343_v59, %v7001_v32  ;;  %v3303_v52 = vmul.f32 %v5346_v60, %v6997_v20 }
 0x1c9   : > { %v3304_v24 = vmul.f32 %v5347_v1, %v7001_v32  ;;  %v3305_v26 = vmul.f32 %v5350_v2, %v6997_v20  ;;  %v3306_v27 = vmul.f32 %v5351_v30, %v7001_v32  ;;  %v3307_v18 = vmul.f32 %v5354_v4, %v6997_v20 }
 0x1ca   : > { %v3308_v28 = vmul.f32 %v5355_v5, %v7001_v32  ;;  %v3309_v29 = vadd.f32 %v3294_v8, %v3293_v6  ;;  %v3316_v31 = vadd.f32 %v3296_v12, %v3295_v11  ;;  %v3323_v15 = vadd.f32 %v3298_v17, %v3297_v14 }
 0x1cb   : > { %v3330_v33 = vadd.f32 %v3300_v21, %v3299_v19  ;;  %v3337_v34 = vadd.f32 %v3302_v23, %v3301_v22  ;;  %v3344_v35 = vadd.f32 %v3304_v24, %v3303_v52  ;;  %v3351_v38 = vadd.f32 %v3306_v27, %v3305_v26 }
 0x1cc   : > { %v3358_v40 = vadd.f32 %v3308_v28, %v3307_v18  ;;  %v3310_v41 = vrot.slane %v3309_v29, 4  ;;  %v3317_v25 = vrot.slane %v3316_v31, 4  ;;  %v3324_v42 = vrot.slane %v3323_v15, 4 }
 0x1cd   : > { %v3331_v43 = vrot.slane %v3330_v33, 4  ;;  %v3338_v44 = vrot.slane %v3337_v34, 4  ;;  %v3345_v48 = vrot.slane %v3344_v35, 4  ;;  %v3352_v54 = vrot.slane %v3351_v38, 4 }
 0x1ce   : > { %v3359_v55 = vrot.slane %v3358_v40, 4  ;;  %v3311_v56 = vadd.f32 %v3310_v41, %v3309_v29  ;;  %v3318_v57 = vadd.f32 %v3317_v25, %v3316_v31  ;;  %v3325_v59 = vadd.f32 %v3324_v42, %v3323_v15 }
 0x1cf   : > { %v3332_v60 = vadd.f32 %v3331_v43, %v3330_v33  ;;  %v3339_v0 = vadd.f32 %v3338_v44, %v3337_v34  ;;  %v3346_v1 = vadd.f32 %v3345_v48, %v3344_v35  ;;  %v3353_v2 = vadd.f32 %v3352_v54, %v3351_v38  ;;  %v5660_v35 = vld [vmem:[%s6648_s7 + $0x50] sm:$0xff]  }
 0x1d0   : > { %v3360_v30 = vadd.f32 %v3359_v55, %v3358_v40  ;;  %v3312_v3 = vrot.slane %v3311_v56, 2  ;;  %v3319_v4 = vrot.slane %v3318_v57, 2  ;;  %v3326_v5 = vrot.slane %v3325_v59, 2  ;;  %v5661_v38 = vld [vmem:[%s6651_s8 + $0x50] sm:$0xff]  }
 0x1d1   : > { %v3333_v6 = vrot.slane %v3332_v60, 2  ;;  %v3340_v8 = vrot.slane %v3339_v0, 2  ;;  %v3347_v11 = vrot.slane %v3346_v1, 2  ;;  %v3354_v12 = vrot.slane %v3353_v2, 2  ;;  %v5662_v43 = vld [vmem:[%s6651_s8 + $0xd0] sm:$0xff]  }
 0x1d2   : > { %v3361_v14 = vrot.slane %v3360_v30, 2  ;;  %v3313_v17 = vadd.f32 %v3312_v3, %v3311_v56  ;;  %v3320_v19 = vadd.f32 %v3319_v4, %v3318_v57  ;;  %v3327_v21 = vadd.f32 %v3326_v5, %v3325_v59  ;;  %v5663_v56 = vld [vmem:[%s6651_s8 + $0x150] sm:$0xff]  }
 0x1d3   : > { %v3334_v22 = vadd.f32 %v3333_v6, %v3332_v60  ;;  %v3341_v23 = vadd.f32 %v3340_v8, %v3339_v0  ;;  %v3348_v52 = vadd.f32 %v3347_v11, %v3346_v1  ;;  %v3355_v24 = vadd.f32 %v3354_v12, %v3353_v2  ;;  %v5664_v57 = vld [vmem:[%s6651_s8 + $0x1d0] sm:$0xff]  }
 0x1d4   : > { %v3362_v26 = vadd.f32 %v3361_v14, %v3360_v30  ;;  %v3314_v27 = vrot.slane %v3313_v17, 1  ;;  %v3321_v18 = vrot.slane %v3320_v19, 1  ;;  %v3328_v28 = vrot.slane %v3327_v21, 1  ;;  %v5665_v2 = vld [vmem:[%s6651_s8 + $0x250] sm:$0xff]  }
 0x1d5   : > { %v3335_v29 = vrot.slane %v3334_v22, 1  ;;  %v3342_v31 = vrot.slane %v3341_v23, 1  ;;  %v3349_v15 = vrot.slane %v3348_v52, 1  ;;  %v3356_v33 = vrot.slane %v3355_v24, 1  ;;  %v5666_v6 = vld [vmem:[%s6651_s8 + $0x2d0] sm:$0xff]  }
 0x1d6   : > { %v3363_v34 = vrot.slane %v3362_v26, 1  ;;  %v3315_v40 = vadd.f32 %v3314_v27, %v3313_v17  ;;  %v3322_v41 = vadd.f32 %v3321_v18, %v3320_v19  ;;  %v3329_v25 = vadd.f32 %v3328_v28, %v3327_v21  ;;  %v5667_v8 = vld [vmem:[%s6651_s8 + $0x350] sm:$0xff]  }
 0x1d7   : > { %v3336_v42 = vadd.f32 %v3335_v29, %v3334_v22  ;;  %v3343_v44 = vadd.f32 %v3342_v31, %v3341_v23  ;;  %v3350_v48 = vadd.f32 %v3349_v15, %v3348_v52  ;;  %v3357_v54 = vadd.f32 %v3356_v33, %v3355_v24  ;;  %v5668_v19 = vld [vmem:[%s6651_s8 + $0x3d0] sm:$0xff]  }
 0x1d8   : > { %v3364_v55 = vadd.f32 %v3363_v34, %v3362_v26  ;;  %v3373_v59 = vsel %vm2133_vm0, %v3322_v41, %v3315_v40  ;;  %v7037_v60 = vunpack.c.l.bf16 %v5660_v35  ;;  %v7039_v0 = vunpack.c.h.bf16 %v5660_v35 }
 0x1d9   : > { %v5362_v1 = vunpack.c.l.bf16 %v5661_v38  ;;  %v3374_v30 = vsel %vm2135_vm1, %v3329_v25, %v3373_v59  ;;  %v5363_v3 = vunpack.c.h.bf16 %v5661_v38  ;;  %v5366_v4 = vunpack.c.l.bf16 %v5662_v43 }
 0x1da   : > { %v5367_v5 = vunpack.c.h.bf16 %v5662_v43  ;;  %v3375_v11 = vsel %vm2137_vm2, %v3336_v42, %v3374_v30  ;;  %v5370_v12 = vunpack.c.l.bf16 %v5663_v56  ;;  %v5371_v14 = vunpack.c.h.bf16 %v5663_v56 }
 0x1db   : > { %v5374_v17 = vunpack.c.l.bf16 %v5664_v57  ;;  %v3376_v21 = vsel %vm2139_vm3, %v3343_v44, %v3375_v11  ;;  %v5375_v22 = vunpack.c.h.bf16 %v5664_v57  ;;  %v5378_v23 = vunpack.c.l.bf16 %v5665_v2 }
 0x1dc   : > { %v5379_v52 = vunpack.c.h.bf16 %v5665_v2  ;;  %v3377_v24 = vsel %vm2141_vm4, %v3350_v48, %v3376_v21  ;;  %v5382_v26 = vunpack.c.l.bf16 %v5666_v6  ;;  %v5383_v27 = vunpack.c.h.bf16 %v5666_v6 }
 0x1dd   : > { %v5386_v18 = vunpack.c.l.bf16 %v5667_v8  ;;  %v3378_v28 = vsel %vm2143_vm5, %v3357_v54, %v3377_v24  ;;  %v5387_v29 = vunpack.c.h.bf16 %v5667_v8  ;;  %v5390_v31 = vunpack.c.l.bf16 %v5668_v19 }
 0x1de   : > { %v5391_v15 = vunpack.c.h.bf16 %v5668_v19  ;;  %v3379_v33 = vsel %vm2145_vm6, %v3364_v55, %v3378_v28  ;;  %v3430_v34 = vmul.f32 %v5362_v1, %v7037_v60  ;;  %v3431_v35 = vmul.f32 %v5363_v3, %v7039_v0 }
 0x1df   : > { %v3432_v38 = vmul.f32 %v5366_v4, %v7037_v60  ;;  %v7055_v40 = vadd.f32 %v3379_v33, %v7014_v7  ;;  %v3433_v41 = vmul.f32 %v5367_v5, %v7039_v0  ;;  %v3434_v25 = vmul.f32 %v5370_v12, %v7037_v60 }
 0x1e0   : > { %v3435_v42 = vmul.f32 %v5371_v14, %v7039_v0  ;;  %v3436_v43 = vmul.f32 %v5374_v17, %v7037_v60  ;;  %v3437_v44 = vmul.f32 %v5375_v22, %v7039_v0  ;;  %v3438_v48 = vmul.f32 %v5378_v23, %v7037_v60 }
 0x1e1   : > { %v3439_v54 = vmul.f32 %v5379_v52, %v7039_v0  ;;  %v3440_v55 = vmul.f32 %v5382_v26, %v7037_v60  ;;  %v3441_v56 = vmul.f32 %v5383_v27, %v7039_v0  ;;  %v3442_v7 = vmul.f32 %v5386_v18, %v7037_v60 }
 0x1e2   : > { %v3443_v57 = vmul.f32 %v5387_v29, %v7039_v0  ;;  %v3444_v59 = vmul.f32 %v5390_v31, %v7037_v60  ;;  %v3445_v1 = vmul.f32 %v5391_v15, %v7039_v0  ;;  %v3446_v2 = vadd.f32 %v3431_v35, %v3430_v34 }
 0x1e3   : > { %v3453_v30 = vadd.f32 %v3433_v41, %v3432_v38  ;;  %v3460_v3 = vadd.f32 %v3435_v42, %v3434_v25  ;;  %v3467_v4 = vadd.f32 %v3437_v44, %v3436_v43  ;;  %v3474_v5 = vadd.f32 %v3439_v54, %v3438_v48 }
 0x1e4   : > { %v3481_v6 = vadd.f32 %v3441_v56, %v3440_v55  ;;  %v3447_v8 = vrot.slane %v3446_v2, 4  ;;  %v3488_v12 = vadd.f32 %v3443_v57, %v3442_v7  ;;  %v3495_v14 = vadd.f32 %v3445_v1, %v3444_v59 }
 0x1e5   : > { %v3454_v11 = vrot.slane %v3453_v30, 4  ;;  %v3461_v17 = vrot.slane %v3460_v3, 4  ;;  %v3468_v19 = vrot.slane %v3467_v4, 4  ;;  %v3475_v21 = vrot.slane %v3474_v5, 4 }
 0x1e6   : > { %v3482_v22 = vrot.slane %v3481_v6, 4  ;;  %v3448_v23 = vadd.f32 %v3447_v8, %v3446_v2  ;;  %v3489_v24 = vrot.slane %v3488_v12, 4  ;;  %v3496_v26 = vrot.slane %v3495_v14, 4 }
 0x1e7   : > { %v3455_v52 = vadd.f32 %v3454_v11, %v3453_v30  ;;  %v3462_v27 = vadd.f32 %v3461_v17, %v3460_v3  ;;  %v3469_v18 = vadd.f32 %v3468_v19, %v3467_v4  ;;  %v3476_v28 = vadd.f32 %v3475_v21, %v3474_v5  ;;  %v5670_v17 = vld [vmem:[%s6651_s8 + $0x58] sm:$0xff]  }
 0x1e8   : > { %v3483_v29 = vadd.f32 %v3482_v22, %v3481_v6  ;;  %v3449_v31 = vrot.slane %v3448_v23, 2  ;;  %v3490_v33 = vadd.f32 %v3489_v24, %v3488_v12  ;;  %v3497_v34 = vadd.f32 %v3496_v26, %v3495_v14  ;;  %v5669_v6 = vld [vmem:[%s6648_s7 + $0x58] sm:$0xff]  }
 0x1e9   : > { %v3456_v15 = vrot.slane %v3455_v52, 2  ;;  %v3463_v35 = vrot.slane %v3462_v27, 2  ;;  %v3470_v38 = vrot.slane %v3469_v18, 2  ;;  %v3477_v41 = vrot.slane %v3476_v28, 2  ;;  %v5672_v24 = vld [vmem:[%s6651_s8 + $0x158] sm:$0xff]  }
 0x1ea   : > { %v3484_v25 = vrot.slane %v3483_v29, 2  ;;  %v3450_v42 = vadd.f32 %v3449_v31, %v3448_v23  ;;  %v3491_v44 = vrot.slane %v3490_v33, 2  ;;  %v3498_v48 = vrot.slane %v3497_v34, 2 }
 0x1eb   : > { %v3457_v43 = vadd.f32 %v3456_v15, %v3455_v52  ;;  %v3464_v54 = vadd.f32 %v3463_v35, %v3462_v27  ;;  %v3471_v55 = vadd.f32 %v3470_v38, %v3469_v18  ;;  %v3478_v56 = vadd.f32 %v3477_v41, %v3476_v28  ;;  %v5671_v52 = vld [vmem:[%s6651_s8 + $0xd8] sm:$0xff]  }
 0x1ec   : > { %v3485_v7 = vadd.f32 %v3484_v25, %v3483_v29  ;;  %v3451_v57 = vrot.slane %v3450_v42, 1  ;;  %v3492_v1 = vadd.f32 %v3491_v44, %v3490_v33  ;;  %v3499_v2 = vadd.f32 %v3498_v48, %v3497_v34  ;;  %v5673_v29 = vld [vmem:[%s6651_s8 + $0x1d8] sm:$0xff]  }
 0x1ed   : > { %v3458_v59 = vrot.slane %v3457_v43, 1  ;;  %v3465_v30 = vrot.slane %v3464_v54, 1  ;;  %v3472_v3 = vrot.slane %v3471_v55, 1  ;;  %v3479_v4 = vrot.slane %v3478_v56, 1  ;;  %v5674_v35 = vld [vmem:[%s6651_s8 + $0x258] sm:$0xff]  }
 0x1ee   : > { %v3486_v5 = vrot.slane %v3485_v7, 1  ;;  %v3452_v8 = vadd.f32 %v3451_v57, %v3450_v42  ;;  %v3493_v12 = vrot.slane %v3492_v1, 1  ;;  %v3500_v14 = vrot.slane %v3499_v2, 1  ;;  %v5675_v38 = vld [vmem:[%s6651_s8 + $0x2d8] sm:$0xff]  }
 0x1ef   : > { %v3459_v11 = vadd.f32 %v3458_v59, %v3457_v43  ;;  %v3466_v19 = vadd.f32 %v3465_v30, %v3464_v54  ;;  %v3473_v21 = vadd.f32 %v3472_v3, %v3471_v55  ;;  %v3480_v22 = vadd.f32 %v3479_v4, %v3478_v56  ;;  %v5676_v44 = vld [vmem:[%s6651_s8 + $0x358] sm:$0xff]  }
 0x1f0   : > { %v3487_v23 = vadd.f32 %v3486_v5, %v3485_v7  ;;  %v3494_v26 = vadd.f32 %v3493_v12, %v3492_v1  ;;  %v3501_v27 = vadd.f32 %v3500_v14, %v3499_v2  ;;  %v7075_v28 = vunpack.c.l.bf16 %v5669_v6  ;;  %v5677_v7 = vld [vmem:[%s6651_s8 + $0x3d8] sm:$0xff]  }
 0x1f1   : > { %v3510_v18 = vsel %vm2133_vm0, %v3459_v11, %v3452_v8  ;;  %v7079_v15 = vunpack.c.h.bf16 %v5669_v6  ;;  %v5398_v33 = vunpack.c.l.bf16 %v5670_v17  ;;  %v5399_v34 = vunpack.c.h.bf16 %v5670_v17 }
 0x1f2   : > { %v3511_v31 = vsel %vm2135_vm1, %v3466_v19, %v3510_v18  ;;  %v5402_v25 = vunpack.c.l.bf16 %v5671_v52  ;;  %v5403_v42 = vunpack.c.h.bf16 %v5671_v52  ;;  %v5406_v43 = vunpack.c.l.bf16 %v5672_v24 }
 0x1f3   : > { %v3512_v41 = vsel %vm2137_vm2, %v3473_v21, %v3511_v31  ;;  %v5407_v54 = vunpack.c.h.bf16 %v5672_v24  ;;  %v5410_v55 = vunpack.c.l.bf16 %v5673_v29  ;;  %v5411_v56 = vunpack.c.h.bf16 %v5673_v29 }
 0x1f4   : > { %v3513_v48 = vsel %vm2139_vm3, %v3480_v22, %v3512_v41  ;;  %v5414_v59 = vunpack.c.l.bf16 %v5674_v35  ;;  %v5415_v1 = vunpack.c.h.bf16 %v5674_v35  ;;  %v5418_v2 = vunpack.c.l.bf16 %v5675_v38 }
 0x1f5   : > { %v3514_v57 = vsel %vm2141_vm4, %v3487_v23, %v3513_v48  ;;  %v5419_v3 = vunpack.c.h.bf16 %v5675_v38  ;;  %v5422_v4 = vunpack.c.l.bf16 %v5676_v44  ;;  %v5423_v5 = vunpack.c.h.bf16 %v5676_v44 }
 0x1f6   : > { %v3515_v30 = vsel %vm2143_vm5, %v3494_v26, %v3514_v57  ;;  %v5426_v8 = vunpack.c.l.bf16 %v5677_v7  ;;  %v5427_v11 = vunpack.c.h.bf16 %v5677_v7  ;;  %v3567_v12 = vmul.f32 %v5398_v33, %v7075_v28 }
 0x1f7   : > { %v3516_v6 = vsel %vm2145_vm6, %v3501_v27, %v3515_v30  ;;  %v3568_v17 = vmul.f32 %v5399_v34, %v7079_v15  ;;  %v3569_v19 = vmul.f32 %v5402_v25, %v7075_v28  ;;  %v3570_v21 = vmul.f32 %v5403_v42, %v7079_v15 }
 0x1f8   : > { %v7092_v14 = vadd.f32 %v3516_v6, %v7055_v40  ;;  %v3571_v22 = vmul.f32 %v5406_v43, %v7075_v28  ;;  %v3572_v23 = vmul.f32 %v5407_v54, %v7079_v15  ;;  %v3573_v52 = vmul.f32 %v5410_v55, %v7075_v28 }
 0x1f9   : > { %v3574_v24 = vmul.f32 %v5411_v56, %v7079_v15  ;;  %v3575_v26 = vmul.f32 %v5414_v59, %v7075_v28  ;;  %v3576_v27 = vmul.f32 %v5415_v1, %v7079_v15  ;;  %v3577_v40 = vmul.f32 %v5418_v2, %v7075_v28 }
 0x1fa   : > { %v3578_v18 = vmul.f32 %v5419_v3, %v7079_v15  ;;  %v3579_v29 = vmul.f32 %v5422_v4, %v7075_v28  ;;  %v3580_v31 = vmul.f32 %v5423_v5, %v7079_v15  ;;  %v3581_v33 = vmul.f32 %v5426_v8, %v7075_v28 }
 0x1fb   : > { %v3582_v34 = vmul.f32 %v5427_v11, %v7079_v15  ;;  %v3583_v35 = vadd.f32 %v3568_v17, %v3567_v12  ;;  %v3590_v38 = vadd.f32 %v3570_v21, %v3569_v19  ;;  %v3597_v41 = vadd.f32 %v3572_v23, %v3571_v22 }
 0x1fc   : > { %v3604_v25 = vadd.f32 %v3574_v24, %v3573_v52  ;;  %v3611_v42 = vadd.f32 %v3576_v27, %v3575_v26  ;;  %v3618_v43 = vadd.f32 %v3578_v18, %v3577_v40  ;;  %v3625_v44 = vadd.f32 %v3580_v31, %v3579_v29 }
 0x1fd   : > { %v3632_v48 = vadd.f32 %v3582_v34, %v3581_v33  ;;  %v3584_v54 = vrot.slane %v3583_v35, 4  ;;  %v3591_v55 = vrot.slane %v3590_v38, 4  ;;  %v3598_v56 = vrot.slane %v3597_v41, 4 }
 0x1fe   : > { %v3605_v7 = vrot.slane %v3604_v25, 4  ;;  %v3612_v57 = vrot.slane %v3611_v42, 4  ;;  %v3619_v59 = vrot.slane %v3618_v43, 4  ;;  %v3626_v1 = vrot.slane %v3625_v44, 4 }
 0x1ff   : > { %v3633_v2 = vrot.slane %v3632_v48, 4  ;;  %v3585_v30 = vadd.f32 %v3584_v54, %v3583_v35  ;;  %v3592_v3 = vadd.f32 %v3591_v55, %v3590_v38  ;;  %v3599_v4 = vadd.f32 %v3598_v56, %v3597_v41  ;;  %v5678_v55 = vld [vmem:[%s6648_s7 + $0x60] sm:$0xff]  }
 0x200   : > { %v3606_v5 = vadd.f32 %v3605_v7, %v3604_v25  ;;  %v3613_v6 = vadd.f32 %v3612_v57, %v3611_v42  ;;  %v3620_v8 = vadd.f32 %v3619_v59, %v3618_v43  ;;  %v3627_v11 = vadd.f32 %v3626_v1, %v3625_v44  ;;  %v5679_v56 = vld [vmem:[%s6651_s8 + $0x60] sm:$0xff]  }
 0x201   : > { %v3634_v12 = vadd.f32 %v3633_v2, %v3632_v48  ;;  %v3586_v17 = vrot.slane %v3585_v30, 2  ;;  %v3593_v19 = vrot.slane %v3592_v3, 2  ;;  %v3600_v21 = vrot.slane %v3599_v4, 2  ;;  %v5680_v2 = vld [vmem:[%s6651_s8 + $0xe0] sm:$0xff]  }
 0x202   : > { %v3607_v22 = vrot.slane %v3606_v5, 2  ;;  %v3614_v23 = vrot.slane %v3613_v6, 2  ;;  %v3621_v52 = vrot.slane %v3620_v8, 2  ;;  %v3628_v24 = vrot.slane %v3627_v11, 2 }
 0x203   : > { %v3635_v26 = vrot.slane %v3634_v12, 2  ;;  %v3587_v27 = vadd.f32 %v3586_v17, %v3585_v30  ;;  %v3594_v40 = vadd.f32 %v3593_v19, %v3592_v3  ;;  %v3601_v18 = vadd.f32 %v3600_v21, %v3599_v4  ;;  %v5683_v21 = vld [vmem:[%s6651_s8 + $0x260] sm:$0xff]  }
 0x204   : > { %v3608_v29 = vadd.f32 %v3607_v22, %v3606_v5  ;;  %v3615_v31 = vadd.f32 %v3614_v23, %v3613_v6  ;;  %v3622_v33 = vadd.f32 %v3621_v52, %v3620_v8  ;;  %v3629_v34 = vadd.f32 %v3628_v24, %v3627_v11  ;;  %v5681_v6 = vld [vmem:[%s6651_s8 + $0x160] sm:$0xff]  }
 0x205   : > { %v3636_v35 = vadd.f32 %v3635_v26, %v3634_v12  ;;  %v3588_v38 = vrot.slane %v3587_v27, 1  ;;  %v3595_v41 = vrot.slane %v3594_v40, 1  ;;  %v3602_v25 = vrot.slane %v3601_v18, 1  ;;  %v5682_v8 = vld [vmem:[%s6651_s8 + $0x1e0] sm:$0xff]  }
 0x206   : > { %v3609_v42 = vrot.slane %v3608_v29, 1  ;;  %v3616_v43 = vrot.slane %v3615_v31, 1  ;;  %v3623_v44 = vrot.slane %v3622_v33, 1  ;;  %v3630_v48 = vrot.slane %v3629_v34, 1  ;;  %v5684_v26 = vld [vmem:[%s6651_s8 + $0x2e0] sm:$0xff]  }
 0x207   : > { %v3637_v54 = vrot.slane %v3636_v35, 1  ;;  %v3589_v7 = vadd.f32 %v3588_v38, %v3587_v27  ;;  %v3596_v57 = vadd.f32 %v3595_v41, %v3594_v40  ;;  %v3603_v59 = vadd.f32 %v3602_v25, %v3601_v18  ;;  %v5685_v27 = vld [vmem:[%s6651_s8 + $0x360] sm:$0xff]  }
 0x208   : > { %v3610_v1 = vadd.f32 %v3609_v42, %v3608_v29  ;;  %v3617_v30 = vadd.f32 %v3616_v43, %v3615_v31  ;;  %v3624_v3 = vadd.f32 %v3623_v44, %v3622_v33  ;;  %v3631_v4 = vadd.f32 %v3630_v48, %v3629_v34  ;;  %v5686_v33 = vld [vmem:[%s6651_s8 + $0x3e0] sm:$0xff]  }
 0x209   : > { %v3638_v5 = vadd.f32 %v3637_v54, %v3636_v35  ;;  %v3647_v11 = vsel %vm2133_vm0, %v3596_v57, %v3589_v7  ;;  %v7115_v12 = vunpack.c.l.bf16 %v5678_v55  ;;  %v7117_v17 = vunpack.c.h.bf16 %v5678_v55 }
 0x20a   : > { %v5434_v19 = vunpack.c.l.bf16 %v5679_v56  ;;  %v3648_v22 = vsel %vm2135_vm1, %v3603_v59, %v3647_v11  ;;  %v5435_v23 = vunpack.c.h.bf16 %v5679_v56  ;;  %v5438_v52 = vunpack.c.l.bf16 %v5680_v2 }
 0x20b   : > { %v5439_v24 = vunpack.c.h.bf16 %v5680_v2  ;;  %v3649_v40 = vsel %vm2137_vm2, %v3610_v1, %v3648_v22  ;;  %v5442_v18 = vunpack.c.l.bf16 %v5681_v6  ;;  %v5443_v29 = vunpack.c.h.bf16 %v5681_v6 }
 0x20c   : > { %v5446_v31 = vunpack.c.l.bf16 %v5682_v8  ;;  %v3650_v34 = vsel %vm2139_vm3, %v3617_v30, %v3649_v40  ;;  %v5447_v35 = vunpack.c.h.bf16 %v5682_v8  ;;  %v5450_v38 = vunpack.c.l.bf16 %v5683_v21 }
 0x20d   : > { %v5451_v41 = vunpack.c.h.bf16 %v5683_v21  ;;  %v3651_v25 = vsel %vm2141_vm4, %v3624_v3, %v3650_v34  ;;  %v5454_v42 = vunpack.c.l.bf16 %v5684_v26  ;;  %v5455_v43 = vunpack.c.h.bf16 %v5684_v26 }
 0x20e   : > { %v5458_v44 = vunpack.c.l.bf16 %v5685_v27  ;;  %v3652_v48 = vsel %vm2143_vm5, %v3631_v4, %v3651_v25  ;;  %v5459_v54 = vunpack.c.h.bf16 %v5685_v27  ;;  %v5462_v55 = vunpack.c.l.bf16 %v5686_v33 }
 0x20f   : > { %v5463_v56 = vunpack.c.h.bf16 %v5686_v33  ;;  %v3653_v7 = vsel %vm2145_vm6, %v3638_v5, %v3652_v48  ;;  %v3704_v57 = vmul.f32 %v5434_v19, %v7115_v12  ;;  %v3705_v59 = vmul.f32 %v5435_v23, %v7117_v17 }
 0x210   : > { %v3706_v1 = vmul.f32 %v5438_v52, %v7115_v12  ;;  %v7133_v2 = vadd.f32 %v3653_v7, %v7092_v14  ;;  %v3707_v30 = vmul.f32 %v5439_v24, %v7117_v17  ;;  %v3708_v3 = vmul.f32 %v5442_v18, %v7115_v12 }
 0x211   : > { %v3709_v4 = vmul.f32 %v5443_v29, %v7117_v17  ;;  %v3710_v6 = vmul.f32 %v5446_v31, %v7115_v12  ;;  %v3711_v8 = vmul.f32 %v5447_v35, %v7117_v17  ;;  %v3712_v5 = vmul.f32 %v5450_v38, %v7115_v12 }
 0x212   : > { %v3713_v11 = vmul.f32 %v5451_v41, %v7117_v17  ;;  %v3714_v19 = vmul.f32 %v5454_v42, %v7115_v12  ;;  %v3715_v21 = vmul.f32 %v5455_v43, %v7117_v17  ;;  %v3716_v14 = vmul.f32 %v5458_v44, %v7115_v12 }
 0x213   : > { %v3717_v22 = vmul.f32 %v5459_v54, %v7117_v17  ;;  %v3718_v23 = vmul.f32 %v5462_v55, %v7115_v12  ;;  %v3719_v52 = vmul.f32 %v5463_v56, %v7117_v17  ;;  %v3720_v24 = vadd.f32 %v3705_v59, %v3704_v57 }
 0x214   : > { %v3727_v26 = vadd.f32 %v3707_v30, %v3706_v1  ;;  %v3734_v27 = vadd.f32 %v3709_v4, %v3708_v3  ;;  %v3741_v40 = vadd.f32 %v3711_v8, %v3710_v6  ;;  %v3748_v18 = vadd.f32 %v3713_v11, %v3712_v5 }
 0x215   : > { %v3755_v29 = vadd.f32 %v3715_v21, %v3714_v19  ;;  %v3721_v31 = vrot.slane %v3720_v24, 4  ;;  %v3762_v34 = vadd.f32 %v3717_v22, %v3716_v14  ;;  %v3769_v35 = vadd.f32 %v3719_v52, %v3718_v23 }
 0x216   : > { %v3728_v33 = vrot.slane %v3727_v26, 4  ;;  %v3735_v38 = vrot.slane %v3734_v27, 4  ;;  %v3742_v41 = vrot.slane %v3741_v40, 4  ;;  %v3749_v25 = vrot.slane %v3748_v18, 4 }
 0x217   : > { %v3756_v42 = vrot.slane %v3755_v29, 4  ;;  %v3722_v43 = vadd.f32 %v3721_v31, %v3720_v24  ;;  %v3763_v48 = vrot.slane %v3762_v34, 4  ;;  %v3770_v54 = vrot.slane %v3769_v35, 4 }
 0x218   : > { %v3729_v44 = vadd.f32 %v3728_v33, %v3727_v26  ;;  %v3736_v55 = vadd.f32 %v3735_v38, %v3734_v27  ;;  %v3743_v56 = vadd.f32 %v3742_v41, %v3741_v40  ;;  %v3750_v7 = vadd.f32 %v3749_v25, %v3748_v18 }
 0x219   : > { %v3757_v57 = vadd.f32 %v3756_v42, %v3755_v29  ;;  %v3723_v59 = vrot.slane %v3722_v43, 2  ;;  %v3764_v30 = vadd.f32 %v3763_v48, %v3762_v34  ;;  %v3771_v3 = vadd.f32 %v3770_v54, %v3769_v35  ;;  %v5687_v35 = vld [vmem:[%s6648_s7 + $0x68] sm:$0xff]  }
 0x21a   : > { %v3730_v1 = vrot.slane %v3729_v44, 2  ;;  %v3737_v4 = vrot.slane %v3736_v55, 2  ;;  %v3744_v6 = vrot.slane %v3743_v56, 2  ;;  %v3751_v8 = vrot.slane %v3750_v7, 2 }
 0x21b   : > { %v3758_v5 = vrot.slane %v3757_v57, 2  ;;  %v3724_v11 = vadd.f32 %v3723_v59, %v3722_v43  ;;  %v3765_v21 = vrot.slane %v3764_v30, 2  ;;  %v3772_v14 = vrot.slane %v3771_v3, 2  ;;  %v5688_v43 = vld [vmem:[%s6651_s8 + $0x68] sm:$0xff]  }
 0x21c   : > { %v3731_v19 = vadd.f32 %v3730_v1, %v3729_v44  ;;  %v3738_v22 = vadd.f32 %v3737_v4, %v3736_v55  ;;  %v3745_v23 = vadd.f32 %v3744_v6, %v3743_v56  ;;  %v3752_v52 = vadd.f32 %v3751_v8, %v3750_v7  ;;  %v5689_v56 = vld [vmem:[%s6651_s8 + $0xe8] sm:$0xff]   ;;  %v5888_v4 = vld [vmem:[%s7490_s1 + $0x40] sm:$0xff]   ;;  %v5890_v8 = vld [vmem:[%s7490_s1 + $0x48] sm:$0xff]  }
 0x21d   : > { %v3759_v24 = vadd.f32 %v3758_v5, %v3757_v57  ;;  %v3725_v26 = vrot.slane %v3724_v11, 1  ;;  %v3766_v40 = vadd.f32 %v3765_v21, %v3764_v30  ;;  %v3773_v18 = vadd.f32 %v3772_v14, %v3771_v3  ;;  %v5690_v7 = vld [vmem:[%s6651_s8 + $0x168] sm:$0xff]   ;;  %v5889_v6 = vld [vmem:[%s7490_s1] sm:$0xff]   ;;  %5830 = vmatprep.subr.bf16.mxu1 %v5888_v4  ;;  %5714 = vmatprep.subr.bf16.mxu0 %v5888_v4 }
 0x21e   : > { %v3732_v27 = vrot.slane %v3731_v19, 1  ;;  %v3739_v29 = vrot.slane %v3738_v22, 1  ;;  %v3746_v31 = vrot.slane %v3745_v23, 1  ;;  %v3753_v33 = vrot.slane %v3752_v52, 1  ;;  %v5691_v57 = vld [vmem:[%s6651_s8 + $0x1e8] sm:$0xff]   ;;  %5838 = vmatpush3.bf16.msra.mxu1 %v5889_v6  ;;  %5715 = vmatpush3.bf16.msra.mxu0 %v5889_v6 }
 0x21f   : > { %v3760_v34 = vrot.slane %v3759_v24, 1  ;;  %v3726_v38 = vadd.f32 %v3725_v26, %v3724_v11  ;;  %v3767_v25 = vrot.slane %v3766_v40, 1  ;;  %v3774_v42 = vrot.slane %v3773_v18, 1  ;;  %v5692_v14 = vld [vmem:[%s6651_s8 + $0x268] sm:$0xff]   ;;  %5831 = vmatprep.subr.bf16.mxu1 %v5890_v8  ;;  %5716 = vmatprep.subr.bf16.mxu0 %v5890_v8 }
 0x220   : > { %v3733_v41 = vadd.f32 %v3732_v27, %v3731_v19  ;;  %v3740_v44 = vadd.f32 %v3739_v29, %v3738_v22  ;;  %v3747_v48 = vadd.f32 %v3746_v31, %v3745_v23  ;;  %v3754_v54 = vadd.f32 %v3753_v33, %v3752_v52  ;;  %v5693_v22 = vld [vmem:[%s6651_s8 + $0x2e8] sm:$0xff]  }
 0x221   : > { %v3761_v55 = vadd.f32 %v3760_v34, %v3759_v24  ;;  %v3768_v59 = vadd.f32 %v3767_v25, %v3766_v40  ;;  %v3775_v1 = vadd.f32 %v3774_v42, %v3773_v18  ;;  %v7154_v3 = vunpack.c.l.bf16 %v5687_v35  ;;  %v5694_v27 = vld [vmem:[%s6651_s8 + $0x368] sm:$0xff]   ;;  %v5891_v34 = vld [vmem:[%s7490_s1 + $0x8] sm:$0xff]  }
 0x222   : > { %v3784_v30 = vsel %vm2133_vm0, %v3733_v41, %v3726_v38  ;;  %v7167_v11 = vunpack.c.h.bf16 %v5687_v35  ;;  %v5470_v19 = vunpack.c.l.bf16 %v5688_v43  ;;  %v5471_v21 = vunpack.c.h.bf16 %v5688_v43  ;;  %v5695_v33 = vld [vmem:[%s6651_s8 + $0x3e8] sm:$0xff]   ;;  %5839 = vmatpush3.bf16.msra.mxu1 %v5891_v34  ;;  %5717 = vmatpush3.bf16.msra.mxu0 %v5891_v34 }
 0x223   : > { %7502 = vst [vmem:[#allocation5_spill] sm:$0xff] %v7154_v3  ;;  %v3785_v5 = vsel %vm2135_vm1, %v3740_v44, %v3784_v30  ;;  %v5474_v52 = vunpack.c.l.bf16 %v5689_v56  ;;  %v5475_v24 = vunpack.c.h.bf16 %v5689_v56  ;;  %v5478_v26 = vunpack.c.l.bf16 %v5690_v7 }
 0x224   : > { %7503 = vst [vmem:[#allocation6_spill] sm:$0xff] %v7167_v11  ;;  %v3786_v23 = vsel %vm2137_vm2, %v3747_v48, %v3785_v5  ;;  %v5479_v18 = vunpack.c.h.bf16 %v5690_v7  ;;  %v5482_v29 = vunpack.c.l.bf16 %v5691_v57  ;;  %v5483_v31 = vunpack.c.h.bf16 %v5691_v57 }
 0x225   : > { %v3787_v40 = vsel %vm2139_vm3, %v3754_v54, %v3786_v23  ;;  %v5486_v38 = vunpack.c.l.bf16 %v5692_v14  ;;  %v5487_v41 = vunpack.c.h.bf16 %v5692_v14  ;;  %v5490_v25 = vunpack.c.l.bf16 %v5693_v22  ;;  %v5892_v54 = vld [vmem:[%s7490_s1 + $0x50] sm:$0xff]  }
 0x226   : > { %v3788_v35 = vsel %vm2141_vm4, %v3761_v55, %v3787_v40  ;;  %v5491_v43 = vunpack.c.h.bf16 %v5693_v22  ;;  %v5494_v44 = vunpack.c.l.bf16 %v5694_v27  ;;  %v5495_v48 = vunpack.c.h.bf16 %v5694_v27  ;;  %5832 = vmatprep.subr.bf16.mxu1 %v5892_v54  ;;  %5718 = vmatprep.subr.bf16.mxu0 %v5892_v54 }
 0x227   : > { %v3789_v42 = vsel %vm2143_vm5, %v3768_v59, %v3788_v35  ;;  %v5498_v55 = vunpack.c.l.bf16 %v5695_v33  ;;  %v5499_v7 = vunpack.c.h.bf16 %v5695_v33  ;;  %v3841_v57 = vmul.f32 %v5470_v19, %v7154_v3 }
 0x228   : > { %v3790_v56 = vsel %vm2145_vm6, %v3775_v1, %v3789_v42  ;;  %v3842_v30 = vmul.f32 %v5471_v21, %v7167_v11  ;;  %v3843_v4 = vmul.f32 %v5474_v52, %v7154_v3  ;;  %v3844_v6 = vmul.f32 %v5475_v24, %v7167_v11  ;;  %v5893_v1 = vld [vmem:[%s7490_s1 + $0x10] sm:$0xff]   ;;  %v5894_v52 = vld [vmem:[%s7490_s1 + $0x58] sm:$0xff]   ;;  %v5906_v24 = vld [vmem:[%s7197_s28 + $0x64] ss:$8 sps:$4 sm:$0xff]  }
 0x229   : > { %v7200_v59 = vadd.f32 %v3790_v56, %v7133_v2  ;;  %v3845_v8 = vmul.f32 %v5478_v26, %v7154_v3  ;;  %v3846_v5 = vmul.f32 %v5479_v18, %v7167_v11  ;;  %v3847_v2 = vmul.f32 %v5482_v29, %v7154_v3  ;;  %v5909_v29 = vld [vmem:[%s7197_s28 + $0x4] ss:$8 sps:$4 sm:$0xff]   ;;  %5840 = vmatpush3.bf16.msra.mxu1 %v5893_v1 }
 0x22a   : > { %v3848_v19 = vmul.f32 %v5483_v31, %v7167_v11  ;;  %v3849_v21 = vmul.f32 %v5486_v38, %v7154_v3  ;;  %v3850_v14 = vmul.f32 %v5487_v41, %v7167_v11  ;;  %v3851_v22 = vmul.f32 %v5490_v25, %v7154_v3  ;;  %v5895_v38 = vld [vmem:[%s7490_s1 + $0x18] sm:$0xff]   ;;  %5719 = vmatpush3.bf16.msra.mxu0 %v5893_v1 }
 0x22b   : > { %v3852_v23 = vmul.f32 %v5491_v43, %v7167_v11  ;;  %v3853_v26 = vmul.f32 %v5494_v44, %v7154_v3  ;;  %v3854_v27 = vmul.f32 %v5495_v48, %v7167_v11  ;;  %v3855_v40 = vmul.f32 %v5498_v55, %v7154_v3  ;;  %v5896_v44 = vld [vmem:[%s7490_s1 + $0x60] sm:$0xff]   ;;  %5833 = vmatprep.subr.bf16.mxu1 %v5894_v52 }
 0x22c   : > { %v3856_v18 = vmul.f32 %v5499_v7, %v7167_v11  ;;  %v3857_v31 = vadd.f32 %v3842_v30, %v3841_v57  ;;  %v3864_v33 = vadd.f32 %v3844_v6, %v3843_v4  ;;  %v3871_v34 = vadd.f32 %v3846_v5, %v3845_v8  ;;  %5720 = vmatprep.subr.bf16.mxu0 %v5894_v52 }
 0x22d   : > { %v3878_v35 = vadd.f32 %v3848_v19, %v3847_v2  ;;  %v3885_v41 = vadd.f32 %v3850_v14, %v3849_v21  ;;  %v3892_v25 = vadd.f32 %v3852_v23, %v3851_v22  ;;  %v3899_v42 = vadd.f32 %v3854_v27, %v3853_v26  ;;  %1967 = vmatprep.mubr.bf16.mxu1 %v5906_v24  ;;  %v5897_v2 = vld [vmem:[%s7490_s1 + $0x20] sm:$0xff]   ;;  %v5898_v24 = vld [vmem:[%s7490_s1 + $0x68] sm:$0xff]  }
 0x22e   : > { %v3906_v43 = vadd.f32 %v3856_v18, %v3855_v40  ;;  %v3858_v48 = vrot.slane %v3857_v31, 4  ;;  %v3865_v54 = vrot.slane %v3864_v33, 4  ;;  %v3872_v56 = vrot.slane %v3871_v34, 4  ;;  %1919 = vmatprep.mubr.bf16.mxu0 %v5909_v29  ;;  %5841 = vmatpush3.bf16.msra.mxu1 %v5895_v38 }
 0x22f   : > { %v3879_v55 = vrot.slane %v3878_v35, 4  ;;  %v3886_v7 = vrot.slane %v3885_v41, 4  ;;  %v3893_v57 = vrot.slane %v3892_v25, 4  ;;  %v3900_v30 = vrot.slane %v3899_v42, 4  ;;  %5721 = vmatpush3.bf16.msra.mxu0 %v5895_v38  ;;  %5834 = vmatprep.subr.bf16.mxu1 %v5896_v44  ;;  %v5899_v38 = vld [vmem:[%s7490_s1 + $0x28] sm:$0xff]  }
 0x230   : > { %v3907_v4 = vrot.slane %v3906_v43, 4  ;;  %v3859_v6 = vadd.f32 %v3858_v48, %v3857_v31  ;;  %v3866_v8 = vadd.f32 %v3865_v54, %v3864_v33  ;;  %v3873_v5 = vadd.f32 %v3872_v56, %v3871_v34  ;;  %5722 = vmatprep.subr.bf16.mxu0 %v5896_v44 }
 0x231   : > { %v3880_v1 = vadd.f32 %v3879_v55, %v3878_v35  ;;  %v3887_v19 = vadd.f32 %v3886_v7, %v3885_v41  ;;  %v3894_v21 = vadd.f32 %v3893_v57, %v3892_v25  ;;  %v3901_v14 = vadd.f32 %v3900_v30, %v3899_v42  ;;  %v5900_v7 = vld [vmem:[%s7490_s1 + $0x70] sm:$0xff]  }
 0x232   : > { %v3908_v22 = vadd.f32 %v3907_v4, %v3906_v43  ;;  %v3860_v23 = vrot.slane %v3859_v6, 2  ;;  %v3867_v52 = vrot.slane %v3866_v8, 2  ;;  %v3874_v26 = vrot.slane %v3873_v5, 2  ;;  %5842 = vmatpush3.bf16.msra.mxu1 %v5897_v2 }
 0x233   : > { %v3881_v27 = vrot.slane %v3880_v1, 2  ;;  %v3888_v40 = vrot.slane %v3887_v19, 2  ;;  %v3895_v18 = vrot.slane %v3894_v21, 2  ;;  %v3902_v29 = vrot.slane %v3901_v14, 2  ;;  %5723 = vmatpush3.bf16.msra.mxu0 %v5897_v2  ;;  %5835 = vmatprep.subr.bf16.mxu1 %v5898_v24 }
 0x234   : > { %v3909_v31 = vrot.slane %v3908_v22, 2  ;;  %v3861_v33 = vadd.f32 %v3860_v23, %v3859_v6  ;;  %v3868_v34 = vadd.f32 %v3867_v52, %v3866_v8  ;;  %v3875_v35 = vadd.f32 %v3874_v26, %v3873_v5  ;;  %5724 = vmatprep.subr.bf16.mxu0 %v5898_v24  ;;  %v5696_v8 = vld [vmem:[%s6648_s7 + $0x70] sm:$0xff]  }
 0x235   : > { %v3882_v41 = vadd.f32 %v3881_v27, %v3880_v1  ;;  %v3889_v25 = vadd.f32 %v3888_v40, %v3887_v19  ;;  %v3896_v42 = vadd.f32 %v3895_v18, %v3894_v21  ;;  %v3903_v43 = vadd.f32 %v3902_v29, %v3901_v14  ;;  %v5697_v5 = vld [vmem:[%s6651_s8 + $0x70] sm:$0xff]   ;;  %v5902_v18 = vld [vmem:[%s7490_s1 + $0x78] sm:$0xff]  }
 0x236   : > { %v3910_v44 = vadd.f32 %v3909_v31, %v3908_v22  ;;  %v3862_v48 = vrot.slane %v3861_v33, 1  ;;  %v3869_v54 = vrot.slane %v3868_v34, 1  ;;  %v3876_v56 = vrot.slane %v3875_v35, 1  ;;  %v5698_v14 = vld [vmem:[%s6651_s8 + $0xf0] sm:$0xff]   ;;  %5843 = vmatpush3.bf16.msra.mxu1 %v5899_v38  ;;  %v5901_v22 = vld [vmem:[%s7490_s1 + $0x30] sm:$0xff]  }
 0x237   : > { %v3883_v55 = vrot.slane %v3882_v41, 1  ;;  %v3890_v57 = vrot.slane %v3889_v25, 1  ;;  %v3897_v30 = vrot.slane %v3896_v42, 1  ;;  %v3904_v4 = vrot.slane %v3903_v43, 1  ;;  %v5699_v24 = vld [vmem:[%s6651_s8 + $0x170] sm:$0xff]   ;;  %5725 = vmatpush3.bf16.msra.mxu0 %v5899_v38  ;;  %5836 = vmatprep.subr.bf16.mxu1 %v5900_v7 }
 0x238   : > { %v3911_v6 = vrot.slane %v3910_v44, 1  ;;  %v3863_v1 = vadd.f32 %v3862_v48, %v3861_v33  ;;  %v3870_v2 = vadd.f32 %v3869_v54, %v3868_v34  ;;  %v3877_v19 = vadd.f32 %v3876_v56, %v3875_v35  ;;  %v5700_v40 = vld [vmem:[%s6651_s8 + $0x1f0] sm:$0xff]   ;;  %5726 = vmatprep.subr.bf16.mxu0 %v5900_v7 }
 0x239   : > { %v3884_v21 = vadd.f32 %v3883_v55, %v3882_v41  ;;  %v3891_v23 = vadd.f32 %v3890_v57, %v3889_v25  ;;  %v3898_v52 = vadd.f32 %v3897_v30, %v3896_v42  ;;  %v3905_v26 = vadd.f32 %v3904_v4, %v3903_v43  ;;  %v5701_v35 = vld [vmem:[%s6651_s8 + $0x270] sm:$0xff]   ;;  %v5903_v30 = vld [vmem:[%s7490_s1 + $0x38] sm:$0xff]  }
 0x23a   : > { %v3912_v27 = vadd.f32 %v3911_v6, %v3910_v44  ;;  %v3921_v29 = vsel %vm2133_vm0, %v3870_v2, %v3863_v1  ;;  %v7255_v31 = vunpack.c.l.bf16 %v5696_v8  ;;  %v7257_v33 = vunpack.c.h.bf16 %v5696_v8  ;;  %v5702_v43 = vld [vmem:[%s6651_s8 + $0x2f0] sm:$0xff]   ;;  %5844 = vmatpush3.bf16.msra.mxu1 %v5901_v22 }
 0x23b   : > { %v5506_v34 = vunpack.c.l.bf16 %v5697_v5  ;;  %v3922_v41 = vsel %vm2135_vm1, %v3877_v19, %v3921_v29  ;;  %v5507_v25 = vunpack.c.h.bf16 %v5697_v5  ;;  %v5510_v42 = vunpack.c.l.bf16 %v5698_v14  ;;  %v5703_v44 = vld [vmem:[%s6651_s8 + $0x370] sm:$0xff]   ;;  %5727 = vmatpush3.bf16.msra.mxu0 %v5901_v22  ;;  %5837 = vmatprep.subr.bf16.mxu1 %v5902_v18 }
 0x23c   : > { %7505 = vst [vmem:[#allocation7_spill] sm:$0xff] %v7255_v31  ;;  %7506 = vst [vmem:[#allocation8_spill] sm:$0xff] %v7257_v33  ;;  %v5511_v38 = vunpack.c.h.bf16 %v5698_v14  ;;  %v3923_v48 = vsel %vm2137_vm2, %v3884_v21, %v3922_v41  ;;  %v5514_v54 = vunpack.c.l.bf16 %v5699_v24  ;;  %v5515_v56 = vunpack.c.h.bf16 %v5699_v24  ;;  %v5704_v57 = vld [vmem:[%s6651_s8 + $0x3f0] sm:$0xff]   ;;  %5728 = vmatprep.subr.bf16.mxu0 %v5902_v18 }
 0x23d   : > { %v5518_v55 = vunpack.c.l.bf16 %v5700_v40  ;;  %v3924_v7 = vsel %vm2139_vm3, %v3891_v23, %v3923_v48  ;;  %v5519_v4 = vunpack.c.h.bf16 %v5700_v40  ;;  %v5522_v6 = vunpack.c.l.bf16 %v5701_v35  ;;  %v5904_v41 = vld [vmem:[%s7197_s28 + $0x60] ss:$8 sps:$4 sm:$0xff]  }
 0x23e   : > { %v5523_v8 = vunpack.c.h.bf16 %v5701_v35  ;;  %v3925_v5 = vsel %vm2141_vm4, %v3898_v52, %v3924_v7  ;;  %v5526_v1 = vunpack.c.l.bf16 %v5702_v43  ;;  %v5527_v2 = vunpack.c.h.bf16 %v5702_v43  ;;  %5845 = vmatpush3.bf16.msra.mxu1 %v5903_v30  ;;  %v5907_v35 = vld [vmem:[%s7197_s28] ss:$8 sps:$4 sm:$0xff]  }
 0x23f   : > { %v5530_v19 = vunpack.c.l.bf16 %v5703_v44  ;;  %v3926_v21 = vsel %vm2143_vm5, %v3905_v26, %v3925_v5  ;;  %v5531_v14 = vunpack.c.h.bf16 %v5703_v44  ;;  %v5534_v24 = vunpack.c.l.bf16 %v5704_v57  ;;  %5729 = vmatpush3.bf16.msra.mxu0 %v5903_v30 }
 0x240   : > { %v5535_v29 = vunpack.c.h.bf16 %v5704_v57  ;;  %v3927_v23 = vsel %vm2145_vm6, %v3912_v27, %v3926_v21  ;;  %v3978_v22 = vmul.f32 %v5506_v34, %v7255_v31  ;;  %v3979_v40 = vmul.f32 %v5507_v25, %v7257_v33  ;;  %v5910_v27 = vld [vmem:[%s7197_s28 + $0x74] ss:$8 sps:$4 sm:$0xff]  }
 0x241   : > { %v3980_v52 = vmul.f32 %v5510_v42, %v7255_v31  ;;  %v7278_v18 = vadd.f32 %v3927_v23, %v7200_v59  ;;  %v3981_v26 = vmul.f32 %v5511_v38, %v7257_v33  ;;  %v3982_v43 = vmul.f32 %v5514_v54, %v7255_v31  ;;  %v5912_v57 = vld [vmem:[%s7197_s28 + $0x14] ss:$8 sps:$4 sm:$0xff]   ;;  %1968 = vmatmul.mubr.bf16.vlgmr.msra.gmra.mrb[0].mxu1 %v5904_v41 }
 0x242   : > { %v3983_v44 = vmul.f32 %v5515_v56, %v7257_v33  ;;  %v3984_v48 = vmul.f32 %v5518_v55, %v7255_v31  ;;  %v3985_v34 = vmul.f32 %v5519_v4, %v7257_v33  ;;  %v3986_v25 = vmul.f32 %v5522_v6, %v7255_v31  ;;  %1920 = vmatmul.mubr.bf16.vlgmr.msra.gmra.mrb[0].mxu0 %v5907_v35 }
 0x243   : > { %v3987_v42 = vmul.f32 %v5523_v8, %v7257_v33  ;;  %v3988_v59 = vmul.f32 %v5526_v1, %v7255_v31  ;;  %v3989_v7 = vmul.f32 %v5527_v2, %v7257_v33  ;;  %v3990_v38 = vmul.f32 %v5530_v19, %v7255_v31  ;;  %1975 = vmatprep.mubr.bf16.mxu1 %v5910_v27 }
 0x244   : > { %v3991_v54 = vmul.f32 %v5531_v14, %v7257_v33  ;;  %v3992_v56 = vmul.f32 %v5534_v24, %v7255_v31  ;;  %v3993_v55 = vmul.f32 %v5535_v29, %v7257_v33  ;;  %v3994_v30 = vadd.f32 %v3979_v40, %v3978_v22  ;;  %1927 = vmatprep.mubr.bf16.mxu0 %v5912_v57  ;;  %v5914_v29 = vld [vmem:[%s7197_s28 + $0x70] ss:$8 sps:$4 sm:$0xff]  }
 0x245   : > { %v4001_v4 = vadd.f32 %v3981_v26, %v3980_v52  ;;  %v4008_v6 = vadd.f32 %v3983_v44, %v3982_v43  ;;  %v4015_v8 = vadd.f32 %v3985_v34, %v3984_v48  ;;  %v4022_v5 = vadd.f32 %v3987_v42, %v3986_v25  ;;  %v5915_v26 = vld [vmem:[%s7197_s28 + $0x10] ss:$8 sps:$4 sm:$0xff]  }
 0x246   : > { %v4029_v21 = vadd.f32 %v3989_v7, %v3988_v59  ;;  %v3995_v1 = vrot.slane %v3994_v30, 4  ;;  %v4036_v19 = vadd.f32 %v3991_v54, %v3990_v38  ;;  %v4043_v23 = vadd.f32 %v3993_v55, %v3992_v56 }
 0x247   : > { %v4002_v2 = vrot.slane %v4001_v4, 4  ;;  %v4009_v14 = vrot.slane %v4008_v6, 4  ;;  %v4016_v41 = vrot.slane %v4015_v8, 4  ;;  %v4023_v24 = vrot.slane %v4022_v5, 4 }
 0x248   : > { %v4030_v31 = vrot.slane %v4029_v21, 4  ;;  %v3996_v22 = vadd.f32 %v3995_v1, %v3994_v30  ;;  %v4037_v52 = vrot.slane %v4036_v19, 4  ;;  %v4044_v35 = vrot.slane %v4043_v23, 4 }
 0x249   : > { %v4003_v40 = vadd.f32 %v4002_v2, %v4001_v4  ;;  %v4010_v43 = vadd.f32 %v4009_v14, %v4008_v6  ;;  %v4017_v44 = vadd.f32 %v4016_v41, %v4015_v8  ;;  %v4024_v48 = vadd.f32 %v4023_v24, %v4022_v5  ;;  %1976 = vmatmul.mubr.bf16.gmra.mrb[4].mxu1 %v5914_v29  ;;  %v5705_v29 = vld [vmem:[%s6648_s7 + $0x78] sm:$0xff]  }
 0x24a   : > { %v4031_v34 = vadd.f32 %v4030_v31, %v4029_v21  ;;  %v3997_v27 = vrot.slane %v3996_v22, 2  ;;  %v4038_v42 = vadd.f32 %v4037_v52, %v4036_v19  ;;  %v4045_v59 = vadd.f32 %v4044_v35, %v4043_v23  ;;  %1928 = vmatmul.mubr.bf16.gmra.mrb[4].mxu0 %v5915_v26  ;;  %v5706_v26 = vld [vmem:[%s6651_s8 + $0x78] sm:$0xff]  }
 0x24b   : > { %v4004_v25 = vrot.slane %v4003_v40, 2  ;;  %v4011_v7 = vrot.slane %v4010_v43, 2  ;;  %v4018_v57 = vrot.slane %v4017_v44, 2  ;;  %v4025_v38 = vrot.slane %v4024_v48, 2 }
 0x24c   : > { %v4032_v54 = vrot.slane %v4031_v34, 2  ;;  %v3998_v56 = vadd.f32 %v3997_v27, %v3996_v22  ;;  %v4039_v30 = vrot.slane %v4038_v42, 2  ;;  %v4046_v4 = vrot.slane %v4045_v59, 2  ;;  %v5707_v27 = vld [vmem:[%s6651_s8 + $0xf8] sm:$0xff]  }
 0x24d   : > { %v4005_v55 = vadd.f32 %v4004_v25, %v4003_v40  ;;  %v4012_v1 = vadd.f32 %v4011_v7, %v4010_v43  ;;  %v4019_v6 = vadd.f32 %v4018_v57, %v4017_v44  ;;  %v4026_v8 = vadd.f32 %v4025_v38, %v4024_v48  ;;  %v5708_v25 = vld [vmem:[%s6651_s8 + $0x178] sm:$0xff]  }
 0x24e   : > { %v4033_v31 = vadd.f32 %v4032_v54, %v4031_v34  ;;  %v3999_v5 = vrot.slane %v3998_v56, 1  ;;  %v4040_v2 = vadd.f32 %v4039_v30, %v4038_v42  ;;  %v4047_v19 = vadd.f32 %v4046_v4, %v4045_v59  ;;  %v5709_v38 = vld [vmem:[%s6651_s8 + $0x1f8] sm:$0xff]  }
 0x24f   : > { %v4006_v21 = vrot.slane %v4005_v55, 1  ;;  %v4013_v23 = vrot.slane %v4012_v1, 1  ;;  %v4020_v14 = vrot.slane %v4019_v6, 1  ;;  %v4027_v41 = vrot.slane %v4026_v8, 1  ;;  %v5710_v4 = vld [vmem:[%s6651_s8 + $0x278] sm:$0xff]  }
 0x250   : > { %v4034_v24 = vrot.slane %v4033_v31, 1  ;;  %v4000_v22 = vadd.f32 %v3999_v5, %v3998_v56  ;;  %v4041_v52 = vrot.slane %v4040_v2, 1  ;;  %v4048_v35 = vrot.slane %v4047_v19, 1 }
 0x251   : > { %v4007_v40 = vadd.f32 %v4006_v21, %v4005_v55  ;;  %v4014_v43 = vadd.f32 %v4013_v23, %v4012_v1  ;;  %v4021_v44 = vadd.f32 %v4020_v14, %v4019_v6  ;;  %v4028_v48 = vadd.f32 %v4027_v41, %v4026_v8  ;;  %v5711_v1 = vld [vmem:[%s6651_s8 + $0x2f8] sm:$0xff]  }
 0x252   : > { %v4035_v34 = vadd.f32 %v4034_v24, %v4033_v31  ;;  %v4042_v42 = vadd.f32 %v4041_v52, %v4040_v2  ;;  %v4049_v59 = vadd.f32 %v4048_v35, %v4047_v19  ;;  %v7302_v57 = vunpack.c.l.bf16 %v5705_v29  ;;  %v5712_v21 = vld [vmem:[%s6651_s8 + $0x378] sm:$0xff]  }
 0x253   : > { %v4058_v7 = vsel %vm2133_vm0, %v4007_v40, %v4000_v22  ;;  %v7306_v56 = vunpack.c.h.bf16 %v5705_v29  ;;  %v5542_v55 = vunpack.c.l.bf16 %v5706_v26  ;;  %v5543_v30 = vunpack.c.h.bf16 %v5706_v26  ;;  %v5713_v41 = vld [vmem:[%s6651_s8 + $0x3f8] sm:$0xff]  }
 0x254   : > { %7507 = vst [vmem:[#allocation9_spill] sm:$0xff] %v7302_v57  ;;  %v4059_v54 = vsel %vm2135_vm1, %v4014_v43, %v4058_v7  ;;  %v5546_v8 = vunpack.c.l.bf16 %v5707_v27  ;;  %v5547_v31 = vunpack.c.h.bf16 %v5707_v27  ;;  %v5550_v5 = vunpack.c.l.bf16 %v5708_v25 }
 0x255   : > { %v4060_v6 = vsel %vm2137_vm2, %v4021_v44, %v4059_v54  ;;  %v5551_v19 = vunpack.c.h.bf16 %v5708_v25  ;;  %v5554_v23 = vunpack.c.l.bf16 %v5709_v38  ;;  %v5555_v14 = vunpack.c.h.bf16 %v5709_v38 }
 0x256   : > { %v4061_v2 = vsel %vm2139_vm3, %v4028_v48, %v4060_v6  ;;  %v5558_v29 = vunpack.c.l.bf16 %v5710_v4  ;;  %v5559_v22 = vunpack.c.h.bf16 %v5710_v4  ;;  %v5562_v40 = vunpack.c.l.bf16 %v5711_v1 }
 0x257   : > { %v4062_v24 = vsel %vm2141_vm4, %v4035_v34, %v4061_v2  ;;  %v5563_v35 = vunpack.c.h.bf16 %v5711_v1  ;;  %v5566_v26 = vunpack.c.l.bf16 %v5712_v21  ;;  %v5567_v43 = vunpack.c.h.bf16 %v5712_v21 }
 0x258   : > { %v4063_v52 = vsel %vm2143_vm5, %v4042_v42, %v4062_v24  ;;  %v5570_v27 = vunpack.c.l.bf16 %v5713_v41  ;;  %v5571_v7 = vunpack.c.h.bf16 %v5713_v41  ;;  %v4115_v48 = vmul.f32 %v5542_v55, %v7302_v57 }
 0x259   : > { %v4064_v44 = vsel %vm2145_vm6, %v4049_v59, %v4063_v52  ;;  %v4116_v38 = vmul.f32 %v5543_v30, %v7306_v56  ;;  %v4117_v34 = vmul.f32 %v5546_v8, %v7302_v57  ;;  %v4118_v54 = vmul.f32 %v5547_v31, %v7306_v56 }
 0x25a   : > { %v7319_v25 = vadd.f32 %v4064_v44, %v7278_v18  ;;  %v4119_v42 = vmul.f32 %v5550_v5, %v7302_v57  ;;  %v4120_v4 = vmul.f32 %v5551_v19, %v7306_v56  ;;  %v4121_v1 = vmul.f32 %v5554_v23, %v7302_v57 }
 0x25b   : > { %v4122_v59 = vmul.f32 %v5555_v14, %v7306_v56  ;;  %v4123_v6 = vmul.f32 %v5558_v29, %v7302_v57  ;;  %v4124_v55 = vmul.f32 %v5559_v22, %v7306_v56  ;;  %v4125_v18 = vmul.f32 %v5562_v40, %v7302_v57 }
 0x25c   : > { %v4126_v30 = vmul.f32 %v5563_v35, %v7306_v56  ;;  %v4127_v8 = vmul.f32 %v5566_v26, %v7302_v57  ;;  %v4128_v31 = vmul.f32 %v5567_v43, %v7306_v56  ;;  %v4129_v5 = vmul.f32 %v5570_v27, %v7302_v57 }
 0x25d   : > { %v4130_v21 = vmul.f32 %v5571_v7, %v7306_v56  ;;  %v4131_v2 = vadd.f32 %v4116_v38, %v4115_v48  ;;  %v4138_v19 = vadd.f32 %v4118_v54, %v4117_v34  ;;  %v4145_v23 = vadd.f32 %v4120_v4, %v4119_v42 }
 0x25e   : > { %v4152_v14 = vadd.f32 %v4122_v59, %v4121_v1  ;;  %v4159_v41 = vadd.f32 %v4124_v55, %v4123_v6  ;;  %v4166_v24 = vadd.f32 %v4126_v30, %v4125_v18  ;;  %v4173_v29 = vadd.f32 %v4128_v31, %v4127_v8 }
 0x25f   : > { %v4180_v22 = vadd.f32 %v4130_v21, %v4129_v5  ;;  %v4132_v52 = vrot.slane %v4131_v2, 4  ;;  %v4139_v40 = vrot.slane %v4138_v19, 4  ;;  %v4146_v44 = vrot.slane %v4145_v23, 4 }
 0x260   : > { %v4153_v35 = vrot.slane %v4152_v14, 4  ;;  %v4160_v33 = vrot.slane %v4159_v41, 4  ;;  %v4167_v26 = vrot.slane %v4166_v24, 4  ;;  %v4174_v11 = vrot.slane %v4173_v29, 4 }
 0x261   : > { %v4181_v43 = vrot.slane %v4180_v22, 4  ;;  %v4133_v3 = vadd.f32 %v4132_v52, %v4131_v2  ;;  %v4140_v27 = vadd.f32 %v4139_v40, %v4138_v19  ;;  %v4147_v57 = vadd.f32 %v4146_v44, %v4145_v23 }
 0x262   : > { %v4154_v7 = vadd.f32 %v4153_v35, %v4152_v14  ;;  %v4161_v48 = vadd.f32 %v4160_v33, %v4159_v41  ;;  %v4168_v38 = vadd.f32 %v4167_v26, %v4166_v24  ;;  %v4175_v34 = vadd.f32 %v4174_v11, %v4173_v29 }
 0x263   : > { %v4182_v54 = vadd.f32 %v4181_v43, %v4180_v22  ;;  %v4134_v42 = vrot.slane %v4133_v3, 2  ;;  %v4141_v4 = vrot.slane %v4140_v27, 2  ;;  %v4148_v1 = vrot.slane %v4147_v57, 2 }
 0x264   : > { %v4155_v59 = vrot.slane %v4154_v7, 2  ;;  %v4162_v6 = vrot.slane %v4161_v48, 2  ;;  %v4169_v55 = vrot.slane %v4168_v38, 2  ;;  %v4176_v18 = vrot.slane %v4175_v34, 2 }
 0x265   : > { %v4183_v30 = vrot.slane %v4182_v54, 2  ;;  %v4135_v8 = vadd.f32 %v4134_v42, %v4133_v3  ;;  %v4142_v31 = vadd.f32 %v4141_v4, %v4140_v27  ;;  %v4149_v5 = vadd.f32 %v4148_v1, %v4147_v57 }
 0x266   : > { %v4156_v21 = vadd.f32 %v4155_v59, %v4154_v7  ;;  %v4163_v2 = vadd.f32 %v4162_v6, %v4161_v48  ;;  %v4170_v19 = vadd.f32 %v4169_v55, %v4168_v38  ;;  %v4177_v23 = vadd.f32 %v4176_v18, %v4175_v34 }
 0x267   : > { %v4184_v14 = vadd.f32 %v4183_v30, %v4182_v54  ;;  %v4136_v33 = vrot.slane %v4135_v8, 1  ;;  %v4143_v41 = vrot.slane %v4142_v31, 1  ;;  %v4150_v11 = vrot.slane %v4149_v5, 1 }
 0x268   : > { %v4157_v24 = vrot.slane %v4156_v21, 1  ;;  %v4164_v29 = vrot.slane %v4163_v2, 1  ;;  %v4171_v22 = vrot.slane %v4170_v19, 1  ;;  %v4178_v52 = vrot.slane %v4177_v23, 1 }
 0x269   : > { %v4185_v40 = vrot.slane %v4184_v14, 1  ;;  %v4137_v44 = vadd.f32 %v4136_v33, %v4135_v8  ;;  %v4144_v35 = vadd.f32 %v4143_v41, %v4142_v31  ;;  %v4151_v26 = vadd.f32 %v4150_v11, %v4149_v5 }
 0x26a   : > { %v4158_v43 = vadd.f32 %v4157_v24, %v4156_v21  ;;  %v4165_v3 = vadd.f32 %v4164_v29, %v4163_v2  ;;  %v4172_v27 = vadd.f32 %v4171_v22, %v4170_v19  ;;  %v4179_v57 = vadd.f32 %v4178_v52, %v4177_v23 }
 0x26b   : > { %v4186_v7 = vadd.f32 %v4185_v40, %v4184_v14  ;;  %v4195_v48 = vsel %vm2133_vm0, %v4144_v35, %v4137_v44  ;;  %v2150_v38 = vadd.f32 %v6657_v37, %v6655_v36  ;;  %v2287_v34 = vadd.f32 %v6692_v16, %v6688_v13 }
 0x26c   : > { %v2424_v54 = vadd.f32 %v6727_v62, %v6725_v61  ;;  %v4196_v42 = vsel %vm2135_vm1, %v4151_v26, %v4195_v48  ;;  %v2561_v4 = vadd.f32 %v6767_v53, %v6763_v50  ;;  %v2698_v1 = vadd.f32 %v6805_v46, %v6803_v45 }
 0x26d   : > { %v2835_v59 = vadd.f32 %v6845_v47, %v6841_v39  ;;  %v4197_v6 = vsel %vm2137_vm2, %v4158_v43, %v4196_v42  ;;  %v2151_v36 = vrot.slane %v2150_v38, 4  ;;  %v2288_v37 = vrot.slane %v2287_v34, 4 }
 0x26e   : > { %v2425_v55 = vrot.slane %v2424_v54, 4  ;;  %v4198_v13 = vsel %vm2139_vm3, %v4165_v3, %v4197_v6  ;;  %v2562_v16 = vrot.slane %v2561_v4, 4  ;;  %v2699_v61 = vrot.slane %v2698_v1, 4 }
 0x26f   : > { %v2836_v62 = vrot.slane %v2835_v59, 4  ;;  %v4199_v18 = vsel %vm2141_vm4, %v4172_v27, %v4198_v13  ;;  %v2152_v30 = vadd.f32 %v2151_v36, %v2150_v38  ;;  %v2289_v50 = vadd.f32 %v2288_v37, %v2287_v34 }
 0x270   : > { %v2426_v53 = vadd.f32 %v2425_v55, %v2424_v54  ;;  %v4200_v45 = vsel %vm2143_vm5, %v4179_v57, %v4199_v18  ;;  %v2563_v46 = vadd.f32 %v2562_v16, %v2561_v4  ;;  %v2700_v8 = vadd.f32 %v2699_v61, %v2698_v1 }
 0x271   : > { %v2837_v39 = vadd.f32 %v2836_v62, %v2835_v59  ;;  %v4201_v47 = vsel %vm2145_vm6, %v4186_v7, %v4200_v45  ;;  %v2153_v31 = vrot.slane %v2152_v30, 2  ;;  %v2290_v5 = vrot.slane %v2289_v50, 2 }
 0x272   : > { %v2427_v21 = vrot.slane %v2426_v53, 2  ;;  %v4203_v2 = vadd.f32 %v4201_v47, %v7319_v25  ;;  %v2564_v19 = vrot.slane %v2563_v46, 2  ;;  %v2701_v23 = vrot.slane %v2700_v8, 2 }
 0x273   : > { %v2838_v14 = vrot.slane %v2837_v39, 2  ;;  %v2154_v33 = vadd.f32 %v2153_v31, %v2152_v30  ;;  %v2291_v41 = vadd.f32 %v2290_v5, %v2289_v50  ;;  %v2972_v24 = vadd.f32 %v6883_v51, %v6881_v49 }
 0x274   : > { %v2428_v11 = vadd.f32 %v2427_v21, %v2426_v53  ;;  %4223 = vxpose.xlu0.b32.start [1/2] (short) %v4203_v2, 128  ;;  %v2565_v29 = vadd.f32 %v2564_v19, %v2563_v46  ;;  %v2702_v22 = vadd.f32 %v2701_v23, %v2700_v8  ;;  %v3109_v40 = vadd.f32 %v6923_v63, %v6919_v58  ;;  %v7508_v2 = vld [vmem:[#allocation5_spill] sm:$0xff]  ;;  %v7509_v19 = vld [vmem:[#allocation6_spill] sm:$0xff] }
 0x275   : > { %v2839_v52 = vadd.f32 %v2838_v14, %v2837_v39  ;;  %v2155_v44 = vrot.slane %v2154_v33, 1  ;;  %v2292_v35 = vrot.slane %v2291_v41, 1  ;;  %v2973_v25 = vrot.slane %v2972_v24, 4 }
 0x276   : > { %v2429_v26 = vrot.slane %v2428_v11, 1  ;;  %v2566_v43 = vrot.slane %v2565_v29, 1  ;;  %v2703_v3 = vrot.slane %v2702_v22, 1  ;;  %v3110_v57 = vrot.slane %v3109_v40, 4 }
 0x277   : > { %v2840_v27 = vrot.slane %v2839_v52, 1  ;;  %v2156_v7 = vadd.f32 %v2155_v44, %v2154_v33  ;;  %v2293_v48 = vadd.f32 %v2292_v35, %v2291_v41  ;;  %v2974_v34 = vadd.f32 %v2973_v25, %v2972_v24  ;;  %v7511_v24 = vld [vmem:[#allocation8_spill] sm:$0xff] }
 0x278   : > { %v2430_v38 = vadd.f32 %v2429_v26, %v2428_v11  ;;  %v2567_v49 = vadd.f32 %v2566_v43, %v2565_v29  ;;  %v2704_v51 = vadd.f32 %v2703_v3, %v2702_v22  ;;  %v3111_v42 = vadd.f32 %v3110_v57, %v3109_v40  ;;  %v7510_v11 = vld [vmem:[#allocation7_spill] sm:$0xff] }
 0x279   : > { %v2841_v54 = vadd.f32 %v2840_v27, %v2839_v52  ;;  %v2294_v4 = vadd.f32 %v2293_v48, %v2156_v7  ;;  %v2975_v1 = vrot.slane %v2974_v34, 2  ;;  %v3246_v58 = vadd.f32 %v6961_v10, %v6959_v9 }
 0x27a   : > { %v3383_v63 = vadd.f32 %v7001_v32, %v6997_v20  ;;  %v3112_v59 = vrot.slane %v3111_v42, 2  ;;  %v3520_v6 = vadd.f32 %v7039_v0, %v7037_v60  ;;  %v3657_v36 = vadd.f32 %v7079_v15, %v7075_v28 }
 0x27b   : > { %v3794_v37 = vadd.f32 %v7117_v17, %v7115_v12  ;;  %v2431_v55 = vadd.f32 %v2430_v38, %v2294_v4  ;;  %v2976_v13 = vadd.f32 %v2975_v1, %v2974_v34  ;;  %v3247_v16 = vrot.slane %v3246_v58, 4 }
 0x27c   : > { %v3384_v61 = vrot.slane %v3383_v63, 4  ;;  %v3113_v62 = vadd.f32 %v3112_v59, %v3111_v42  ;;  %v3521_v18 = vrot.slane %v3520_v6, 4  ;;  %v3658_v9 = vrot.slane %v3657_v36, 4 }
 0x27d   : > { %v3795_v10 = vrot.slane %v3794_v37, 4  ;;  %v2568_v30 = vadd.f32 %v2567_v49, %v2431_v55  ;;  %v2977_v20 = vrot.slane %v2976_v13, 1  ;;  %v3248_v32 = vadd.f32 %v3247_v16, %v3246_v58 }
 0x27e   : > { %v3385_v50 = vadd.f32 %v3384_v61, %v3383_v63  ;;  %v3114_v53 = vrot.slane %v3113_v62, 1  ;;  %v3522_v60 = vadd.f32 %v3521_v18, %v3520_v6  ;;  %v3659_v0 = vadd.f32 %v3658_v9, %v3657_v36 }
 0x27f   : > { %v3796_v45 = vadd.f32 %v3795_v10, %v3794_v37  ;;  %v2705_v28 = vadd.f32 %v2704_v51, %v2568_v30  ;;  %v2978_v15 = vadd.f32 %v2977_v20, %v2976_v13  ;;  %v3249_v46 = vrot.slane %v3248_v32, 2  ;;  %v7512_v51 = vld [vmem:[#allocation9_spill] sm:$0xff] }
 0x280   : > { %v3386_v12 = vrot.slane %v3385_v50, 2  ;;  %v3115_v17 = vadd.f32 %v3114_v53, %v3113_v62  ;;  %v3523_v8 = vrot.slane %v3522_v60, 2  ;;  %v3660_v39 = vrot.slane %v3659_v0, 2 }
 0x281   : > { %v3797_v47 = vrot.slane %v3796_v45, 2  ;;  %v2842_v31 = vadd.f32 %v2841_v54, %v2705_v28  ;;  %v3250_v5 = vadd.f32 %v3249_v46, %v3248_v32  ;;  %v3931_v23 = vadd.f32 %v7509_v19, %v7508_v2  ;;  %v5916_v46 = vld [vmem:[%s7197_s28 + $0x24] ss:$8 sps:$4 sm:$0xff]  }
 0x282   : > { %v3387_v21 = vadd.f32 %v3386_v12, %v3385_v50  ;;  %v3524_v14 = vadd.f32 %v3523_v8, %v3522_v60  ;;  %v3661_v33 = vadd.f32 %v3660_v39, %v3659_v0  ;;  %v4068_v29 = vadd.f32 %v7511_v24, %v7510_v11  ;;  %v4213_v50 = vld [vmem:[#allocation2 + $0x8] sm:$0x1]  ;;  %v4221_v0 = vld [vmem:[%s7494_s5] sm:$0xff]  ;;  %1935 = vmatprep.mubr.bf16.mxu0 %v5916_v46  ;;  %v5921_v8 = vld [vmem:[%s7197_s28 + $0x30] ss:$8 sps:$4 sm:$0xff]  }
 0x283   : > { %v3798_v41 = vadd.f32 %v3797_v47, %v3796_v45  ;;  %v2979_v22 = vadd.f32 %v2978_v15, %v2842_v31  ;;  %v3251_v52 = vrot.slane %v3250_v5, 1  ;;  %v3932_v44 = vrot.slane %v3931_v23, 4  ;;  %v4222_v45 = vld [vmem:[%s7494_s5 + $0x8] sm:$0x1]  ;;  %v5922_v39 = vld [vmem:[%s7197_s28 + $0x44] ss:$8 sps:$4 sm:$0xff]  }
 0x284   : > { %v3388_v40 = vrot.slane %v3387_v21, 1  ;;  %v3525_v35 = vrot.slane %v3524_v14, 1  ;;  %v3662_v26 = vrot.slane %v3661_v33, 1  ;;  %v4069_v25 = vrot.slane %v4068_v29, 4  ;;  %v5918_v12 = vld [vmem:[%s7197_s28 + $0x20] ss:$8 sps:$4 sm:$0xff]  }
 0x285   : > { %v3116_v43 = vadd.f32 %v3115_v17, %v2979_v22  ;;  %v3252_v3 = vadd.f32 %v3251_v52, %v3250_v5  ;;  %v3933_v57 = vadd.f32 %v3932_v44, %v3931_v23  ;;  %v3799_v7 = vrot.slane %v3798_v41, 1  ;;  %1936 = vmatmul.mubr.bf16.gmra.mrb[8].mxu0 %v5918_v12  ;;  %v5919_v17 = vld [vmem:[%s7197_s28 + $0x34] ss:$8 sps:$4 sm:$0xff]   ;;  %v5924_v47 = vld [vmem:[%s7197_s28 + $0x40] ss:$8 sps:$4 sm:$0xff]  }
 0x286   : > { %v3389_v27 = vadd.f32 %v3388_v40, %v3387_v21  ;;  %v4070_v48 = vadd.f32 %v4069_v25, %v4068_v29  ;;  %v3526_v34 = vadd.f32 %v3525_v35, %v3524_v14  ;;  %v4205_v54 = vadd.f32 %v7306_v56, %v7512_v51  ;;  %1943 = vmatprep.mubr.bf16.mxu0 %v5919_v17  ;;  %v5925_v31 = vld [vmem:[%s7197_s28 + $0x54] ss:$8 sps:$4 sm:$0xff]   ;;  %v5927_v5 = vld [vmem:[%s7197_s28 + $0x50] ss:$8 sps:$4 sm:$0xff]   ;;  %v1625_v19 = vld [vmem:[%s7394_s17 + $0x60] sm:$0xff] }
 0x287   : > { %v3253_v38 = vadd.f32 %v3252_v3, %v3116_v43  ;;  %v3934_v49 = vrot.slane %v3933_v57, 2  ;;  %v3663_v1 = vadd.f32 %v3662_v26, %v3661_v33  ;;  %v3800_v36 = vadd.f32 %v3799_v7, %v3798_v41  ;;  %v1613_v14 = vld [vmem:[%s7394_s17] sm:$0xff]  ;;  %v1626_v22 = vld [vmem:[%s7394_s17 + $0x68] sm:$0xff] }
 0x288   : > { %v4071_v42 = vrot.slane %v4070_v48, 2  ;;  %v4206_v63 = vrot.slane %v4205_v54, 4  ;;  %v5824_v28 = vpack.c.bf16 %v4222_v45, %v4221_v0  ;;  %v1614_v40 = vld [vmem:[%s7394_s17 + $0x8] sm:$0xff]  ;;  %v1617_v12 = vld [vmem:[%s7394_s17 + $0x20] sm:$0xff] }
 0x289   : > { %v3390_v4 = vadd.f32 %v3389_v27, %v3253_v38  ;;  %v3935_v58 = vadd.f32 %v3934_v49, %v3933_v57  ;;  %v1627_v38 = vld [vmem:[%s7394_s17 + $0x70] sm:$0xff] }
 0x28a   : > { %v4072_v59 = vadd.f32 %v4071_v42, %v4070_v48  ;;  %v4207_v55 = vadd.f32 %v4206_v63, %v4205_v54  ;;  %5826 = vmatprep.subr.msk.bf16.mxu1 %vm5825_vm9, %v5824_v28  ;;  %v1615_v49 = vld [vmem:[%s7394_s17 + $0x10] sm:$0xff]  ;;  %v1616_v63 = vld [vmem:[%s7394_s17 + $0x18] sm:$0xff] }
 0x28b   : > { %v3527_v6 = vadd.f32 %v3526_v34, %v3390_v4  ;;  %v3936_v37 = vrot.slane %v3935_v58, 1  ;;  %5829 = vmatpush3.bf16.msk.msra.mxu1 %vm5825_vm9, %v5824_v28 }
 0x28c   : > { %v4073_v13 = vrot.slane %v4072_v59, 1  ;;  %v4208_v62 = vrot.slane %v4207_v55, 2 }
 0x28d   : > { %v3664_v16 = vadd.f32 %v3663_v1, %v3527_v6  ;;  %v3937_v61 = vadd.f32 %v3936_v37, %v3935_v58  ;;  %1944 = vmatmul.mubr.bf16.gmra.mrb[12].mxu0 %v5921_v8 }
 0x28e   : > { %v4074_v9 = vadd.f32 %v4073_v13, %v4072_v59  ;;  %v4209_v10 = vadd.f32 %v4208_v62, %v4207_v55  ;;  %1951 = vmatprep.mubr.bf16.mxu0 %v5922_v39 }
 0x28f   : > { %v3801_v18 = vadd.f32 %v3800_v36, %v3664_v16  ;;  %v1628_v36 = vld [vmem:[%s7394_s17 + $0x78] sm:$0xff] }
 0x290   : > { %v4210_v20 = vrot.slane %v4209_v10, 1 }
 0x291   : > { %v3938_v30 = vadd.f32 %v3937_v61, %v3801_v18 }
 0x292   : > { %v4211_v32 = vadd.f32 %v4210_v20, %v4209_v10 }
 0x293   : > { %v4075_v56 = vadd.f32 %v4074_v9, %v3938_v30 }
 0x295   : > { %v4212_v53 = vadd.f32 %v4211_v32, %v4075_v56  ;;  %1952 = vmatmul.mubr.bf16.gmra.mrb[16].mxu0 %v5924_v47  ;;  %v1618_v47 = vld [vmem:[%s7394_s17 + $0x28] sm:$0xff] }
 0x296   : > { %1959 = vmatprep.mubr.bf16.mxu0 %v5925_v31 }
 0x297   : > { %v4214_v60 = vadd.f32 %v4213_v50, %v4212_v53 }
 0x299   : > { %4215 = vst [vmem:[#allocation2 + $0x8] sm:$0x1] %v4214_v60 }
 0x29d   : > { %1960 = vmatmul.mubr.bf16.gmra.mrb[20].mxu0 %v5927_v5 }
 0x2a0   : > { %v4220_v15 = vld [vmem:[#allocation2 + $0x8] sm:$0x1] }
 0x2a1   : > { %4224 = vxpose.xlu0.b32.end [2/2] (short) %v4220_v15, 128 }
 0x314   : > { %v5766_v21 = vpop.f32.mrb[0].mxu1 }
 0x315   : > { %v5730_v2 = vpop.f32.mrb[0].mxu0  ;;  %v5767_v23 = vpop.f32.mrb[1].mxu1 }
 0x316   : > { %v5731_v33 = vpop.f32.mrb[1].mxu0  ;;  %v5768_v41 = vadd.f32 %v5767_v23, %v5766_v21  ;;  %v5769_v11 = vpop.f32.mrb[2].mxu1  ;;  %v1619_v23 = vld [vmem:[%s7394_s17 + $0x30] sm:$0xff] }
 0x317   : > { %v5732_v24 = vadd.f32 %v5731_v33, %v5730_v2  ;;  %v5733_v29 = vpop.f32.mrb[2].mxu0  ;;  %v5770_v52 = vpop.f32.mrb[3].mxu1 }
 0x318   : > { %v5734_v44 = vpop.f32.mrb[3].mxu0  ;;  %v7400_v35 = vadd.f32 %v5768_v41, %v1625_v19  ;;  %v5771_v26 = vadd.f32 %v5770_v52, %v5769_v11  ;;  %v1620_v11 = vld [vmem:[%s7394_s17 + $0x38] sm:$0xff] }
 0x319   : > { %v7402_v25 = vadd.f32 %v5732_v24, %v1613_v14  ;;  %v5735_v43 = vadd.f32 %v5734_v44, %v5733_v29  ;;  %v1621_v44 = vld [vmem:[%s7394_s17 + $0x40] sm:$0xff] }
 0x31a   : > { %v7404_v3 = vadd.f32 %v5771_v26, %v1626_v22 }
 0x31b   : > { %v7406_v57 = vadd.f32 %v5735_v43, %v1614_v40 }
 0x31c   : > { %v5772_v7 = vpop.f32.mrb[4].mxu1 }
 0x31d   : > { %v4239_v27 = vpop.trf.xlu0  ;;  %v5736_v48 = vpop.f32.mrb[4].mxu0 }
 0x31e   : > { %5800 = vmatprep.mubr.msk.f32.mxu1 %vm4255_vm10, %v4239_v27  ;;  %v5773_v34 = vpop.f32.mrb[5].mxu1  ;;  %v5737_v51 = vpop.f32.mrb[5].mxu0 }
 0x31f   : > { %v5774_v54 = vadd.f32 %v5773_v34, %v5772_v7  ;;  %v5775_v42 = vpop.f32.mrb[6].mxu1  ;;  %v5738_v1 = vadd.f32 %v5737_v51, %v5736_v48  ;;  %v5739_v58 = vpop.f32.mrb[6].mxu0  ;;  %v1622_v7 = vld [vmem:[%s7394_s17 + $0x48] sm:$0xff] }
 0x320   : > { %v5740_v59 = vpop.f32.mrb[7].mxu0  ;;  %v5776_v37 = vpop.f32.mrb[7].mxu1 }
 0x321   : > { %v4240_v4 = vpop.trf.xlu0  ;;  %v7413_v6 = vadd.f32 %v5774_v54, %v1627_v38  ;;  %v7416_v55 = vadd.f32 %v5738_v1, %v1615_v49  ;;  %v5741_v13 = vadd.f32 %v5740_v59, %v5739_v58  ;;  %v5777_v16 = vadd.f32 %v5776_v37, %v5775_v42  ;;  %v1623_v54 = vld [vmem:[%s7394_s17 + $0x50] sm:$0xff]  ;;  %v1624_v58 = vld [vmem:[%s7394_s17 + $0x58] sm:$0xff] }
 0x322   : > { %5801 = vmatmul.mubr.msk.f32.vlgmr.msra.gmra.mrb[8].mxu1 %vm4255_vm10, %v4240_v4 }
 0x323   : > { %v7418_v62 = vadd.f32 %v5741_v13, %v1616_v63  ;;  %v7420_v18 = vadd.f32 %v5777_v16, %v1628_v36 }
 0x325   : > { %v4241_v61 = vpop.trf.xlu0 }
 0x326   : > { %5803 = vmatprep.mubr.msk.f32.mxu1 %vm4255_vm10, %v4241_v61 }
 0x329   : > { %v4242_v9 = vpop.trf.xlu0 }
 0x32a   : > { %5804 = vmatmul.mubr.msk.f32.gmra.mrb[10].mxu1 %vm4255_vm10, %v4242_v9 }
 0x32d   : > { %v4243_v10 = vpop.trf.xlu0 }
 0x32e   : > { %5806 = vmatprep.mubr.msk.f32.mxu1 %vm4255_vm10, %v4243_v10 }
 0x331   : > { %v4244_v30 = vpop.trf.xlu0 }
 0x332   : > { %5807 = vmatmul.mubr.msk.f32.gmra.mrb[12].mxu1 %vm4255_vm10, %v4244_v30 }
 0x335   : > { %v4245_v20 = vpop.trf.xlu0 }
 0x336   : > { %5809 = vmatprep.mubr.msk.f32.mxu1 %vm4255_vm10, %v4245_v20 }
 0x339   : > { %v4246_v56 = vpop.trf.xlu0 }
 0x33a   : > { %5810 = vmatmul.mubr.msk.f32.gmra.mrb[14].mxu1 %vm4255_vm10, %v4246_v56 }
 0x33d   : > { %v4247_v32 = vpop.trf.xlu0 }
 0x33e   : > { %5812 = vmatprep.mubr.msk.f32.mxu1 %vm4255_vm10, %v4247_v32 }
 0x341   : > { %v4248_v50 = vpop.trf.xlu0 }
 0x342   : > { %5813 = vmatmul.mubr.msk.f32.gmra.mrb[16].mxu1 %vm4255_vm10, %v4248_v50 }
 0x345   : > { %v4249_v53 = vpop.trf.xlu0 }
 0x346   : > { %5815 = vmatprep.mubr.msk.f32.mxu1 %vm4255_vm10, %v4249_v53 }
 0x349   : > { %v4250_v60 = vpop.trf.xlu0 }
 0x34a   : > { %5816 = vmatmul.mubr.msk.f32.gmra.mrb[18].mxu1 %vm4255_vm10, %v4250_v60 }
 0x34d   : > { %v4251_v0 = vpop.trf.xlu0 }
 0x34e   : > { %5818 = vmatprep.mubr.msk.f32.mxu1 %vm4255_vm10, %v4251_v0 }
 0x351   : > { %v4252_v45 = vpop.trf.xlu0 }
 0x352   : > { %5819 = vmatmul.mubr.msk.f32.gmra.mrb[20].mxu1 %vm4255_vm10, %v4252_v45 }
 0x355   : > { %v4253_v28 = vpop.trf.xlu0 }
 0x356   : > { %5821 = vmatprep.mubr.msk.f32.mxu1 %vm4255_vm10, %v4253_v28 }
 0x358   : > { %v5742_v46 = vpop.f32.mrb[8].mxu0 }
 0x359   : > { %v4254_v15 = vpop.trf.xlu0  ;;  %v5743_v17 = vpop.f32.mrb[9].mxu0 }
 0x35a   : > { %5822 = vmatmul.mubr.msk.f32.gmra.mrb[22].mxu1 %vm4255_vm10, %v4254_v15  ;;  %v5744_v8 = vadd.f32 %v5743_v17, %v5742_v46  ;;  %v5745_v39 = vpop.f32.mrb[10].mxu0 }
 0x35b   : > { %v5746_v31 = vpop.f32.mrb[11].mxu0 }
 0x35c   : > { %v1988_v5 = vadd.f32 %v5744_v8, %v1617_v12  ;;  %v5747_v21 = vadd.f32 %v5746_v31, %v5745_v39 }
 0x35e   : > { %v1989_v2 = vadd.f32 %v5747_v21, %v1618_v47 }
 0x360   : > { %v5748_v19 = vpop.f32.mrb[12].mxu0 }
 0x361   : > { %v5749_v14 = vpop.f32.mrb[13].mxu0 }
 0x362   : > { %v5750_v33 = vadd.f32 %v5749_v14, %v5748_v19  ;;  %v5751_v41 = vpop.f32.mrb[14].mxu0 }
 0x363   : > { %v5752_v24 = vpop.f32.mrb[15].mxu0 }
 0x364   : > { %v1990_v29 = vadd.f32 %v5750_v33, %v1619_v23  ;;  %v5753_v22 = vadd.f32 %v5752_v24, %v5751_v41 }
 0x366   : > { %v1991_v52 = vadd.f32 %v5753_v22, %v1620_v11 }
 0x368   : > { %v5754_v40 = vpop.f32.mrb[16].mxu0 }
 0x369   : > { %v5755_v26 = vpop.f32.mrb[17].mxu0 }
 0x36a   : > { %v5756_v43 = vadd.f32 %v5755_v26, %v5754_v40  ;;  %v5757_v27 = vpop.f32.mrb[18].mxu0 }
 0x36b   : > { %v5758_v48 = vpop.f32.mrb[19].mxu0 }
 0x36c   : > { %v1992_v38 = vadd.f32 %v5756_v43, %v1621_v44  ;;  %v5759_v34 = vadd.f32 %v5758_v48, %v5757_v27 }
 0x36e   : > { %v1993_v49 = vadd.f32 %v5759_v34, %v1622_v7 }
 0x370   : > { %v5760_v51 = vpop.f32.mrb[20].mxu0 }
 0x371   : > { %v5761_v42 = vpop.f32.mrb[21].mxu0 }
 0x372   : > { %v5762_v4 = vadd.f32 %v5761_v42, %v5760_v51  ;;  %v5763_v1 = vpop.f32.mrb[22].mxu0 }
 0x373   : > { %v5764_v63 = vpop.f32.mrb[23].mxu0 }
 0x374   : > { %v1994_v59 = vadd.f32 %v5762_v4, %v1623_v54  ;;  %v5765_v36 = vadd.f32 %v5764_v63, %v5763_v1 }
 0x376   : > { %v1995_v37 = vadd.f32 %v5765_v36, %v1624_v58 }
 0x3f5   : > { %v5802_v13 = vpop.f32.mrb[8].mxu1 }
 0x3f6   : > { %v4470_v16 = vadd.f32 %v5802_v13, %v7406_v57  ;;  %v4374_v61 = vpop.f32.mrb[9].mxu1 }
 0x3f7   : > { %v4469_v9 = vadd.f32 %v4374_v61, %v7402_v25 }
 0x3f8   : > { %v4486_v10 = vmax.f32 %v4470_v16, 0.0 }
 0x3f9   : > { %v4485_v30 = vmax.f32 %v4469_v9, 0.0 }
 0x3fa   : > { %4502 = vst [vmem:[%s7449_s20 + $0x8] sm:$0xff] %v4486_v10 }
 0x3fb   : > { %4501 = vst [vmem:[%s7449_s20] sm:$0xff] %v4485_v30 }
 0x3fd   : > { %v5805_v20 = vpop.f32.mrb[10].mxu1 }
 0x3fe   : > { %v4472_v57 = vadd.f32 %v5805_v20, %v7418_v62  ;;  %v4384_v56 = vpop.f32.mrb[11].mxu1 }
 0x3ff   : > { %v4471_v32 = vadd.f32 %v4384_v56, %v7416_v55 }
 0x400   : > { %v4488_v50 = vmax.f32 %v4472_v57, 0.0 }
 0x401   : > { %v4487_v53 = vmax.f32 %v4471_v32, 0.0 }
 0x402   : > { %4504 = vst [vmem:[%s7449_s20 + $0x18] sm:$0xff] %v4488_v50 }
 0x403   : > { %4503 = vst [vmem:[%s7449_s20 + $0x10] sm:$0xff] %v4487_v53 }
 0x405   : > { %v5808_v60 = vpop.f32.mrb[12].mxu1 }
 0x406   : > { %v4474_v25 = vadd.f32 %v5808_v60, %v1989_v2  ;;  %v4394_v0 = vpop.f32.mrb[13].mxu1 }
 0x407   : > { %v4473_v45 = vadd.f32 %v4394_v0, %v1988_v5 }
 0x408   : > { %v4490_v28 = vmax.f32 %v4474_v25, 0.0 }
 0x409   : > { %v4489_v15 = vmax.f32 %v4473_v45, 0.0 }
 0x40a   : > { %4506 = vst [vmem:[%s7449_s20 + $0x28] sm:$0xff] %v4490_v28 }
 0x40b   : > { %4505 = vst [vmem:[%s7449_s20 + $0x20] sm:$0xff] %v4489_v15 }
 0x40d   : > { %v5811_v62 = vpop.f32.mrb[14].mxu1 }
 0x40e   : > { %v4476_v46 = vadd.f32 %v5811_v62, %v1991_v52  ;;  %v4404_v12 = vpop.f32.mrb[15].mxu1 }
 0x40f   : > { %v4475_v55 = vadd.f32 %v4404_v12, %v1990_v29 }
 0x410   : > { %v4492_v17 = vmax.f32 %v4476_v46, 0.0 }
 0x411   : > { %v4491_v8 = vmax.f32 %v4475_v55, 0.0 }
 0x412   : > { %4508 = vst [vmem:[%s7449_s20 + $0x38] sm:$0xff] %v4492_v17 }
 0x413   : > { %4507 = vst [vmem:[%s7449_s20 + $0x30] sm:$0xff] %v4491_v8 }
 0x415   : > { %v5814_v39 = vpop.f32.mrb[16].mxu1 }
 0x416   : > { %v4478_v47 = vadd.f32 %v5814_v39, %v1993_v49  ;;  %v4414_v31 = vpop.f32.mrb[17].mxu1 }
 0x417   : > { %v4477_v5 = vadd.f32 %v4414_v31, %v1992_v38 }
 0x418   : > { %v4494_v21 = vmax.f32 %v4478_v47, 0.0 }
 0x419   : > { %v4493_v2 = vmax.f32 %v4477_v5, 0.0 }
 0x41a   : > { %4510 = vst [vmem:[%s7449_s20 + $0x48] sm:$0xff] %v4494_v21 }
 0x41b   : > { %4509 = vst [vmem:[%s7449_s20 + $0x40] sm:$0xff] %v4493_v2 }
 0x41d   : > { %v5817_v19 = vpop.f32.mrb[18].mxu1 }
 0x41e   : > { %v4480_v23 = vadd.f32 %v5817_v19, %v1995_v37  ;;  %v4424_v14 = vpop.f32.mrb[19].mxu1 }
 0x41f   : > { %v4479_v33 = vadd.f32 %v4424_v14, %v1994_v59 }
 0x420   : > { %v4496_v41 = vmax.f32 %v4480_v23, 0.0 }
 0x421   : > { %v4495_v11 = vmax.f32 %v4479_v33, 0.0 }
 0x422   : > { %4512 = vst [vmem:[%s7449_s20 + $0x58] sm:$0xff] %v4496_v41 }
 0x423   : > { %4511 = vst [vmem:[%s7449_s20 + $0x50] sm:$0xff] %v4495_v11 }
 0x425   : > { %v5820_v24 = vpop.f32.mrb[20].mxu1 }
 0x426   : > { %v4482_v29 = vadd.f32 %v5820_v24, %v7404_v3  ;;  %v4434_v22 = vpop.f32.mrb[21].mxu1 }
 0x427   : > { %v4481_v52 = vadd.f32 %v4434_v22, %v7400_v35 }
 0x428   : > { %v4498_v40 = vmax.f32 %v4482_v29, 0.0 }
 0x429   : > { %v4497_v44 = vmax.f32 %v4481_v52, 0.0 }
 0x42a   : > { %4514 = vst [vmem:[%s7449_s20 + $0x68] sm:$0xff] %v4498_v40 }
 0x42b   : > { %4513 = vst [vmem:[%s7449_s20 + $0x60] sm:$0xff] %v4497_v44 }
 0x42d   : > { %v5823_v26 = vpop.f32.mrb[22].mxu1 }
 0x42e   : > { %v4484_v43 = vadd.f32 %v5823_v26, %v7420_v18  ;;  %v4444_v27 = vpop.f32.mrb[23].mxu1 }
 0x42f   : > { %v4483_v7 = vadd.f32 %v4444_v27, %v7413_v6 }
 0x430   : > { %v4500_v48 = vmax.f32 %v4484_v43, 0.0 }
 0x431   : > { %v4499_v38 = vmax.f32 %v4483_v7, 0.0 }
 0x432   : > { %4516 = vst [vmem:[%s7449_s20 + $0x78] sm:$0xff] %v4500_v48 }
 0x433   : > { %4515 = vst [vmem:[%s7449_s20 + $0x70] sm:$0xff] %v4499_v38 }
 0x434 PF: > { %s16_s25 = sadd.s32 1, %s5966_s25   ;;  %s7513_s21 = smov %s5954_s22 }
 0x435   : > { %p13_p10 = scmp.ge.s32.totalorder %s16_s25, 4   ;;  %s7514_s22 = smov %s6044_s30 }
 0x436   : > { %s7515_s23 = smov %s5962_s24  ;;  %s7516_s24 = smov %s7518_s26 }
 0x437   :  { %15 = sbr.rel (!%p13_p10) target bundleno = 3 (0x3), region = 216 }

</bundles_post_ra>
